<compile_context>
chip_gen: v7x
topology: tpu7x:2x2x1
jax: 0.10.0
libtpu: 0.0.40
codegen_flags: <defaults>
</compile_context>

<pallas_src>
import functools
import math

import jax
import jax.numpy as jnp
import numpy as np
from jax import lax
from jax.experimental import pallas as pl
from jax.experimental.pallas import tpu as pltpu


# ----------------------------------------------------------------------------
# Pallas kernel: one block of timesteps of the RWA recurrence per grid step.
# ----------------------------------------------------------------------------
def _rwa_kernel(yx_ref, st0_ref, whb_ref, st_ref,
                *, batch, g_width, tt, rem, nblk, approx_recip):
    B, G = batch, g_width
    tb = pl.program_id(0)

    # Resident packed state [h; n; d; a_max] (4B, G): constant out index_map ==> the
    # output ref doubles as the cross-block carry; single HBM writeback at the end.
    @pl.when(tb == 0)
    def _init():
        st_ref[...] = st0_ref[...]

    whb = whb_ref[...]          # (G, 4*G) banded conv (h channels), bf16 in fast config

    def run_block(nsteps):
        st = st_ref[...]
        h = st[0:B]             # (B, G)
        nd = st[B:3 * B]        # (2B, G)  packed [n; d]
        am = st[3 * B:]         # (B, G)

        def step(i, carry):
            h, nd, am = carry
            # Only the h-dependent half of the gate pre-activation stays in the loop.
            y = yx_ref[i] + jnp.dot(h.astype(whb.dtype), whb,
                                    preferred_element_type=jnp.float32)   # (B, 4*G)

            g_t = y[:, 0 * G:1 * G]
            u_t = y[:, 1 * G:2 * G]
            a_t = y[:, 2 * G:3 * G]
            decay = jax.nn.sigmoid(y[:, 3 * G:4 * G])

            z_t = u_t * jnp.tanh(g_t)
            a_new = jnp.maximum(am * jnp.exp(-decay), a_t)
            # fused: exp(-decay) * exp(am - a_new)  ==  exp(am - decay - a_new)
            w = jnp.exp(am - decay - a_new)
            es = jnp.exp(a_t - a_new)

            # packed n/d update: [n; d] * [w; w] + [z*es; es]
            nd_new = (nd * jnp.concatenate([w, w], axis=0)
                      + jnp.concatenate([z_t * es, es], axis=0))

            if approx_recip:
                h_new = jnp.tanh(nd_new[0:B] * pl.reciprocal(nd_new[B:], approx=True))
            else:
                h_new = jnp.tanh(nd_new[0:B] / nd_new[B:])
            return h_new, nd_new, a_new

        unroll = True if nsteps <= 16 else 8
        h, nd, am = lax.fori_loop(0, nsteps, step, (h, nd, am), unroll=unroll)
        st_ref[...] = jnp.concatenate([h, nd, am], axis=0)

    if rem == 0:
        run_block(tt)
    else:
        @pl.when(tb < nblk - 1)
        def _full():
            run_block(tt)

        @pl.when(tb == nblk - 1)
        def _tail():
            run_block(rem)          # static remainder count — no masked/wasted steps


# ----------------------------------------------------------------------------
# Wrapper: BN folding, banded conv weights, hoisted x-path, pallas_call.
# ----------------------------------------------------------------------------
def rwa_forward_pallas(params, x, s, n, d, h, a_max, *,
                       num_features, kernel_width, num_filters, num_classes,
                       time_block=128, fast_math=True):
    assert kernel_width % 2 == 1, "only odd kernel_width supported"
    B, T, _F = x.shape
    NF, KW = num_filters, kernel_width
    NC = num_features * NF
    G = NF * NC
    pad = KW // 2
    f32 = jnp.float32

    # ---- state in lane-dense (B, NF*NC) layout, packed to one (4B, G) tile ---------
    def flat(v):  # (B, NF, 1, NC) -> (B, NF*NC)
        return v.reshape(B, G).astype(f32)

    h_i = flat(h) + jnp.tanh(flat(s))          # h = h + tanh(s), folded once
    st0 = jnp.concatenate([h_i, flat(n), flat(d), flat(a_max)], axis=0)   # (4B, G)

    # ---- fold eval-mode BatchNorm and build banded conv matrices -------------------
    # Placement tensor P[k, c_in, c_out] = 1 iff c_in == c_out + k - pad (in range).
    P_np = np.zeros((KW, NC, NC), np.float32)
    for k in range(KW):
        for c_out in range(NC):
            c_in = c_out + k - pad
            if 0 <= c_in < NC:
                P_np[k, c_in, c_out] = 1.0
    P = jnp.asarray(P_np)

    def fold_bn(name, eps=1e-5):
        w = params[f"{name}_conv_w"].astype(f32)        # (NF, Cin, 1, KW)
        b = params[f"{name}_conv_b"].astype(f32)
        gm, bt = params[f"{name}_bn_g"], params[f"{name}_bn_b"]
        mu, vr = params[f"{name}_bn_m"], params[f"{name}_bn_v"]
        scale = gm / jnp.sqrt(vr + eps)
        w_eff = w[:, :, 0, :] * scale[:, None, None]    # (NF, Cin, KW)
        b_eff = scale * b + (bt - mu * scale)           # (NF,)
        return w_eff, b_eff

    wx_parts, wh_parts, b_parts = [], [], []
    for name in ("g", "u", "a", "decay"):
        w_eff, b_eff = fold_bn(name)
        # x channel (channel 0 of xh_join): (NC, NF*NC), column index f_out*NC + c_out.
        wx_p = jnp.einsum("ok,kab->aob", w_eff[:, 0, :], P).reshape(NC, G)
        # h channels (channels 1..NF of xh_join): (NF*NC, NF*NC); zero for the u gate.
        if w_eff.shape[1] > 1:
            wh_p = jnp.einsum("oik,kab->iaob", w_eff[:, 1:, :], P).reshape(G, G)
        else:
            wh_p = jnp.zeros((G, G), f32)
        wx_parts.append(wx_p)
        wh_parts.append(wh_p)
        b_parts.append(jnp.broadcast_to(b_eff[:, None], (NF, NC)).reshape(G))

    wxb = jnp.concatenate(wx_parts, axis=1)             # (NC, 4*G)
    whb = jnp.concatenate(wh_parts, axis=1)             # (G,  4*G)
    bc = jnp.concatenate(b_parts).reshape(1, 4 * G)     # (1,  4*G)

    # ---- x-dependent half of the gate pre-activation, hoisted for ALL timesteps ----
    xr = jnp.einsum("btf,cf->btc", x.astype(f32),
                    params["x_resize_w"].astype(f32))            # (B, T, NC)
    yx = jnp.einsum("btc,cg->tbg", xr, wxb) + bc                 # (T, B, 4*G)

    TT = int(max(1, min(time_block, T)))
    nblk = -(-T // TT)
    rem = T % TT
    T_pad = nblk * TT
    if T_pad != T:
        # Padding only feeds the last block's DMA; the kernel never reads those rows.
        yx = jnp.concatenate([yx, jnp.zeros((T_pad - T, B, 4 * G), f32)], axis=0)

    if fast_math:
        whb = whb.astype(jnp.bfloat16)   # bf16 MXU operands, f32 accumulate

    kern = functools.partial(_rwa_kernel, batch=B, g_width=G, tt=TT, rem=rem,
                             nblk=nblk, approx_recip=fast_math)

    st_o = pl.pallas_call(
        kern,
        out_shape=jax.ShapeDtypeStruct((4 * B, G), f32),
        grid_spec=pltpu.PrefetchScalarGridSpec(
            num_scalar_prefetch=0,
            grid=(nblk,),
            in_specs=[
                pl.BlockSpec((TT, B, 4 * G), lambda t: (t, 0, 0)),   # hoisted x-gates
                pl.BlockSpec((4 * B, G), lambda t: (0, 0)),          # packed init state
                pl.BlockSpec((G, 4 * G), lambda t: (0, 0)),          # banded h weights
            ],
            out_specs=pl.BlockSpec((4 * B, G), lambda t: (0, 0)),    # packed state out
        ),
        compiler_params=pltpu.CompilerParams(
            dimension_semantics=("arbitrary",)),
    )(yx, st0, whb)

    h_o = st_o[0 * B:1 * B]
    n_o = st_o[1 * B:2 * B]
    d_o = st_o[2 * B:3 * B]
    am_o = st_o[3 * B:4 * B]

    # ---- output projection, hoisted out of the kernel (plain XLA matmul) -----------
    outs = h_o @ params["o_w"].T.astype(f32) + params["o_b"].astype(f32)

    def to_torch(v):  # (B, NF*NC) -> (B, NF, 1, NC)
        return v.reshape(B, NF, 1, NC)

    return outs, s, to_torch(n_o), to_torch(d_o), to_torch(h_o), to_torch(am_o)


# ----------------------------------------------------------------------------
# Pure-JAX reference (PyTorch NCHW semantics, eval-mode BatchNorm)
# ----------------------------------------------------------------------------
def rwa_forward_ref(params, x, s, n, d, h, a_max, *,
                    num_features, kernel_width, num_filters, num_classes):
    NF, KW = num_filters, kernel_width
    pad = KW // 2
    eps = 1e-5

    def conv_bn(inp, name):
        w = params[f"{name}_conv_w"]
        b = params[f"{name}_conv_b"]
        out = lax.conv_general_dilated(
            inp, w, window_strides=(1, 1), padding=((0, 0), (pad, pad)),
            dimension_numbers=("NCHW", "OIHW", "NCHW"))
        out = out + b[None, :, None, None]
        g_, b_, m_, v_ = (params[f"{name}_bn_g"], params[f"{name}_bn_b"],
                          params[f"{name}_bn_m"], params[f"{name}_bn_v"])
        return ((out - m_[None, :, None, None])
                / jnp.sqrt(v_ + eps)[None, :, None, None]
                * g_[None, :, None, None] + b_[None, :, None, None])

    h_t = h + jnp.tanh(s)
    a_max_t, n_t, d_t = a_max, n, d
    B, T, _ = x.shape
    for t in range(T):
        x_t = x[:, t, :].reshape(B, -1)
        x_t = x_t @ params["x_resize_w"].T
        x_t = x_t[:, None, None, :]
        xh = jnp.concatenate([x_t, h_t], axis=1)
        g_t = conv_bn(xh, "g")
        u_t = conv_bn(x_t, "u")
        a_t = conv_bn(xh, "a")
        decay = jax.nn.sigmoid(conv_bn(xh, "decay"))
        z_t = u_t * jnp.tanh(g_t)
        a_new = jnp.maximum(a_max_t * jnp.exp(-decay), a_t)
        exp_diff = jnp.exp(a_max_t - a_new)
        exp_scaled = jnp.exp(a_t - a_new)
        n_t = n_t * jnp.exp(-decay) * exp_diff + z_t * exp_scaled
        d_t = d_t * jnp.exp(-decay) * exp_diff + exp_scaled
        h_t = jnp.tanh(n_t / d_t)
        a_max_t = a_new
    outs = h_t.reshape(B, -1) @ params["o_w"].T + params["o_b"]
    return outs, s, n_t, d_t, h_t, a_max_t


# ----------------------------------------------------------------------------
# Deterministic parameter init (shapes follow the PyTorch __init__)
# ----------------------------------------------------------------------------
def init_params(key, *, num_features, kernel_width, num_filters, num_classes, init=1.0):
    NF, KW, C, F = num_filters, kernel_width, num_classes, num_features
    NC = F * NF
    ks = jax.random.split(key, 16)
    u = lambda k, shape, b: jax.random.uniform(k, shape, jnp.float32, -b, b)
    p = {}
    p["x_resize_w"] = u(ks[0], (NC, F), 1.0 / math.sqrt(F))
    i = 1
    for name, cin in (("g", NF + 1), ("u", 1), ("a", NF + 1), ("decay", NF + 1)):
        bound = 1.0 / math.sqrt(cin * KW)
        p[f"{name}_conv_w"] = u(ks[i], (NF, cin, 1, KW), bound); i += 1
        p[f"{name}_conv_b"] = u(ks[i], (NF,), bound); i += 1
        p[f"{name}_bn_g"] = jnp.ones((NF,), jnp.float32)
        p[f"{name}_bn_b"] = jnp.zeros((NF,), jnp.float32)
        p[f"{name}_bn_m"] = jnp.zeros((NF,), jnp.float32)
        p[f"{name}_bn_v"] = jnp.ones((NF,), jnp.float32)
    o_bound = math.sqrt(6.0 * init / (NC + C))
    p["o_w"] = u(ks[i], (C, NC * NF), o_bound)
    p["o_b"] = jnp.zeros((C,), jnp.float32)
    return p


if __name__ == "__main__":
    F, KW, NF, C = 8, 3, 4, 10         # num_features, kernel_width, num_filters, num_classes
    B, T = 2, 12                       # batch, sequence length
    NC = F * NF                        # num_cells = 32;  NF*NC = 128 (lane-dense state)

    key = jax.random.PRNGKey(0)
    kp, kx, ks_ = jax.random.split(key, 3)
    params = init_params(kp, num_features=F, kernel_width=KW,
                         num_filters=NF, num_classes=C)

    x = jax.random.normal(kx, (B, T, F), jnp.float32)
    # init_sndha(batch_size)
    s = jax.random.normal(ks_, (B, NF, 1, NC), jnp.float32)     # normal(0, init=1.0)
    n = jnp.zeros((B, NF, 1, NC), jnp.float32)
    d = jnp.zeros((B, NF, 1, NC), jnp.float32)
    h = jnp.zeros((B, NF, 1, NC), jnp.float32)
    a_max = jnp.full((B, NF, 1, NC), -1e38, jnp.float32)

    outs_r, _, n_r, d_r, h_r, am_r = rwa_forward_ref(
        params, x, s, n, d, h, a_max, num_features=F, kernel_width=KW,
        num_filters=NF, num_classes=C)

    # Config A: exact numerics (f32 matmul, exact divide), small time_block so the
    # multi-block + static-remainder path is exercised (nblk=2, rem=4).  Tight tolerance.
    fwd_exact = jax.jit(functools.partial(
        rwa_forward_pallas, num_features=F, kernel_width=KW, num_filters=NF,
        num_classes=C, time_block=8, fast_math=False))
    res_a = fwd_exact(params, x, s, n, d, h, a_max)
    jax.block_until_ready(res_a)
    outs_a, _, n_a, d_a, h_a, am_a = res_a
    for got, want, name in ((outs_a, outs_r, "outs"), (n_a, n_r, "n"),
                            (d_a, d_r, "d"), (h_a, h_r, "h"), (am_a, am_r, "a_max")):
        np.testing.assert_allclose(np.asarray(got), np.asarray(want),
                                   rtol=5e-3, atol=1e-4, err_msg=f"exact:{name}")

    # Config B: performance config (bf16 h@Wh MXU operands, approx reciprocal,
    # time_block=128 => single block here).  Tolerance relaxed accordingly.
    fwd_fast = jax.jit(functools.partial(
        rwa_forward_pallas, num_features=F, kernel_width=KW, num_filters=NF,
        num_classes=C, time_block=128, fast_math=True))
    res_b = fwd_fast(params, x, s, n, d, h, a_max)
    jax.block_until_ready(res_b)
    outs_b, _, n_b, d_b, h_b, am_b = res_b
    for got, want, name in ((outs_b, outs_r, "outs"), (n_b, n_r, "n"),
                            (d_b, d_r, "d"), (h_b, h_r, "h"), (am_b, am_r, "a_max")):
        np.testing.assert_allclose(np.asarray(got), np.asarray(want),
                                   rtol=2e-2, atol=5e-3, err_msg=f"fast:{name}")

    print("KERNEL_OK")
</pallas_src>

<mosaic_0001>
module attributes {stable_mosaic.version = 11 : i64} {
  func.func @_rwa_kernel(%arg0: i32, %arg1: memref<8x2x512xf32, #tpu.memory_space<vmem>>, %arg2: memref<8x128xf32, #tpu.memory_space<vmem>>, %arg3: memref<128x512xf32, #tpu.memory_space<vmem>>, %arg4: memref<8x128xf32, #tpu.memory_space<vmem>>) attributes {dimension_semantics = [#tpu.dimension_semantics<arbitrary>], iteration_bounds = array<i64: 2>, scalar_prefetch = 0 : i64, scratch_operands = 0 : i64, tpu.core_type = #tpu.core_type<tc>, window_params = [{transform_indices = @transform_0, window_bounds = array<i64: 8, 2, 512>}, {pipeline_mode = #tpu.pipeline_mode<synchronous>, transform_indices = @transform_1, window_bounds = array<i64: 8, 128>}, {pipeline_mode = #tpu.pipeline_mode<synchronous>, transform_indices = @transform_2, window_bounds = array<i64: 128, 512>}, {pipeline_mode = #tpu.pipeline_mode<synchronous>, transform_indices = @transform_3, window_bounds = array<i64: 8, 128>}]} {
    %c0_i32 = arith.constant 0 : i32
    %0 = arith.cmpi eq, %arg0, %c0_i32 : i32
    %1 = arith.extui %0 : i1 to i32
    %c0_i32_0 = arith.constant 0 : i32
    %2 = arith.cmpi ne, %1, %c0_i32_0 : i32
    scf.if %2 {
      %c0_5 = arith.constant 0 : index
      %c0_6 = arith.constant 0 : index
      %10 = vector.load %arg2[%c0_5, %c0_6] : memref<8x128xf32, #tpu.memory_space<vmem>>, vector<8x128xf32>
      %c0_7 = arith.constant 0 : index
      %c0_8 = arith.constant 0 : index
      %11 = vector.load %arg4[%c0_7, %c0_8] : memref<8x128xf32, #tpu.memory_space<vmem>>, vector<8x128xf32>
      tpu.vector_store %arg4[%c0_7, %c0_8], %10 {strides = array<i32>} : memref<8x128xf32, #tpu.memory_space<vmem>>, vector<8x128xf32>,
    } else {
    }
    %c0 = arith.constant 0 : index
    %c0_1 = arith.constant 0 : index
    %3 = vector.load %arg3[%c0, %c0_1] : memref<128x512xf32, #tpu.memory_space<vmem>>, vector<128x512xf32>
    %c1_i32 = arith.constant 1 : i32
    %4 = arith.cmpi slt, %arg0, %c1_i32 : i32
    %5 = arith.extui %4 : i1 to i32
    %c0_i32_2 = arith.constant 0 : i32
    %6 = arith.cmpi ne, %5, %c0_i32_2 : i32
    scf.if %6 {
      %c0_5 = arith.constant 0 : index
      %c0_6 = arith.constant 0 : index
      %10 = vector.load %arg4[%c0_5, %c0_6] : memref<8x128xf32, #tpu.memory_space<vmem>>, vector<8x128xf32>
      %11 = vector.extract_strided_slice %10 {offsets = [0, 0], sizes = [2, 128], strides = [1, 1]} : vector<8x128xf32> to vector<2x128xf32>
      %12 = vector.extract_strided_slice %10 {offsets = [2, 0], sizes = [4, 128], strides = [1, 1]} : vector<8x128xf32> to vector<4x128xf32>
      %13 = vector.extract_strided_slice %10 {offsets = [6, 0], sizes = [2, 128], strides = [1, 1]} : vector<8x128xf32> to vector<2x128xf32>
      %c0_i32_7 = arith.constant 0 : i32
      %14 = arith.index_cast %c0_i32_7 : i32 to index
      %c0_8 = arith.constant 0 : index
      %c0_9 = arith.constant 0 : index
      %15 = vector.load %arg1[%14, %c0_8, %c0_9] : memref<8x2x512xf32, #tpu.memory_space<vmem>>, vector<1x2x512xf32>
      %16 = vector.shape_cast %15 : vector<1x2x512xf32> to vector<2x512xf32>
      %cst = arith.constant dense<0.000000e+00> : vector<2x512xf32>
      %17 = tpu.matmul %11, %3, %cst {dimension_numbers = #tpu.dot_dimension_numbers<[1], [0], [0], [1], [0, 0, 1, 1], [], []>} : vector<2x128xf32>, vector<128x512xf32>, vector<2x512xf32> -> vector<2x512xf32>
      %18 = arith.addf %16, %17 : vector<2x512xf32>
      %19 = vector.extract_strided_slice %18 {offsets = [0, 0], sizes = [2, 128], strides = [1, 1]} : vector<2x512xf32> to vector<2x128xf32>
      %20 = vector.extract_strided_slice %18 {offsets = [0, 128], sizes = [2, 128], strides = [1, 1]} : vector<2x512xf32> to vector<2x128xf32>
      %21 = vector.extract_strided_slice %18 {offsets = [0, 256], sizes = [2, 128], strides = [1, 1]} : vector<2x512xf32> to vector<2x128xf32>
      %22 = vector.extract_strided_slice %18 {offsets = [0, 384], sizes = [2, 128], strides = [1, 1]} : vector<2x512xf32> to vector<2x128xf32>
      %23 = arith.negf %22 : vector<2x128xf32>
      %24 = math.exp %23 : vector<2x128xf32>
      %cst_10 = arith.constant 1.000000e+00 : f32
      %25 = vector.broadcast %cst_10 : f32 to vector<2x128xf32>
      %26 = arith.addf %25, %24 : vector<2x128xf32>
      %27 = arith.divf %25, %26 : vector<2x128xf32>
      %28 = math.tanh %19 : vector<2x128xf32>
      %29 = arith.mulf %20, %28 : vector<2x128xf32>
      %cst_11 = arith.constant 0.000000e+00 : f32
      %30 = vector.broadcast %cst_11 : f32 to vector<2x128xf32>
      %31 = arith.subf %30, %27 : vector<2x128xf32>
      %32 = math.exp %31 : vector<2x128xf32>
      %33 = arith.mulf %13, %32 : vector<2x128xf32>
      %34 = arith.maximumf %33, %21 : vector<2x128xf32>
      %35 = arith.subf %13, %27 : vector<2x128xf32>
      %36 = arith.subf %35, %34 : vector<2x128xf32>
      %37 = math.exp %36 : vector<2x128xf32>
      %38 = arith.subf %21, %34 : vector<2x128xf32>
      %39 = math.exp %38 : vector<2x128xf32>
      %40 = tpu.concatenate %37, %37 in 0 : vector<2x128xf32>, vector<2x128xf32> -> vector<4x128xf32>
      %41 = arith.mulf %12, %40 : vector<4x128xf32>
      %42 = arith.mulf %29, %39 : vector<2x128xf32>
      %43 = tpu.concatenate %42, %39 in 0 : vector<2x128xf32>, vector<2x128xf32> -> vector<4x128xf32>
      %44 = arith.addf %41, %43 : vector<4x128xf32>
      %45 = vector.extract_strided_slice %44 {offsets = [0, 0], sizes = [2, 128], strides = [1, 1]} : vector<4x128xf32> to vector<2x128xf32>
      %46 = vector.extract_strided_slice %44 {offsets = [2, 0], sizes = [2, 128], strides = [1, 1]} : vector<4x128xf32> to vector<2x128xf32>
      %47 = arith.divf %45, %46 : vector<2x128xf32>
      %48 = math.tanh %47 : vector<2x128xf32>
      %c1_i32_12 = arith.constant 1 : i32
      %49 = arith.index_cast %c1_i32_12 : i32 to index
      %c0_13 = arith.constant 0 : index
      %c0_14 = arith.constant 0 : index
      %50 = vector.load %arg1[%49, %c0_13, %c0_14] : memref<8x2x512xf32, #tpu.memory_space<vmem>>, vector<1x2x512xf32>
      %51 = vector.shape_cast %50 : vector<1x2x512xf32> to vector<2x512xf32>
      %cst_15 = arith.constant dense<0.000000e+00> : vector<2x512xf32>
      %52 = tpu.matmul %48, %3, %cst_15 {dimension_numbers = #tpu.dot_dimension_numbers<[1], [0], [0], [1], [0, 0, 1, 1], [], []>} : vector<2x128xf32>, vector<128x512xf32>, vector<2x512xf32> -> vector<2x512xf32>
      %53 = arith.addf %51, %52 : vector<2x512xf32>
      %54 = vector.extract_strided_slice %53 {offsets = [0, 0], sizes = [2, 128], strides = [1, 1]} : vector<2x512xf32> to vector<2x128xf32>
      %55 = vector.extract_strided_slice %53 {offsets = [0, 128], sizes = [2, 128], strides = [1, 1]} : vector<2x512xf32> to vector<2x128xf32>
      %56 = vector.extract_strided_slice %53 {offsets = [0, 256], sizes = [2, 128], strides = [1, 1]} : vector<2x512xf32> to vector<2x128xf32>
      %57 = vector.extract_strided_slice %53 {offsets = [0, 384], sizes = [2, 128], strides = [1, 1]} : vector<2x512xf32> to vector<2x128xf32>
      %58 = arith.negf %57 : vector<2x128xf32>
      %59 = math.exp %58 : vector<2x128xf32>
      %cst_16 = arith.constant 1.000000e+00 : f32
      %60 = vector.broadcast %cst_16 : f32 to vector<2x128xf32>
      %61 = arith.addf %60, %59 : vector<2x128xf32>
      %62 = arith.divf %60, %61 : vector<2x128xf32>
      %63 = math.tanh %54 : vector<2x128xf32>
      %64 = arith.mulf %55, %63 : vector<2x128xf32>
      %cst_17 = arith.constant 0.000000e+00 : f32
      %65 = vector.broadcast %cst_17 : f32 to vector<2x128xf32>
      %66 = arith.subf %65, %62 : vector<2x128xf32>
      %67 = math.exp %66 : vector<2x128xf32>
      %68 = arith.mulf %34, %67 : vector<2x128xf32>
      %69 = arith.maximumf %68, %56 : vector<2x128xf32>
      %70 = arith.subf %34, %62 : vector<2x128xf32>
      %71 = arith.subf %70, %69 : vector<2x128xf32>
      %72 = math.exp %71 : vector<2x128xf32>
      %73 = arith.subf %56, %69 : vector<2x128xf32>
      %74 = math.exp %73 : vector<2x128xf32>
      %75 = tpu.concatenate %72, %72 in 0 : vector<2x128xf32>, vector<2x128xf32> -> vector<4x128xf32>
      %76 = arith.mulf %44, %75 : vector<4x128xf32>
      %77 = arith.mulf %64, %74 : vector<2x128xf32>
      %78 = tpu.concatenate %77, %74 in 0 : vector<2x128xf32>, vector<2x128xf32> -> vector<4x128xf32>
      %79 = arith.addf %76, %78 : vector<4x128xf32>
      %80 = vector.extract_strided_slice %79 {offsets = [0, 0], sizes = [2, 128], strides = [1, 1]} : vector<4x128xf32> to vector<2x128xf32>
      %81 = vector.extract_strided_slice %79 {offsets = [2, 0], sizes = [2, 128], strides = [1, 1]} : vector<4x128xf32> to vector<2x128xf32>
      %82 = arith.divf %80, %81 : vector<2x128xf32>
      %83 = math.tanh %82 : vector<2x128xf32>
      %c2_i32 = arith.constant 2 : i32
      %84 = arith.index_cast %c2_i32 : i32 to index
      %c0_18 = arith.constant 0 : index
      %c0_19 = arith.constant 0 : index
      %85 = vector.load %arg1[%84, %c0_18, %c0_19] : memref<8x2x512xf32, #tpu.memory_space<vmem>>, vector<1x2x512xf32>
      %86 = vector.shape_cast %85 : vector<1x2x512xf32> to vector<2x512xf32>
      %cst_20 = arith.constant dense<0.000000e+00> : vector<2x512xf32>
      %87 = tpu.matmul %83, %3, %cst_20 {dimension_numbers = #tpu.dot_dimension_numbers<[1], [0], [0], [1], [0, 0, 1, 1], [], []>} : vector<2x128xf32>, vector<128x512xf32>, vector<2x512xf32> -> vector<2x512xf32>
      %88 = arith.addf %86, %87 : vector<2x512xf32>
      %89 = vector.extract_strided_slice %88 {offsets = [0, 0], sizes = [2, 128], strides = [1, 1]} : vector<2x512xf32> to vector<2x128xf32>
      %90 = vector.extract_strided_slice %88 {offsets = [0, 128], sizes = [2, 128], strides = [1, 1]} : vector<2x512xf32> to vector<2x128xf32>
      %91 = vector.extract_strided_slice %88 {offsets = [0, 256], sizes = [2, 128], strides = [1, 1]} : vector<2x512xf32> to vector<2x128xf32>
      %92 = vector.extract_strided_slice %88 {offsets = [0, 384], sizes = [2, 128], strides = [1, 1]} : vector<2x512xf32> to vector<2x128xf32>
      %93 = arith.negf %92 : vector<2x128xf32>
      %94 = math.exp %93 : vector<2x128xf32>
      %cst_21 = arith.constant 1.000000e+00 : f32
      %95 = vector.broadcast %cst_21 : f32 to vector<2x128xf32>
      %96 = arith.addf %95, %94 : vector<2x128xf32>
      %97 = arith.divf %95, %96 : vector<2x128xf32>
      %98 = math.tanh %89 : vector<2x128xf32>
      %99 = arith.mulf %90, %98 : vector<2x128xf32>
      %cst_22 = arith.constant 0.000000e+00 : f32
      %100 = vector.broadcast %cst_22 : f32 to vector<2x128xf32>
      %101 = arith.subf %100, %97 : vector<2x128xf32>
      %102 = math.exp %101 : vector<2x128xf32>
      %103 = arith.mulf %69, %102 : vector<2x128xf32>
      %104 = arith.maximumf %103, %91 : vector<2x128xf32>
      %105 = arith.subf %69, %97 : vector<2x128xf32>
      %106 = arith.subf %105, %104 : vector<2x128xf32>
      %107 = math.exp %106 : vector<2x128xf32>
      %108 = arith.subf %91, %104 : vector<2x128xf32>
      %109 = math.exp %108 : vector<2x128xf32>
      %110 = tpu.concatenate %107, %107 in 0 : vector<2x128xf32>, vector<2x128xf32> -> vector<4x128xf32>
      %111 = arith.mulf %79, %110 : vector<4x128xf32>
      %112 = arith.mulf %99, %109 : vector<2x128xf32>
      %113 = tpu.concatenate %112, %109 in 0 : vector<2x128xf32>, vector<2x128xf32> -> vector<4x128xf32>
      %114 = arith.addf %111, %113 : vector<4x128xf32>
      %115 = vector.extract_strided_slice %114 {offsets = [0, 0], sizes = [2, 128], strides = [1, 1]} : vector<4x128xf32> to vector<2x128xf32>
      %116 = vector.extract_strided_slice %114 {offsets = [2, 0], sizes = [2, 128], strides = [1, 1]} : vector<4x128xf32> to vector<2x128xf32>
      %117 = arith.divf %115, %116 : vector<2x128xf32>
      %118 = math.tanh %117 : vector<2x128xf32>
      %c3_i32 = arith.constant 3 : i32
      %119 = arith.index_cast %c3_i32 : i32 to index
      %c0_23 = arith.constant 0 : index
      %c0_24 = arith.constant 0 : index
      %120 = vector.load %arg1[%119, %c0_23, %c0_24] : memref<8x2x512xf32, #tpu.memory_space<vmem>>, vector<1x2x512xf32>
      %121 = vector.shape_cast %120 : vector<1x2x512xf32> to vector<2x512xf32>
      %cst_25 = arith.constant dense<0.000000e+00> : vector<2x512xf32>
      %122 = tpu.matmul %118, %3, %cst_25 {dimension_numbers = #tpu.dot_dimension_numbers<[1], [0], [0], [1], [0, 0, 1, 1], [], []>} : vector<2x128xf32>, vector<128x512xf32>, vector<2x512xf32> -> vector<2x512xf32>
      %123 = arith.addf %121, %122 : vector<2x512xf32>
      %124 = vector.extract_strided_slice %123 {offsets = [0, 0], sizes = [2, 128], strides = [1, 1]} : vector<2x512xf32> to vector<2x128xf32>
      %125 = vector.extract_strided_slice %123 {offsets = [0, 128], sizes = [2, 128], strides = [1, 1]} : vector<2x512xf32> to vector<2x128xf32>
      %126 = vector.extract_strided_slice %123 {offsets = [0, 256], sizes = [2, 128], strides = [1, 1]} : vector<2x512xf32> to vector<2x128xf32>
      %127 = vector.extract_strided_slice %123 {offsets = [0, 384], sizes = [2, 128], strides = [1, 1]} : vector<2x512xf32> to vector<2x128xf32>
      %128 = arith.negf %127 : vector<2x128xf32>
      %129 = math.exp %128 : vector<2x128xf32>
      %cst_26 = arith.constant 1.000000e+00 : f32
      %130 = vector.broadcast %cst_26 : f32 to vector<2x128xf32>
      %131 = arith.addf %130, %129 : vector<2x128xf32>
      %132 = arith.divf %130, %131 : vector<2x128xf32>
      %133 = math.tanh %124 : vector<2x128xf32>
      %134 = arith.mulf %125, %133 : vector<2x128xf32>
      %cst_27 = arith.constant 0.000000e+00 : f32
      %135 = vector.broadcast %cst_27 : f32 to vector<2x128xf32>
      %136 = arith.subf %135, %132 : vector<2x128xf32>
      %137 = math.exp %136 : vector<2x128xf32>
      %138 = arith.mulf %104, %137 : vector<2x128xf32>
      %139 = arith.maximumf %138, %126 : vector<2x128xf32>
      %140 = arith.subf %104, %132 : vector<2x128xf32>
      %141 = arith.subf %140, %139 : vector<2x128xf32>
      %142 = math.exp %141 : vector<2x128xf32>
      %143 = arith.subf %126, %139 : vector<2x128xf32>
      %144 = math.exp %143 : vector<2x128xf32>
      %145 = tpu.concatenate %142, %142 in 0 : vector<2x128xf32>, vector<2x128xf32> -> vector<4x128xf32>
      %146 = arith.mulf %114, %145 : vector<4x128xf32>
      %147 = arith.mulf %134, %144 : vector<2x128xf32>
      %148 = tpu.concatenate %147, %144 in 0 : vector<2x128xf32>, vector<2x128xf32> -> vector<4x128xf32>
      %149 = arith.addf %146, %148 : vector<4x128xf32>
      %150 = vector.extract_strided_slice %149 {offsets = [0, 0], sizes = [2, 128], strides = [1, 1]} : vector<4x128xf32> to vector<2x128xf32>
      %151 = vector.extract_strided_slice %149 {offsets = [2, 0], sizes = [2, 128], strides = [1, 1]} : vector<4x128xf32> to vector<2x128xf32>
      %152 = arith.divf %150, %151 : vector<2x128xf32>
      %153 = math.tanh %152 : vector<2x128xf32>
      %c4_i32 = arith.constant 4 : i32
      %154 = arith.index_cast %c4_i32 : i32 to index
      %c0_28 = arith.constant 0 : index
      %c0_29 = arith.constant 0 : index
      %155 = vector.load %arg1[%154, %c0_28, %c0_29] : memref<8x2x512xf32, #tpu.memory_space<vmem>>, vector<1x2x512xf32>
      %156 = vector.shape_cast %155 : vector<1x2x512xf32> to vector<2x512xf32>
      %cst_30 = arith.constant dense<0.000000e+00> : vector<2x512xf32>
      %157 = tpu.matmul %153, %3, %cst_30 {dimension_numbers = #tpu.dot_dimension_numbers<[1], [0], [0], [1], [0, 0, 1, 1], [], []>} : vector<2x128xf32>, vector<128x512xf32>, vector<2x512xf32> -> vector<2x512xf32>
      %158 = arith.addf %156, %157 : vector<2x512xf32>
      %159 = vector.extract_strided_slice %158 {offsets = [0, 0], sizes = [2, 128], strides = [1, 1]} : vector<2x512xf32> to vector<2x128xf32>
      %160 = vector.extract_strided_slice %158 {offsets = [0, 128], sizes = [2, 128], strides = [1, 1]} : vector<2x512xf32> to vector<2x128xf32>
      %161 = vector.extract_strided_slice %158 {offsets = [0, 256], sizes = [2, 128], strides = [1, 1]} : vector<2x512xf32> to vector<2x128xf32>
      %162 = vector.extract_strided_slice %158 {offsets = [0, 384], sizes = [2, 128], strides = [1, 1]} : vector<2x512xf32> to vector<2x128xf32>
      %163 = arith.negf %162 : vector<2x128xf32>
      %164 = math.exp %163 : vector<2x128xf32>
      %cst_31 = arith.constant 1.000000e+00 : f32
      %165 = vector.broadcast %cst_31 : f32 to vector<2x128xf32>
      %166 = arith.addf %165, %164 : vector<2x128xf32>
      %167 = arith.divf %165, %166 : vector<2x128xf32>
      %168 = math.tanh %159 : vector<2x128xf32>
      %169 = arith.mulf %160, %168 : vector<2x128xf32>
      %cst_32 = arith.constant 0.000000e+00 : f32
      %170 = vector.broadcast %cst_32 : f32 to vector<2x128xf32>
      %171 = arith.subf %170, %167 : vector<2x128xf32>
      %172 = math.exp %171 : vector<2x128xf32>
      %173 = arith.mulf %139, %172 : vector<2x128xf32>
      %174 = arith.maximumf %173, %161 : vector<2x128xf32>
      %175 = arith.subf %139, %167 : vector<2x128xf32>
      %176 = arith.subf %175, %174 : vector<2x128xf32>
      %177 = math.exp %176 : vector<2x128xf32>
      %178 = arith.subf %161, %174 : vector<2x128xf32>
      %179 = math.exp %178 : vector<2x128xf32>
      %180 = tpu.concatenate %177, %177 in 0 : vector<2x128xf32>, vector<2x128xf32> -> vector<4x128xf32>
      %181 = arith.mulf %149, %180 : vector<4x128xf32>
      %182 = arith.mulf %169, %179 : vector<2x128xf32>
      %183 = tpu.concatenate %182, %179 in 0 : vector<2x128xf32>, vector<2x128xf32> -> vector<4x128xf32>
      %184 = arith.addf %181, %183 : vector<4x128xf32>
      %185 = vector.extract_strided_slice %184 {offsets = [0, 0], sizes = [2, 128], strides = [1, 1]} : vector<4x128xf32> to vector<2x128xf32>
      %186 = vector.extract_strided_slice %184 {offsets = [2, 0], sizes = [2, 128], strides = [1, 1]} : vector<4x128xf32> to vector<2x128xf32>
      %187 = arith.divf %185, %186 : vector<2x128xf32>
      %188 = math.tanh %187 : vector<2x128xf32>
      %c5_i32 = arith.constant 5 : i32
      %189 = arith.index_cast %c5_i32 : i32 to index
      %c0_33 = arith.constant 0 : index
      %c0_34 = arith.constant 0 : index
      %190 = vector.load %arg1[%189, %c0_33, %c0_34] : memref<8x2x512xf32, #tpu.memory_space<vmem>>, vector<1x2x512xf32>
      %191 = vector.shape_cast %190 : vector<1x2x512xf32> to vector<2x512xf32>
      %cst_35 = arith.constant dense<0.000000e+00> : vector<2x512xf32>
      %192 = tpu.matmul %188, %3, %cst_35 {dimension_numbers = #tpu.dot_dimension_numbers<[1], [0], [0], [1], [0, 0, 1, 1], [], []>} : vector<2x128xf32>, vector<128x512xf32>, vector<2x512xf32> -> vector<2x512xf32>
      %193 = arith.addf %191, %192 : vector<2x512xf32>
      %194 = vector.extract_strided_slice %193 {offsets = [0, 0], sizes = [2, 128], strides = [1, 1]} : vector<2x512xf32> to vector<2x128xf32>
      %195 = vector.extract_strided_slice %193 {offsets = [0, 128], sizes = [2, 128], strides = [1, 1]} : vector<2x512xf32> to vector<2x128xf32>
      %196 = vector.extract_strided_slice %193 {offsets = [0, 256], sizes = [2, 128], strides = [1, 1]} : vector<2x512xf32> to vector<2x128xf32>
      %197 = vector.extract_strided_slice %193 {offsets = [0, 384], sizes = [2, 128], strides = [1, 1]} : vector<2x512xf32> to vector<2x128xf32>
      %198 = arith.negf %197 : vector<2x128xf32>
      %199 = math.exp %198 : vector<2x128xf32>
      %cst_36 = arith.constant 1.000000e+00 : f32
      %200 = vector.broadcast %cst_36 : f32 to vector<2x128xf32>
      %201 = arith.addf %200, %199 : vector<2x128xf32>
      %202 = arith.divf %200, %201 : vector<2x128xf32>
      %203 = math.tanh %194 : vector<2x128xf32>
      %204 = arith.mulf %195, %203 : vector<2x128xf32>
      %cst_37 = arith.constant 0.000000e+00 : f32
      %205 = vector.broadcast %cst_37 : f32 to vector<2x128xf32>
      %206 = arith.subf %205, %202 : vector<2x128xf32>
      %207 = math.exp %206 : vector<2x128xf32>
      %208 = arith.mulf %174, %207 : vector<2x128xf32>
      %209 = arith.maximumf %208, %196 : vector<2x128xf32>
      %210 = arith.subf %174, %202 : vector<2x128xf32>
      %211 = arith.subf %210, %209 : vector<2x128xf32>
      %212 = math.exp %211 : vector<2x128xf32>
      %213 = arith.subf %196, %209 : vector<2x128xf32>
      %214 = math.exp %213 : vector<2x128xf32>
      %215 = tpu.concatenate %212, %212 in 0 : vector<2x128xf32>, vector<2x128xf32> -> vector<4x128xf32>
      %216 = arith.mulf %184, %215 : vector<4x128xf32>
      %217 = arith.mulf %204, %214 : vector<2x128xf32>
      %218 = tpu.concatenate %217, %214 in 0 : vector<2x128xf32>, vector<2x128xf32> -> vector<4x128xf32>
      %219 = arith.addf %216, %218 : vector<4x128xf32>
      %220 = vector.extract_strided_slice %219 {offsets = [0, 0], sizes = [2, 128], strides = [1, 1]} : vector<4x128xf32> to vector<2x128xf32>
      %221 = vector.extract_strided_slice %219 {offsets = [2, 0], sizes = [2, 128], strides = [1, 1]} : vector<4x128xf32> to vector<2x128xf32>
      %222 = arith.divf %220, %221 : vector<2x128xf32>
      %223 = math.tanh %222 : vector<2x128xf32>
      %c6_i32 = arith.constant 6 : i32
      %224 = arith.index_cast %c6_i32 : i32 to index
      %c0_38 = arith.constant 0 : index
      %c0_39 = arith.constant 0 : index
      %225 = vector.load %arg1[%224, %c0_38, %c0_39] : memref<8x2x512xf32, #tpu.memory_space<vmem>>, vector<1x2x512xf32>
      %226 = vector.shape_cast %225 : vector<1x2x512xf32> to vector<2x512xf32>
      %cst_40 = arith.constant dense<0.000000e+00> : vector<2x512xf32>
      %227 = tpu.matmul %223, %3, %cst_40 {dimension_numbers = #tpu.dot_dimension_numbers<[1], [0], [0], [1], [0, 0, 1, 1], [], []>} : vector<2x128xf32>, vector<128x512xf32>, vector<2x512xf32> -> vector<2x512xf32>
      %228 = arith.addf %226, %227 : vector<2x512xf32>
      %229 = vector.extract_strided_slice %228 {offsets = [0, 0], sizes = [2, 128], strides = [1, 1]} : vector<2x512xf32> to vector<2x128xf32>
      %230 = vector.extract_strided_slice %228 {offsets = [0, 128], sizes = [2, 128], strides = [1, 1]} : vector<2x512xf32> to vector<2x128xf32>
      %231 = vector.extract_strided_slice %228 {offsets = [0, 256], sizes = [2, 128], strides = [1, 1]} : vector<2x512xf32> to vector<2x128xf32>
      %232 = vector.extract_strided_slice %228 {offsets = [0, 384], sizes = [2, 128], strides = [1, 1]} : vector<2x512xf32> to vector<2x128xf32>
      %233 = arith.negf %232 : vector<2x128xf32>
      %234 = math.exp %233 : vector<2x128xf32>
      %cst_41 = arith.constant 1.000000e+00 : f32
      %235 = vector.broadcast %cst_41 : f32 to vector<2x128xf32>
      %236 = arith.addf %235, %234 : vector<2x128xf32>
      %237 = arith.divf %235, %236 : vector<2x128xf32>
      %238 = math.tanh %229 : vector<2x128xf32>
      %239 = arith.mulf %230, %238 : vector<2x128xf32>
      %cst_42 = arith.constant 0.000000e+00 : f32
      %240 = vector.broadcast %cst_42 : f32 to vector<2x128xf32>
      %241 = arith.subf %240, %237 : vector<2x128xf32>
      %242 = math.exp %241 : vector<2x128xf32>
      %243 = arith.mulf %209, %242 : vector<2x128xf32>
      %244 = arith.maximumf %243, %231 : vector<2x128xf32>
      %245 = arith.subf %209, %237 : vector<2x128xf32>
      %246 = arith.subf %245, %244 : vector<2x128xf32>
      %247 = math.exp %246 : vector<2x128xf32>
      %248 = arith.subf %231, %244 : vector<2x128xf32>
      %249 = math.exp %248 : vector<2x128xf32>
      %250 = tpu.concatenate %247, %247 in 0 : vector<2x128xf32>, vector<2x128xf32> -> vector<4x128xf32>
      %251 = arith.mulf %219, %250 : vector<4x128xf32>
      %252 = arith.mulf %239, %249 : vector<2x128xf32>
      %253 = tpu.concatenate %252, %249 in 0 : vector<2x128xf32>, vector<2x128xf32> -> vector<4x128xf32>
      %254 = arith.addf %251, %253 : vector<4x128xf32>
      %255 = vector.extract_strided_slice %254 {offsets = [0, 0], sizes = [2, 128], strides = [1, 1]} : vector<4x128xf32> to vector<2x128xf32>
      %256 = vector.extract_strided_slice %254 {offsets = [2, 0], sizes = [2, 128], strides = [1, 1]} : vector<4x128xf32> to vector<2x128xf32>
      %257 = arith.divf %255, %256 : vector<2x128xf32>
      %258 = math.tanh %257 : vector<2x128xf32>
      %c7_i32 = arith.constant 7 : i32
      %259 = arith.index_cast %c7_i32 : i32 to index
      %c0_43 = arith.constant 0 : index
      %c0_44 = arith.constant 0 : index
      %260 = vector.load %arg1[%259, %c0_43, %c0_44] : memref<8x2x512xf32, #tpu.memory_space<vmem>>, vector<1x2x512xf32>
      %261 = vector.shape_cast %260 : vector<1x2x512xf32> to vector<2x512xf32>
      %cst_45 = arith.constant dense<0.000000e+00> : vector<2x512xf32>
      %262 = tpu.matmul %258, %3, %cst_45 {dimension_numbers = #tpu.dot_dimension_numbers<[1], [0], [0], [1], [0, 0, 1, 1], [], []>} : vector<2x128xf32>, vector<128x512xf32>, vector<2x512xf32> -> vector<2x512xf32>
      %263 = arith.addf %261, %262 : vector<2x512xf32>
      %264 = vector.extract_strided_slice %263 {offsets = [0, 0], sizes = [2, 128], strides = [1, 1]} : vector<2x512xf32> to vector<2x128xf32>
      %265 = vector.extract_strided_slice %263 {offsets = [0, 128], sizes = [2, 128], strides = [1, 1]} : vector<2x512xf32> to vector<2x128xf32>
      %266 = vector.extract_strided_slice %263 {offsets = [0, 256], sizes = [2, 128], strides = [1, 1]} : vector<2x512xf32> to vector<2x128xf32>
      %267 = vector.extract_strided_slice %263 {offsets = [0, 384], sizes = [2, 128], strides = [1, 1]} : vector<2x512xf32> to vector<2x128xf32>
      %268 = arith.negf %267 : vector<2x128xf32>
      %269 = math.exp %268 : vector<2x128xf32>
      %cst_46 = arith.constant 1.000000e+00 : f32
      %270 = vector.broadcast %cst_46 : f32 to vector<2x128xf32>
      %271 = arith.addf %270, %269 : vector<2x128xf32>
      %272 = arith.divf %270, %271 : vector<2x128xf32>
      %273 = math.tanh %264 : vector<2x128xf32>
      %274 = arith.mulf %265, %273 : vector<2x128xf32>
      %cst_47 = arith.constant 0.000000e+00 : f32
      %275 = vector.broadcast %cst_47 : f32 to vector<2x128xf32>
      %276 = arith.subf %275, %272 : vector<2x128xf32>
      %277 = math.exp %276 : vector<2x128xf32>
      %278 = arith.mulf %244, %277 : vector<2x128xf32>
      %279 = arith.maximumf %278, %266 : vector<2x128xf32>
      %280 = arith.subf %244, %272 : vector<2x128xf32>
      %281 = arith.subf %280, %279 : vector<2x128xf32>
      %282 = math.exp %281 : vector<2x128xf32>
      %283 = arith.subf %266, %279 : vector<2x128xf32>
      %284 = math.exp %283 : vector<2x128xf32>
      %285 = tpu.concatenate %282, %282 in 0 : vector<2x128xf32>, vector<2x128xf32> -> vector<4x128xf32>
      %286 = arith.mulf %254, %285 : vector<4x128xf32>
      %287 = arith.mulf %274, %284 : vector<2x128xf32>
      %288 = tpu.concatenate %287, %284 in 0 : vector<2x128xf32>, vector<2x128xf32> -> vector<4x128xf32>
      %289 = arith.addf %286, %288 : vector<4x128xf32>
      %290 = vector.extract_strided_slice %289 {offsets = [0, 0], sizes = [2, 128], strides = [1, 1]} : vector<4x128xf32> to vector<2x128xf32>
      %291 = vector.extract_strided_slice %289 {offsets = [2, 0], sizes = [2, 128], strides = [1, 1]} : vector<4x128xf32> to vector<2x128xf32>
      %292 = arith.divf %290, %291 : vector<2x128xf32>
      %293 = math.tanh %292 : vector<2x128xf32>
      %c8_i32 = arith.constant 8 : i32
      %294 = tpu.concatenate %293, %289, %279 in 0 : vector<2x128xf32>, vector<4x128xf32>, vector<2x128xf32> -> vector<8x128xf32>
      %c0_48 = arith.constant 0 : index
      %c0_49 = arith.constant 0 : index
      %295 = vector.load %arg4[%c0_48, %c0_49] : memref<8x128xf32, #tpu.memory_space<vmem>>, vector<8x128xf32>
      tpu.vector_store %arg4[%c0_48, %c0_49], %294 {strides = array<i32>} : memref<8x128xf32, #tpu.memory_space<vmem>>, vector<8x128xf32>,
    } else {
    }
    %c1_i32_3 = arith.constant 1 : i32
    %7 = arith.cmpi eq, %arg0, %c1_i32_3 : i32
    %8 = arith.extui %7 : i1 to i32
    %c0_i32_4 = arith.constant 0 : i32
    %9 = arith.cmpi ne, %8, %c0_i32_4 : i32
    scf.if %9 {
      %c0_5 = arith.constant 0 : index
      %c0_6 = arith.constant 0 : index
      %10 = vector.load %arg4[%c0_5, %c0_6] : memref<8x128xf32, #tpu.memory_space<vmem>>, vector<8x128xf32>
      %11 = vector.extract_strided_slice %10 {offsets = [0, 0], sizes = [2, 128], strides = [1, 1]} : vector<8x128xf32> to vector<2x128xf32>
      %12 = vector.extract_strided_slice %10 {offsets = [2, 0], sizes = [4, 128], strides = [1, 1]} : vector<8x128xf32> to vector<4x128xf32>
      %13 = vector.extract_strided_slice %10 {offsets = [6, 0], sizes = [2, 128], strides = [1, 1]} : vector<8x128xf32> to vector<2x128xf32>
      %c0_i32_7 = arith.constant 0 : i32
      %14 = arith.index_cast %c0_i32_7 : i32 to index
      %c0_8 = arith.constant 0 : index
      %c0_9 = arith.constant 0 : index
      %15 = vector.load %arg1[%14, %c0_8, %c0_9] : memref<8x2x512xf32, #tpu.memory_space<vmem>>, vector<1x2x512xf32>
      %16 = vector.shape_cast %15 : vector<1x2x512xf32> to vector<2x512xf32>
      %cst = arith.constant dense<0.000000e+00> : vector<2x512xf32>
      %17 = tpu.matmul %11, %3, %cst {dimension_numbers = #tpu.dot_dimension_numbers<[1], [0], [0], [1], [0, 0, 1, 1], [], []>} : vector<2x128xf32>, vector<128x512xf32>, vector<2x512xf32> -> vector<2x512xf32>
      %18 = arith.addf %16, %17 : vector<2x512xf32>
      %19 = vector.extract_strided_slice %18 {offsets = [0, 0], sizes = [2, 128], strides = [1, 1]} : vector<2x512xf32> to vector<2x128xf32>
      %20 = vector.extract_strided_slice %18 {offsets = [0, 128], sizes = [2, 128], strides = [1, 1]} : vector<2x512xf32> to vector<2x128xf32>
      %21 = vector.extract_strided_slice %18 {offsets = [0, 256], sizes = [2, 128], strides = [1, 1]} : vector<2x512xf32> to vector<2x128xf32>
      %22 = vector.extract_strided_slice %18 {offsets = [0, 384], sizes = [2, 128], strides = [1, 1]} : vector<2x512xf32> to vector<2x128xf32>
      %23 = arith.negf %22 : vector<2x128xf32>
      %24 = math.exp %23 : vector<2x128xf32>
      %cst_10 = arith.constant 1.000000e+00 : f32
      %25 = vector.broadcast %cst_10 : f32 to vector<2x128xf32>
      %26 = arith.addf %25, %24 : vector<2x128xf32>
      %27 = arith.divf %25, %26 : vector<2x128xf32>
      %28 = math.tanh %19 : vector<2x128xf32>
      %29 = arith.mulf %20, %28 : vector<2x128xf32>
      %cst_11 = arith.constant 0.000000e+00 : f32
      %30 = vector.broadcast %cst_11 : f32 to vector<2x128xf32>
      %31 = arith.subf %30, %27 : vector<2x128xf32>
      %32 = math.exp %31 : vector<2x128xf32>
      %33 = arith.mulf %13, %32 : vector<2x128xf32>
      %34 = arith.maximumf %33, %21 : vector<2x128xf32>
      %35 = arith.subf %13, %27 : vector<2x128xf32>
      %36 = arith.subf %35, %34 : vector<2x128xf32>
      %37 = math.exp %36 : vector<2x128xf32>
      %38 = arith.subf %21, %34 : vector<2x128xf32>
      %39 = math.exp %38 : vector<2x128xf32>
      %40 = tpu.concatenate %37, %37 in 0 : vector<2x128xf32>, vector<2x128xf32> -> vector<4x128xf32>
      %41 = arith.mulf %12, %40 : vector<4x128xf32>
      %42 = arith.mulf %29, %39 : vector<2x128xf32>
      %43 = tpu.concatenate %42, %39 in 0 : vector<2x128xf32>, vector<2x128xf32> -> vector<4x128xf32>
      %44 = arith.addf %41, %43 : vector<4x128xf32>
      %45 = vector.extract_strided_slice %44 {offsets = [0, 0], sizes = [2, 128], strides = [1, 1]} : vector<4x128xf32> to vector<2x128xf32>
      %46 = vector.extract_strided_slice %44 {offsets = [2, 0], sizes = [2, 128], strides = [1, 1]} : vector<4x128xf32> to vector<2x128xf32>
      %47 = arith.divf %45, %46 : vector<2x128xf32>
      %48 = math.tanh %47 : vector<2x128xf32>
      %c1_i32_12 = arith.constant 1 : i32
      %49 = arith.index_cast %c1_i32_12 : i32 to index
      %c0_13 = arith.constant 0 : index
      %c0_14 = arith.constant 0 : index
      %50 = vector.load %arg1[%49, %c0_13, %c0_14] : memref<8x2x512xf32, #tpu.memory_space<vmem>>, vector<1x2x512xf32>
      %51 = vector.shape_cast %50 : vector<1x2x512xf32> to vector<2x512xf32>
      %cst_15 = arith.constant dense<0.000000e+00> : vector<2x512xf32>
      %52 = tpu.matmul %48, %3, %cst_15 {dimension_numbers = #tpu.dot_dimension_numbers<[1], [0], [0], [1], [0, 0, 1, 1], [], []>} : vector<2x128xf32>, vector<128x512xf32>, vector<2x512xf32> -> vector<2x512xf32>
      %53 = arith.addf %51, %52 : vector<2x512xf32>
      %54 = vector.extract_strided_slice %53 {offsets = [0, 0], sizes = [2, 128], strides = [1, 1]} : vector<2x512xf32> to vector<2x128xf32>
      %55 = vector.extract_strided_slice %53 {offsets = [0, 128], sizes = [2, 128], strides = [1, 1]} : vector<2x512xf32> to vector<2x128xf32>
      %56 = vector.extract_strided_slice %53 {offsets = [0, 256], sizes = [2, 128], strides = [1, 1]} : vector<2x512xf32> to vector<2x128xf32>
      %57 = vector.extract_strided_slice %53 {offsets = [0, 384], sizes = [2, 128], strides = [1, 1]} : vector<2x512xf32> to vector<2x128xf32>
      %58 = arith.negf %57 : vector<2x128xf32>
      %59 = math.exp %58 : vector<2x128xf32>
      %cst_16 = arith.constant 1.000000e+00 : f32
      %60 = vector.broadcast %cst_16 : f32 to vector<2x128xf32>
      %61 = arith.addf %60, %59 : vector<2x128xf32>
      %62 = arith.divf %60, %61 : vector<2x128xf32>
      %63 = math.tanh %54 : vector<2x128xf32>
      %64 = arith.mulf %55, %63 : vector<2x128xf32>
      %cst_17 = arith.constant 0.000000e+00 : f32
      %65 = vector.broadcast %cst_17 : f32 to vector<2x128xf32>
      %66 = arith.subf %65, %62 : vector<2x128xf32>
      %67 = math.exp %66 : vector<2x128xf32>
      %68 = arith.mulf %34, %67 : vector<2x128xf32>
      %69 = arith.maximumf %68, %56 : vector<2x128xf32>
      %70 = arith.subf %34, %62 : vector<2x128xf32>
      %71 = arith.subf %70, %69 : vector<2x128xf32>
      %72 = math.exp %71 : vector<2x128xf32>
      %73 = arith.subf %56, %69 : vector<2x128xf32>
      %74 = math.exp %73 : vector<2x128xf32>
      %75 = tpu.concatenate %72, %72 in 0 : vector<2x128xf32>, vector<2x128xf32> -> vector<4x128xf32>
      %76 = arith.mulf %44, %75 : vector<4x128xf32>
      %77 = arith.mulf %64, %74 : vector<2x128xf32>
      %78 = tpu.concatenate %77, %74 in 0 : vector<2x128xf32>, vector<2x128xf32> -> vector<4x128xf32>
      %79 = arith.addf %76, %78 : vector<4x128xf32>
      %80 = vector.extract_strided_slice %79 {offsets = [0, 0], sizes = [2, 128], strides = [1, 1]} : vector<4x128xf32> to vector<2x128xf32>
      %81 = vector.extract_strided_slice %79 {offsets = [2, 0], sizes = [2, 128], strides = [1, 1]} : vector<4x128xf32> to vector<2x128xf32>
      %82 = arith.divf %80, %81 : vector<2x128xf32>
      %83 = math.tanh %82 : vector<2x128xf32>
      %c2_i32 = arith.constant 2 : i32
      %84 = arith.index_cast %c2_i32 : i32 to index
      %c0_18 = arith.constant 0 : index
      %c0_19 = arith.constant 0 : index
      %85 = vector.load %arg1[%84, %c0_18, %c0_19] : memref<8x2x512xf32, #tpu.memory_space<vmem>>, vector<1x2x512xf32>
      %86 = vector.shape_cast %85 : vector<1x2x512xf32> to vector<2x512xf32>
      %cst_20 = arith.constant dense<0.000000e+00> : vector<2x512xf32>
      %87 = tpu.matmul %83, %3, %cst_20 {dimension_numbers = #tpu.dot_dimension_numbers<[1], [0], [0], [1], [0, 0, 1, 1], [], []>} : vector<2x128xf32>, vector<128x512xf32>, vector<2x512xf32> -> vector<2x512xf32>
      %88 = arith.addf %86, %87 : vector<2x512xf32>
      %89 = vector.extract_strided_slice %88 {offsets = [0, 0], sizes = [2, 128], strides = [1, 1]} : vector<2x512xf32> to vector<2x128xf32>
      %90 = vector.extract_strided_slice %88 {offsets = [0, 128], sizes = [2, 128], strides = [1, 1]} : vector<2x512xf32> to vector<2x128xf32>
      %91 = vector.extract_strided_slice %88 {offsets = [0, 256], sizes = [2, 128], strides = [1, 1]} : vector<2x512xf32> to vector<2x128xf32>
      %92 = vector.extract_strided_slice %88 {offsets = [0, 384], sizes = [2, 128], strides = [1, 1]} : vector<2x512xf32> to vector<2x128xf32>
      %93 = arith.negf %92 : vector<2x128xf32>
      %94 = math.exp %93 : vector<2x128xf32>
      %cst_21 = arith.constant 1.000000e+00 : f32
      %95 = vector.broadcast %cst_21 : f32 to vector<2x128xf32>
      %96 = arith.addf %95, %94 : vector<2x128xf32>
      %97 = arith.divf %95, %96 : vector<2x128xf32>
      %98 = math.tanh %89 : vector<2x128xf32>
      %99 = arith.mulf %90, %98 : vector<2x128xf32>
      %cst_22 = arith.constant 0.000000e+00 : f32
      %100 = vector.broadcast %cst_22 : f32 to vector<2x128xf32>
      %101 = arith.subf %100, %97 : vector<2x128xf32>
      %102 = math.exp %101 : vector<2x128xf32>
      %103 = arith.mulf %69, %102 : vector<2x128xf32>
      %104 = arith.maximumf %103, %91 : vector<2x128xf32>
      %105 = arith.subf %69, %97 : vector<2x128xf32>
      %106 = arith.subf %105, %104 : vector<2x128xf32>
      %107 = math.exp %106 : vector<2x128xf32>
      %108 = arith.subf %91, %104 : vector<2x128xf32>
      %109 = math.exp %108 : vector<2x128xf32>
      %110 = tpu.concatenate %107, %107 in 0 : vector<2x128xf32>, vector<2x128xf32> -> vector<4x128xf32>
      %111 = arith.mulf %79, %110 : vector<4x128xf32>
      %112 = arith.mulf %99, %109 : vector<2x128xf32>
      %113 = tpu.concatenate %112, %109 in 0 : vector<2x128xf32>, vector<2x128xf32> -> vector<4x128xf32>
      %114 = arith.addf %111, %113 : vector<4x128xf32>
      %115 = vector.extract_strided_slice %114 {offsets = [0, 0], sizes = [2, 128], strides = [1, 1]} : vector<4x128xf32> to vector<2x128xf32>
      %116 = vector.extract_strided_slice %114 {offsets = [2, 0], sizes = [2, 128], strides = [1, 1]} : vector<4x128xf32> to vector<2x128xf32>
      %117 = arith.divf %115, %116 : vector<2x128xf32>
      %118 = math.tanh %117 : vector<2x128xf32>
      %c3_i32 = arith.constant 3 : i32
      %119 = arith.index_cast %c3_i32 : i32 to index
      %c0_23 = arith.constant 0 : index
      %c0_24 = arith.constant 0 : index
      %120 = vector.load %arg1[%119, %c0_23, %c0_24] : memref<8x2x512xf32, #tpu.memory_space<vmem>>, vector<1x2x512xf32>
      %121 = vector.shape_cast %120 : vector<1x2x512xf32> to vector<2x512xf32>
      %cst_25 = arith.constant dense<0.000000e+00> : vector<2x512xf32>
      %122 = tpu.matmul %118, %3, %cst_25 {dimension_numbers = #tpu.dot_dimension_numbers<[1], [0], [0], [1], [0, 0, 1, 1], [], []>} : vector<2x128xf32>, vector<128x512xf32>, vector<2x512xf32> -> vector<2x512xf32>
      %123 = arith.addf %121, %122 : vector<2x512xf32>
      %124 = vector.extract_strided_slice %123 {offsets = [0, 0], sizes = [2, 128], strides = [1, 1]} : vector<2x512xf32> to vector<2x128xf32>
      %125 = vector.extract_strided_slice %123 {offsets = [0, 128], sizes = [2, 128], strides = [1, 1]} : vector<2x512xf32> to vector<2x128xf32>
      %126 = vector.extract_strided_slice %123 {offsets = [0, 256], sizes = [2, 128], strides = [1, 1]} : vector<2x512xf32> to vector<2x128xf32>
      %127 = vector.extract_strided_slice %123 {offsets = [0, 384], sizes = [2, 128], strides = [1, 1]} : vector<2x512xf32> to vector<2x128xf32>
      %128 = arith.negf %127 : vector<2x128xf32>
      %129 = math.exp %128 : vector<2x128xf32>
      %cst_26 = arith.constant 1.000000e+00 : f32
      %130 = vector.broadcast %cst_26 : f32 to vector<2x128xf32>
      %131 = arith.addf %130, %129 : vector<2x128xf32>
      %132 = arith.divf %130, %131 : vector<2x128xf32>
      %133 = math.tanh %124 : vector<2x128xf32>
      %134 = arith.mulf %125, %133 : vector<2x128xf32>
      %cst_27 = arith.constant 0.000000e+00 : f32
      %135 = vector.broadcast %cst_27 : f32 to vector<2x128xf32>
      %136 = arith.subf %135, %132 : vector<2x128xf32>
      %137 = math.exp %136 : vector<2x128xf32>
      %138 = arith.mulf %104, %137 : vector<2x128xf32>
      %139 = arith.maximumf %138, %126 : vector<2x128xf32>
      %140 = arith.subf %104, %132 : vector<2x128xf32>
      %141 = arith.subf %140, %139 : vector<2x128xf32>
      %142 = math.exp %141 : vector<2x128xf32>
      %143 = arith.subf %126, %139 : vector<2x128xf32>
      %144 = math.exp %143 : vector<2x128xf32>
      %145 = tpu.concatenate %142, %142 in 0 : vector<2x128xf32>, vector<2x128xf32> -> vector<4x128xf32>
      %146 = arith.mulf %114, %145 : vector<4x128xf32>
      %147 = arith.mulf %134, %144 : vector<2x128xf32>
      %148 = tpu.concatenate %147, %144 in 0 : vector<2x128xf32>, vector<2x128xf32> -> vector<4x128xf32>
      %149 = arith.addf %146, %148 : vector<4x128xf32>
      %150 = vector.extract_strided_slice %149 {offsets = [0, 0], sizes = [2, 128], strides = [1, 1]} : vector<4x128xf32> to vector<2x128xf32>
      %151 = vector.extract_strided_slice %149 {offsets = [2, 0], sizes = [2, 128], strides = [1, 1]} : vector<4x128xf32> to vector<2x128xf32>
      %152 = arith.divf %150, %151 : vector<2x128xf32>
      %153 = math.tanh %152 : vector<2x128xf32>
      %c4_i32 = arith.constant 4 : i32
      %154 = tpu.concatenate %153, %149, %139 in 0 : vector<2x128xf32>, vector<4x128xf32>, vector<2x128xf32> -> vector<8x128xf32>
      %c0_28 = arith.constant 0 : index
      %c0_29 = arith.constant 0 : index
      %155 = vector.load %arg4[%c0_28, %c0_29] : memref<8x128xf32, #tpu.memory_space<vmem>>, vector<8x128xf32>
      tpu.vector_store %arg4[%c0_28, %c0_29], %154 {strides = array<i32>} : memref<8x128xf32, #tpu.memory_space<vmem>>, vector<8x128xf32>,
    } else {
    }
    return
  }
  func.func @transform_0(%arg0: i32) -> (i32, i32, i32) {
    %c0_i32 = arith.constant 0 : i32
    %c0_i32_0 = arith.constant 0 : i32
    %c0_i32_1 = arith.constant 0 : i32
    return %arg0, %c0_i32, %c0_i32_0 : i32, i32, i32
  }
  func.func @transform_1(%arg0: i32) -> (i32, i32) {
    %c0_i32 = arith.constant 0 : i32
    %c0_i32_0 = arith.constant 0 : i32
    %c0_i32_1 = arith.constant 0 : i32
    return %c0_i32, %c0_i32_0 : i32, i32
  }
  func.func @transform_2(%arg0: i32) -> (i32, i32) {
    %c0_i32 = arith.constant 0 : i32
    %c0_i32_0 = arith.constant 0 : i32
    %c0_i32_1 = arith.constant 0 : i32
    return %c0_i32, %c0_i32_0 : i32, i32
  }
  func.func @transform_3(%arg0: i32) -> (i32, i32) {
    %c0_i32 = arith.constant 0 : i32
    %c0_i32_0 = arith.constant 0 : i32
    %c0_i32_1 = arith.constant 0 : i32
    return %c0_i32, %c0_i32_0 : i32, i32
  }
}

</mosaic_0001>

<bundles_post_ra>
// kernel: rwa_forward_pallas.1
= control target key start
LH: loop header
LB: loop body
LE: loop exit
PB: predicated region body
PF: predicated region fallthrough
CT: control target
= control target key end

     0   :  { %s4568_s12 = smov 0   ;;  %s5852_s0 = inlined_call_operand.vmem [shape: f32[16,2,512], index: 0, kind: input, shape index: {}]   ;;  %s5853_s1 = inlined_call_operand.vmem [shape: f32[8,128], index: 1, kind: input, shape index: {}]   ;;  %s5854_s2 = inlined_call_operand.vmem [shape: f32[128,512], index: 2, kind: input, shape index: {}]   ;;  %s5855_s3 = inlined_call_operand.vmem [shape: f32[8,128], index: 3, kind: output, shape index: {}]  }
   0x1 LB: > { %s4574_s13 = sadd.s32 4294967295, %s4542_s12   ;;  %p3532_p0 = scmp.ge.s32.totalorder %s4542_s12, 1  ;;  %s4542_s12 = sphi %s4568_s12, %s13_s12  }
   0x2   : > { %p134_p1 = scmp.lt.s32.totalorder %s4542_s12, 3 }
   0x4   : > { %p135_p2 = pnand %p3532_p0, %p134_p1 }
   0x6   : > { %138 = sbr.rel (%p135_p2) target bundleno = 4111 (0x100f), region = 32 }
   0xd   : > { %s3533_s14 = sshll.u32 %s4574_s13, 3  ;;  %p3536_p4 = scmp.ne.s32.totalorder %s4574_s13, 0 }
   0xe   : > { %p155_p3 = scmp.lt.s32.totalorder %s3533_s14, 15  ;;  %v165_v0 = vld [vmem:[%s5853_s1] sm:$0xff] (!%p3536_p4) }
   0xf   : > { %164 = sbr.rel (%p3536_p4) target bundleno = 22 (0x16), region = 36  ;;  %166 = vst [vmem:[%s5855_s3] sm:$0xff] (!%p3536_p4), %v165_v0 }
  0x10   : > { %s6025_s14 = smov (!%p155_p3, %s3533_s14), 15 }
  0x11   : > { %s3563_s15 = sshll.u32 %s6025_s14, 3 }
  0x12   : > { %s4582_s18 = scalar_lea.vmem %s5852_s0, %s3563_s15 }
  0x16 PF: > { %v4594_v1 = vld [vmem:[%s5854_s2] sm:$0xff]  ;;  %v4599_v2 = vld [vmem:[%s5854_s2 + $0x8] sm:$0xff]  ;;  %v4604_v3 = vld [vmem:[%s5854_s2 + $0x10] sm:$0xff]  ;;  %p3537_p5 = scmp.ge.s32.totalorder %s4574_s13, 1 }
  0x17   : > { %v4609_v4 = vld [vmem:[%s5854_s2 + $0x18] sm:$0xff]  ;;  %v4614_v5 = vld [vmem:[%s5854_s2 + $0x20] sm:$0xff]  ;;  %v4619_v6 = vld [vmem:[%s5854_s2 + $0x28] sm:$0xff]  ;;  %vm476_vm0 = vcmask (!%p3537_p5), 1041408   ;;  %vm2405_vm1 = vcmask (!%p3537_p5), 1045504  }
  0x18   : > { %5908 = vst [vmem:[#allocation2_spill] sm:$0xff] %v4619_v6  ;;  %v4624_v7 = vld [vmem:[%s5854_s2 + $0x30] sm:$0xff]  ;;  %v4629_v8 = vld [vmem:[%s5854_s2 + $0x38] sm:$0xff]  ;;  %v4634_v9 = vld [vmem:[%s5854_s2 + $0x40] sm:$0xff] }
  0x19   : > { %5909 = vst [vmem:[#allocation3_spill] sm:$0xff] %v4624_v7  ;;  %v4639_v10 = vld [vmem:[%s5854_s2 + $0x48] sm:$0xff]  ;;  %v4644_v11 = vld [vmem:[%s5854_s2 + $0x50] sm:$0xff]  ;;  %v4649_v12 = vld [vmem:[%s5854_s2 + $0x58] sm:$0xff] }
  0x1a   : > { %5910 = vst [vmem:[#allocation4_spill] sm:$0xff] %v4639_v10  ;;  %5911 = vst [vmem:[#allocation5_spill] sm:$0xff] %v4649_v12  ;;  %v4654_v13 = vld [vmem:[%s5854_s2 + $0x60] sm:$0xff]  ;;  %v4659_v14 = vld [vmem:[%s5854_s2 + $0x68] sm:$0xff] }
  0x1b   : > { %5912 = vst [vmem:[#allocation6_spill] sm:$0xff] %v4659_v14  ;;  %v4664_v15 = vld [vmem:[%s5854_s2 + $0x70] sm:$0xff]  ;;  %v4669_v16 = vld [vmem:[%s5854_s2 + $0x78] sm:$0xff]  ;;  %v4674_v17 = vld [vmem:[%s5854_s2 + $0x80] sm:$0xff] }
  0x1c   : > { %5913 = vst [vmem:[#allocation7_spill] sm:$0xff] %v4664_v15  ;;  %5914 = vst [vmem:[#allocation8_spill] sm:$0xff] %v4669_v16  ;;  %v4679_v18 = vld [vmem:[%s5854_s2 + $0x88] sm:$0xff]  ;;  %v4684_v19 = vld [vmem:[%s5854_s2 + $0x90] sm:$0xff] }
  0x1d   : > { %5915 = vst [vmem:[#allocation9_spill] sm:$0xff] %v4674_v17  ;;  %5916 = vst [vmem:[#allocation10_spill] sm:$0xff] %v4679_v18  ;;  %v4689_v20 = vld [vmem:[%s5854_s2 + $0x98] sm:$0xff]  ;;  %v4694_v21 = vld [vmem:[%s5854_s2 + $0xa0] sm:$0xff] }
  0x1e   : > { %5917 = vst [vmem:[#allocation11_spill] sm:$0xff] %v4684_v19  ;;  %5918 = vst [vmem:[#allocation12_spill] sm:$0xff] %v4689_v20  ;;  %v4699_v22 = vld [vmem:[%s5854_s2 + $0xa8] sm:$0xff]  ;;  %v4704_v23 = vld [vmem:[%s5854_s2 + $0xb0] sm:$0xff] }
  0x1f   : > { %5919 = vst [vmem:[#allocation13_spill] sm:$0xff] %v4694_v21  ;;  %5920 = vst [vmem:[#allocation14_spill] sm:$0xff] %v4699_v22  ;;  %v4709_v24 = vld [vmem:[%s5854_s2 + $0xb8] sm:$0xff]  ;;  %v4714_v25 = vld [vmem:[%s5854_s2 + $0xc0] sm:$0xff] }
  0x20   : > { %5921 = vst [vmem:[#allocation15_spill] sm:$0xff] %v4704_v23  ;;  %5922 = vst [vmem:[#allocation16_spill] sm:$0xff] %v4709_v24  ;;  %v4719_v26 = vld [vmem:[%s5854_s2 + $0xc8] sm:$0xff]  ;;  %v4724_v27 = vld [vmem:[%s5854_s2 + $0xd0] sm:$0xff] }
  0x21   : > { %5923 = vst [vmem:[#allocation17_spill] sm:$0xff] %v4714_v25  ;;  %5924 = vst [vmem:[#allocation18_spill] sm:$0xff] %v4719_v26  ;;  %v4729_v28 = vld [vmem:[%s5854_s2 + $0xd8] sm:$0xff]  ;;  %v4734_v29 = vld [vmem:[%s5854_s2 + $0xe0] sm:$0xff] }
  0x22   : > { %5925 = vst [vmem:[#allocation19_spill] sm:$0xff] %v4724_v27  ;;  %5926 = vst [vmem:[#allocation20_spill] sm:$0xff] %v4729_v28  ;;  %v4739_v30 = vld [vmem:[%s5854_s2 + $0xe8] sm:$0xff]  ;;  %v4744_v31 = vld [vmem:[%s5854_s2 + $0xf0] sm:$0xff] }
  0x23   : > { %5927 = vst [vmem:[#allocation21_spill] sm:$0xff] %v4734_v29  ;;  %5928 = vst [vmem:[#allocation22_spill] sm:$0xff] %v4739_v30  ;;  %v4749_v32 = vld [vmem:[%s5854_s2 + $0xf8] sm:$0xff]  ;;  %v4754_v33 = vld [vmem:[%s5854_s2 + $0x100] sm:$0xff] }
  0x24   : > { %5929 = vst [vmem:[#allocation23_spill] sm:$0xff] %v4744_v31  ;;  %5930 = vst [vmem:[#allocation24_spill] sm:$0xff] %v4749_v32  ;;  %v4759_v34 = vld [vmem:[%s5854_s2 + $0x108] sm:$0xff]  ;;  %v4764_v35 = vld [vmem:[%s5854_s2 + $0x110] sm:$0xff] }
  0x25   : > { %5931 = vst [vmem:[#allocation25_spill] sm:$0xff] %v4754_v33  ;;  %5932 = vst [vmem:[#allocation26_spill] sm:$0xff] %v4759_v34  ;;  %v4769_v36 = vld [vmem:[%s5854_s2 + $0x118] sm:$0xff]  ;;  %v4774_v37 = vld [vmem:[%s5854_s2 + $0x120] sm:$0xff] }
  0x26   : > { %5933 = vst [vmem:[#allocation27_spill] sm:$0xff] %v4764_v35  ;;  %5934 = vst [vmem:[#allocation28_spill] sm:$0xff] %v4769_v36  ;;  %v4779_v38 = vld [vmem:[%s5854_s2 + $0x128] sm:$0xff]  ;;  %v4784_v39 = vld [vmem:[%s5854_s2 + $0x130] sm:$0xff] }
  0x27   : > { %5935 = vst [vmem:[#allocation29_spill] sm:$0xff] %v4774_v37  ;;  %5936 = vst [vmem:[#allocation30_spill] sm:$0xff] %v4779_v38  ;;  %v4789_v40 = vld [vmem:[%s5854_s2 + $0x138] sm:$0xff]  ;;  %v4794_v41 = vld [vmem:[%s5854_s2 + $0x140] sm:$0xff] }
  0x28   : > { %5937 = vst [vmem:[#allocation31_spill] sm:$0xff] %v4784_v39  ;;  %5938 = vst [vmem:[#allocation32_spill] sm:$0xff] %v4789_v40  ;;  %v4799_v42 = vld [vmem:[%s5854_s2 + $0x148] sm:$0xff]  ;;  %v4804_v43 = vld [vmem:[%s5854_s2 + $0x150] sm:$0xff] }
  0x29   : > { %5939 = vst [vmem:[#allocation33_spill] sm:$0xff] %v4794_v41  ;;  %5940 = vst [vmem:[#allocation34_spill] sm:$0xff] %v4799_v42  ;;  %v4809_v44 = vld [vmem:[%s5854_s2 + $0x158] sm:$0xff]  ;;  %v4814_v45 = vld [vmem:[%s5854_s2 + $0x160] sm:$0xff] }
  0x2a   : > { %5941 = vst [vmem:[#allocation35_spill] sm:$0xff] %v4804_v43  ;;  %5942 = vst [vmem:[#allocation36_spill] sm:$0xff] %v4809_v44  ;;  %v4819_v46 = vld [vmem:[%s5854_s2 + $0x168] sm:$0xff]  ;;  %v4824_v47 = vld [vmem:[%s5854_s2 + $0x170] sm:$0xff] }
  0x2b   : > { %5943 = vst [vmem:[#allocation37_spill] sm:$0xff] %v4814_v45  ;;  %5944 = vst [vmem:[#allocation38_spill] sm:$0xff] %v4819_v46  ;;  %v4829_v48 = vld [vmem:[%s5854_s2 + $0x178] sm:$0xff]  ;;  %v4834_v49 = vld [vmem:[%s5854_s2 + $0x180] sm:$0xff] }
  0x2c   : > { %5945 = vst [vmem:[#allocation39_spill] sm:$0xff] %v4824_v47  ;;  %5946 = vst [vmem:[#allocation40_spill] sm:$0xff] %v4829_v48  ;;  %v4839_v50 = vld [vmem:[%s5854_s2 + $0x188] sm:$0xff]  ;;  %v4844_v51 = vld [vmem:[%s5854_s2 + $0x190] sm:$0xff] }
  0x2d   : > { %5947 = vst [vmem:[#allocation41_spill] sm:$0xff] %v4834_v49  ;;  %5948 = vst [vmem:[#allocation42_spill] sm:$0xff] %v4839_v50  ;;  %v4849_v52 = vld [vmem:[%s5854_s2 + $0x198] sm:$0xff]  ;;  %v4854_v53 = vld [vmem:[%s5854_s2 + $0x1a0] sm:$0xff] }
  0x2e   : > { %5949 = vst [vmem:[#allocation43_spill] sm:$0xff] %v4844_v51  ;;  %5950 = vst [vmem:[#allocation44_spill] sm:$0xff] %v4849_v52  ;;  %v4859_v54 = vld [vmem:[%s5854_s2 + $0x1a8] sm:$0xff]  ;;  %v4864_v55 = vld [vmem:[%s5854_s2 + $0x1b0] sm:$0xff]  ;;  %234 = sbr.rel (%p3537_p5) target bundleno = 2744 (0xab8), region = 40 }
  0x2f   : > { %5951 = vst [vmem:[#allocation45_spill] sm:$0xff] %v4854_v53  ;;  %5952 = vst [vmem:[#allocation46_spill] sm:$0xff] %v4859_v54  ;;  %v4869_v56 = vld [vmem:[%s5854_s2 + $0x1b8] sm:$0xff]  ;;  %v4874_v57 = vld [vmem:[%s5854_s2 + $0x1c0] sm:$0xff] }
  0x30   : > { %5953 = vst [vmem:[#allocation47_spill] sm:$0xff] %v4864_v55  ;;  %5954 = vst [vmem:[#allocation48_spill] sm:$0xff] %v4869_v56  ;;  %v4879_v58 = vld [vmem:[%s5854_s2 + $0x1c8] sm:$0xff]  ;;  %v4884_v59 = vld [vmem:[%s5854_s2 + $0x1d0] sm:$0xff] }
  0x31   : > { %5955 = vst [vmem:[#allocation49_spill] sm:$0xff] %v4874_v57  ;;  %5956 = vst [vmem:[#allocation50_spill] sm:$0xff] %v4879_v58  ;;  %v4889_v60 = vld [vmem:[%s5854_s2 + $0x1d8] sm:$0xff]  ;;  %v4894_v61 = vld [vmem:[%s5854_s2 + $0x1e0] sm:$0xff]  ;;  %v4922_v57 = vpack.c.bf16 (!%p3537_p5), %v4614_v5, %v4594_v1 }
  0x32   : > { %5957 = vst [vmem:[#allocation51_spill] sm:$0xff] %v4884_v59  ;;  %5958 = vst [vmem:[#allocation52_spill] sm:$0xff] %v4889_v60  ;;  %v4899_v62 = vld [vmem:[%s5854_s2 + $0x1e8] sm:$0xff]  ;;  %v4904_v63 = vld [vmem:[%s5854_s2 + $0x1f0] sm:$0xff]  ;;  %v4914_v59 = vpack.c.bf16 (!%p3537_p5), %v4619_v6, %v4599_v2  ;;  %v4934_v6 = vpack.c.bf16 (!%p3537_p5), %v4669_v16, %v4649_v12  ;;  %v4952_v16 = vpack.c.bf16 (!%p3537_p5), %v4699_v22, %v4679_v18 }
  0x33   : > { %5959 = vst [vmem:[#allocation53_spill] sm:$0xff] %v4894_v61  ;;  %5960 = vst [vmem:[#allocation54_spill] sm:$0xff] %v4899_v62  ;;  %v4909_v0 = vld [vmem:[%s5854_s2 + $0x1f8] sm:$0xff]  ;;  %v4918_v61 = vpack.c.bf16 (!%p3537_p5), %v4629_v8, %v4609_v4  ;;  %v4956_v12 = vpack.c.bf16 (!%p3537_p5), %v4709_v24, %v4689_v20  ;;  %v4968_v22 = vpack.c.bf16 (!%p3537_p5), %v4704_v23, %v4684_v19 }
  0x34   : > { %5961 = vst [vmem:[#allocation55_spill] sm:$0xff] %v4904_v63  ;;  %5962 = vst [vmem:[#allocation56_spill] sm:$0xff] %v4909_v0  ;;  %v4926_v63 = vpack.c.bf16 (!%p3537_p5), %v4624_v7, %v4604_v3  ;;  %v4930_v0 = vpack.c.bf16 (!%p3537_p5), %v4659_v14, %v4639_v10  ;;  %3565 = vmatprep.subr.bf16.mxu0 (!%p3537_p5), %v4914_v59  ;;  %v4942_v7 = vpack.c.bf16 (!%p3537_p5), %v4654_v13, %v4634_v9  ;;  %v5865_v10 = vmov (!%p3537_p5), 0.0  }
  0x35   : > { %3597 = vmatprep.subr.bf16.mxu1 %v4918_v61  ;;  %3567 = vmatpush1.bf16.msra.mxu0 %v4922_v57  ;;  %v4946_v14 = vpack.c.bf16 %v4664_v15, %v4644_v11  ;;  %v4964_v15 = vpack.c.bf16 %v4694_v21, %v4674_v17  ;;  %v4974_v24 = vpack.c.bf16 %v4739_v30, %v4719_v26 }
  0x36   : > { %3599 = vmatpush1.bf16.msra.mxu1 %v4926_v63  ;;  %3569 = vmatprep.subr.bf16.mxu0 %v4930_v0  ;;  %v4984_v23 = vpack.c.bf16 %v4734_v29, %v4714_v25  ;;  %v4988_v19 = vpack.c.bf16 %v4744_v31, %v4724_v27  ;;  %v5004_v31 = vpack.c.bf16 %v4774_v37, %v4754_v33  ;;  %v236_v25 = vld [vmem:[%s4582_s18] sm:$0xff] }
  0x37   : > { %3601 = vmatprep.subr.bf16.mxu1 %v4934_v6  ;;  %301 = vmatprep.mubr.f32.mxu0 %v5865_v10  ;;  %v5008_v27 = vpack.c.bf16 %v4784_v39, %v4764_v35  ;;  %v5024_v39 = vpack.c.bf16 %v4814_v45, %v4794_v41  ;;  %v5028_v35 = vpack.c.bf16 %v4824_v47, %v4804_v43 }
  0x38   : > { %372 = vmatprep.mubr.f32.mxu1 %v5865_v10  ;;  %v4978_v10 = vpack.c.bf16 %v4749_v32, %v4729_v28  ;;  %v4994_v32 = vpack.c.bf16 %v4779_v38, %v4759_v34  ;;  %v4998_v28 = vpack.c.bf16 %v4789_v40, %v4769_v36  ;;  %v5014_v40 = vpack.c.bf16 %v4819_v46, %v4799_v42 }
  0x39   : > { %3571 = vmatpush1.bf16.msra.mxu0 %v4942_v7  ;;  %v5018_v36 = vpack.c.bf16 %v4829_v48, %v4809_v44  ;;  %v5034_v48 = vpack.c.bf16 %v4859_v54, %v4839_v50  ;;  %v5038_v44 = vpack.c.bf16 %v4869_v56, %v4849_v52  ;;  %v5044_v47 = vpack.c.bf16 %v4854_v53, %v4834_v49  ;;  %v5964_v53 = vld [vmem:[#allocation49_spill] sm:$0xff] }
  0x3a   : > { %3603 = vmatpush1.bf16.msra.mxu1 %v4946_v14  ;;  %3573 = vmatprep.subr.bf16.mxu0 %v4952_v16  ;;  %v5048_v43 = vpack.c.bf16 %v4864_v55, %v4844_v51  ;;  %v5054_v56 = vpack.c.bf16 %v4899_v62, %v4879_v58  ;;  %v5965_v49 = vld [vmem:[#allocation53_spill] sm:$0xff]  ;;  %v5966_v51 = vld [vmem:[#allocation51_spill] sm:$0xff] }
  0x3b   : > { %3605 = vmatprep.subr.bf16.mxu1 %v4956_v12  ;;  %v5963_v52 = vld [vmem:[#allocation56_spill] sm:$0xff]  ;;  %v5064_v55 = vpack.c.bf16 %v5965_v49, %v5964_v53  ;;  %v5967_v50 = vld [vmem:[#allocation55_spill] sm:$0xff]  ;;  %v5968_v49 = vmov 0.0   ;;  %v388_v53 = vlaneseq }
  0x3c   : > { %v5058_v54 = vpack.c.bf16 %v5963_v52, %v4889_v60  ;;  %v5068_v45 = vpack.c.bf16 %v5967_v50, %v5966_v51  ;;  %v5077_v52 = vld [vmem:[%s5855_s3] sm:$0xff]  ;;  %v4545_v50 = vmov 1983009808  }
  0x3d   : > { %3575 = vmatpush1.bf16.msra.mxu0 %v4964_v15  ;;  %v386_v51 = vunpack.c.l.s4 %v4545_v50  ;;  %v389_v62 = vshrl.u32 %v388_v53, 7 }
  0x3e   : > { %3607 = vmatpush1.bf16.msra.mxu1 %v4968_v22  ;;  %3577 = vmatprep.subr.bf16.mxu0 %v4974_v24 }
  0x3f   : > { %3609 = vmatprep.subr.bf16.mxu1 %v4978_v10  ;;  %v387_v60 = vunpack.c.0.s8 %v386_v51 }
  0x41   : > { %3579 = vmatpush1.bf16.msra.mxu0 %v4984_v23  ;;  %v5117_v46 = vsub.s32 %v387_v60, %v389_v62 }
  0x42   : > { %3611 = vmatpush1.bf16.msra.mxu1 %v4988_v19  ;;  %3581 = vmatprep.subr.bf16.mxu0 %v4994_v32 }
  0x43   : > { %3613 = vmatprep.subr.bf16.mxu1 %v4998_v28 }
  0x45   : > { %3583 = vmatpush1.bf16.msra.mxu0 %v5004_v31 }
  0x46   : > { %3615 = vmatpush1.bf16.msra.mxu1 %v5008_v27  ;;  %3585 = vmatprep.subr.bf16.mxu0 %v5014_v40 }
  0x47   : > { %3617 = vmatprep.subr.bf16.mxu1 %v5018_v36 }
  0x49   : > { %3587 = vmatpush1.bf16.msra.mxu0 %v5024_v39 }
  0x4a   : > { %3619 = vmatpush1.bf16.msra.mxu1 %v5028_v35  ;;  %3589 = vmatprep.subr.bf16.mxu0 %v5034_v48 }
  0x4b   : > { %3621 = vmatprep.subr.bf16.mxu1 %v5038_v44 }
  0x4d   : > { %3591 = vmatpush1.bf16.msra.mxu0 %v5044_v47 }
  0x4e   : > { %3623 = vmatpush1.bf16.msra.mxu1 %v5048_v43  ;;  %3593 = vmatprep.subr.bf16.mxu0 %v5054_v56 }
  0x4f   : > { %3625 = vmatprep.subr.bf16.mxu1 %v5058_v54 }
  0x51   : > { %3595 = vmatpush1.bf16.msra.mxu0 %v5064_v55 }
  0x52   : > { %3627 = vmatpush1.bf16.msra.mxu1 %v5068_v45  ;;  %3629 = vmatprep.subr.bf16.mxu0 %v4914_v59 }
  0x53   : > { %3661 = vmatprep.subr.bf16.mxu1 %v4918_v61 }
  0x54   : > { %302 = vmatmul.mubr.f32.vlgmr.msra.gmra.mrb[0].mxu0 %v5077_v52 }
  0x55   : > { %373 = vmatmul.mubr.f32.vlgmr.msra.gmra.mrb[0].mxu1 %v5077_v52  ;;  %3631 = vmatpush1.bf16.msra.mxu0 %v4922_v57 }
  0x56   : > { %3663 = vmatpush1.bf16.msra.mxu1 %v4926_v63  ;;  %3633 = vmatprep.subr.bf16.mxu0 %v4930_v0 }
  0x57   : > { %3665 = vmatprep.subr.bf16.mxu1 %v4934_v6  ;;  %573 = vmatprep.mubr.f32.mxu0 %v5968_v49 }
  0x58   : > { %644 = vmatprep.mubr.f32.mxu1 %v5968_v49 }
  0x59   : > { %3635 = vmatpush1.bf16.msra.mxu0 %v4942_v7 }
  0x5a   : > { %3667 = vmatpush1.bf16.msra.mxu1 %v4946_v14  ;;  %3637 = vmatprep.subr.bf16.mxu0 %v4952_v16 }
  0x5b   : > { %3669 = vmatprep.subr.bf16.mxu1 %v4956_v12 }
  0x5d   : > { %3639 = vmatpush1.bf16.msra.mxu0 %v4964_v15 }
  0x5e   : > { %3671 = vmatpush1.bf16.msra.mxu1 %v4968_v22  ;;  %3641 = vmatprep.subr.bf16.mxu0 %v4974_v24 }
  0x5f   : > { %3673 = vmatprep.subr.bf16.mxu1 %v4978_v10 }
  0x61   : > { %3643 = vmatpush1.bf16.msra.mxu0 %v4984_v23 }
  0x62   : > { %3675 = vmatpush1.bf16.msra.mxu1 %v4988_v19  ;;  %3645 = vmatprep.subr.bf16.mxu0 %v4994_v32 }
  0x63   : > { %3677 = vmatprep.subr.bf16.mxu1 %v4998_v28 }
  0x65   : > { %3647 = vmatpush1.bf16.msra.mxu0 %v5004_v31 }
  0x66   : > { %3679 = vmatpush1.bf16.msra.mxu1 %v5008_v27  ;;  %3649 = vmatprep.subr.bf16.mxu0 %v5014_v40 }
  0x67   : > { %3681 = vmatprep.subr.bf16.mxu1 %v5018_v36 }
  0x69   : > { %3651 = vmatpush1.bf16.msra.mxu0 %v5024_v39 }
  0x6a   : > { %3683 = vmatpush1.bf16.msra.mxu1 %v5028_v35  ;;  %3653 = vmatprep.subr.bf16.mxu0 %v5034_v48 }
  0x6b   : > { %3685 = vmatprep.subr.bf16.mxu1 %v5038_v44 }
  0x6d   : > { %3655 = vmatpush1.bf16.msra.mxu0 %v5044_v47 }
  0x6e   : > { %3687 = vmatpush1.bf16.msra.mxu1 %v5048_v43  ;;  %3657 = vmatprep.subr.bf16.mxu0 %v5054_v56 }
  0x6f   : > { %3689 = vmatprep.subr.bf16.mxu1 %v5058_v54 }
  0x71   : > { %3659 = vmatpush1.bf16.msra.mxu0 %v5064_v55 }
  0x72   : > { %3691 = vmatpush1.bf16.msra.mxu1 %v5068_v45  ;;  %3693 = vmatprep.subr.bf16.mxu0 %v4914_v59 }
  0x73   : > { %3725 = vmatprep.subr.bf16.mxu1 %v4918_v61 }
 0x127   : > { %v303_v58 = vpop.f32.mrb[0].mxu0 }
 0x128   : > { %v374_v41 = vpop.f32.mrb[0].mxu1  ;;  %v305_v42 = vpop.f32.mrb[1].mxu0 }
 0x129   : > { %v376_v37 = vpop.f32.mrb[1].mxu1  ;;  %v383_v33 = vcombine.low %v303_v58, %v305_v42 }
 0x12a   : > { %v384_v38 = vcombine.low %v374_v41, %v376_v37 }
 0x12b   : > { %v391_v34 = vrot.slane %v383_v33, %v5117_v46 }
 0x12c   : > { %v398_v29 = vrot.slane %v384_v38, %v5117_v46 }
 0x12e   : > { %v399_v30 = vcombine.low %v391_v34, %v398_v29 }
 0x130   : > { %v401_v26 = vadd.f32 %v399_v30, %v236_v25 }
 0x132   : > { %v403_v21 = vrot.slane %v401_v26, 6  ;;  %v436_v29 = vrot.slane %v401_v26, %v5117_v46 }
 0x134   : > { %v3538_v50 = vmul.f32 -1.442695, %v403_v21  ;;  %v437_v34 = vcombine.low %v436_v29, %v436_v29 }
 0x136   : > { %4344 = vpow2.f32 %v3538_v50 }
 0x140   : > { %v4345_v51 = vpop.eup %4344 }
 0x141   : > { %v408_v53 = vadd.f32 1.0, %v4345_v51 }
 0x143   : > { %4346 = vrcp.f32 %v408_v53  ;;  %v455_v53 = vrot.slane %v401_v26, 4 }
 0x14d   : > { %v4347_v17 = vpop.eup %4346 }
 0x14e   : > { %v415_v60 = vsub.f32 0.0, %v4347_v17  ;;  %v441_v20 = vcombine.low %v4347_v17, %v4347_v17 }
 0x150   : > { %v416_v62 = vmul.f32 1.442695, %v415_v60  ;;  %v448_v33 = vrot.slane %v441_v20, %v5117_v46 }
 0x152   : > { %4348 = vpow2.f32 %v416_v62  ;;  %v449_v30 = vcombine.low %v448_v33, %v448_v33 }
 0x154   : > { %v451_v58 = vsub.f32 %v5077_v52, %v449_v30 }
 0x15c   : > { %v4349_v42 = vpop.eup %4348 }
 0x15d   : > { %v419_v37 = vcombine.low %v4349_v42, %v4349_v42 }
 0x15f   : > { %v426_v38 = vrot.slane %v419_v37, %v5117_v46 }
 0x161   : > { %v427_v25 = vcombine.low %v426_v38, %v426_v38 }
 0x163   : > { %v429_v21 = vmul.f32 %v427_v25, %v5077_v52  ;;  %v412_v25 = vrot.slane %v401_v26, 2 }
 0x165   : > { %v5126_v41 = vmax.f32 %v429_v21, %v437_v34 }
 0x167   : > { %v452_v50 = vsub.f32 %v451_v58, %v5126_v41  ;;  %v458_v17 = vcombine.high %v5126_v41, %v5126_v41 }
 0x169   : > { %v453_v51 = vmul.f32 1.442695, %v452_v50  ;;  %v465_v20 = vrot.slane %v458_v17, %v5117_v46 }
 0x16b   : > { %4350 = vpow2.f32 %v453_v51  ;;  %v466_v60 = vcombine.high %v465_v20, %v465_v20 }
 0x16c   : > { %4352 = vtanh.f32 %v401_v26 }
 0x16d   : > { %v468_v62 = vsub.f32 %v455_v53, %v466_v60 }
 0x16f   : > { %v469_v42 = vmul.f32 1.442695, %v468_v62 }
 0x171   : > { %4354 = vpow2.f32 %v469_v42 }
 0x175   : > { %v4351_v37 = vpop.eup %4350 }
 0x176   : > { %v472_v33 = vrot.slane %v4351_v37, 6  ;;  %v474_v38 = vrot.slane %v4351_v37, 4  ;;  %v4353_v29 = vpop.eup %4352 }
 0x177   : > { %v414_v30 = vmul.f32 %v4353_v29, %v412_v25 }
 0x178   : > { %v477_v21 = vsel %vm476_vm0, %v472_v33, %v474_v38 }
 0x179   : > { %v479_v17 = vrot.slane %v477_v21, 6 }
 0x17b   : > { %v4355_v34 = vpop.eup %4354  ;;  %v481_v53 = vmul.f32 %v479_v17, %v5077_v52  ;;  %v3539_v17 = vld [vmem:[%s4582_s18 + $0x8] sm:$0xff] }
 0x17c   : > { %v482_v58 = vmul.f32 %v4355_v34, %v414_v30  ;;  %v484_v50 = vcombine.low %v4355_v34, %v4355_v34 }
 0x17e   : > { %v491_v51 = vrot.slane %v484_v50, %v5117_v46 }
 0x180   : > { %v493_v20 = vsel %vm476_vm0, %v482_v58, %v491_v51 }
 0x181   : > { %v495_v60 = vrot.slane %v493_v20, 6 }
 0x183   : > { %v5137_v62 = vadd.f32 %v495_v60, %v481_v53 }
 0x185   : > { %v499_v42 = vrot.slane %v5137_v62, 2 }
 0x187   : > { %4356 = vrcp.f32 %v499_v42 }
 0x191   : > { %v4357_v26 = vpop.eup %4356 }
 0x192   : > { %v502_v37 = vmul.f32 %v4357_v26, %v5137_v62 }
 0x194   : > { %4358 = vtanh.f32 %v502_v37 }
 0x19e   : > { %v4359_v33 = vpop.eup %4358 }
 0x19f   : > { %v507_v38 = vrot.slane %v4359_v33, 2 }
 0x1a1   : > { %574 = vmatmul.mubr.f32.vlgmr.msra.gmra.mrb[2].mxu0 %v507_v38  ;;  %645 = vmatmul.mubr.f32.vlgmr.msra.gmra.mrb[2].mxu1 %v507_v38 }
 0x1a2   : > { %3695 = vmatpush1.bf16.msra.mxu0 %v4922_v57  ;;  %3727 = vmatpush1.bf16.msra.mxu1 %v4926_v63 }
 0x1a3   : > { %3697 = vmatprep.subr.bf16.mxu0 %v4930_v0  ;;  %3729 = vmatprep.subr.bf16.mxu1 %v4934_v6 }
 0x1a4   : > { %844 = vmatprep.mubr.f32.mxu0 %v5968_v49  ;;  %915 = vmatprep.mubr.f32.mxu1 %v5968_v49 }
 0x1a6   : > { %3699 = vmatpush1.bf16.msra.mxu0 %v4942_v7  ;;  %3731 = vmatpush1.bf16.msra.mxu1 %v4946_v14 }
 0x1a7   : > { %3701 = vmatprep.subr.bf16.mxu0 %v4952_v16  ;;  %3733 = vmatprep.subr.bf16.mxu1 %v4956_v12 }
 0x1aa   : > { %3703 = vmatpush1.bf16.msra.mxu0 %v4964_v15  ;;  %3735 = vmatpush1.bf16.msra.mxu1 %v4968_v22 }
 0x1ab   : > { %3705 = vmatprep.subr.bf16.mxu0 %v4974_v24  ;;  %3737 = vmatprep.subr.bf16.mxu1 %v4978_v10 }
 0x1ae   : > { %3707 = vmatpush1.bf16.msra.mxu0 %v4984_v23  ;;  %3739 = vmatpush1.bf16.msra.mxu1 %v4988_v19 }
 0x1af   : > { %3709 = vmatprep.subr.bf16.mxu0 %v4994_v32  ;;  %3741 = vmatprep.subr.bf16.mxu1 %v4998_v28 }
 0x1b2   : > { %3711 = vmatpush1.bf16.msra.mxu0 %v5004_v31  ;;  %3743 = vmatpush1.bf16.msra.mxu1 %v5008_v27 }
 0x1b3   : > { %3713 = vmatprep.subr.bf16.mxu0 %v5014_v40  ;;  %3745 = vmatprep.subr.bf16.mxu1 %v5018_v36 }
 0x1b6   : > { %3715 = vmatpush1.bf16.msra.mxu0 %v5024_v39  ;;  %3747 = vmatpush1.bf16.msra.mxu1 %v5028_v35 }
 0x1b7   : > { %3717 = vmatprep.subr.bf16.mxu0 %v5034_v48  ;;  %3749 = vmatprep.subr.bf16.mxu1 %v5038_v44 }
 0x1ba   : > { %3719 = vmatpush1.bf16.msra.mxu0 %v5044_v47  ;;  %3751 = vmatpush1.bf16.msra.mxu1 %v5048_v43 }
 0x1bb   : > { %3721 = vmatprep.subr.bf16.mxu0 %v5054_v56  ;;  %3753 = vmatprep.subr.bf16.mxu1 %v5058_v54 }
 0x1be   : > { %3723 = vmatpush1.bf16.msra.mxu0 %v5064_v55  ;;  %3755 = vmatpush1.bf16.msra.mxu1 %v5068_v45 }
 0x1bf   : > { %3757 = vmatprep.subr.bf16.mxu0 %v4914_v59  ;;  %3789 = vmatprep.subr.bf16.mxu1 %v4918_v61 }
 0x274   : > { %v575_v52 = vpop.f32.mrb[2].mxu0  ;;  %v646_v29 = vpop.f32.mrb[2].mxu1 }
 0x275   : > { %v577_v25 = vpop.f32.mrb[3].mxu0  ;;  %v648_v30 = vpop.f32.mrb[3].mxu1 }
 0x276   : > { %v655_v21 = vcombine.low %v575_v52, %v577_v25  ;;  %v656_v34 = vcombine.low %v646_v29, %v648_v30 }
 0x278   : > { %v663_v58 = vrot.slane %v655_v21, %v5117_v46  ;;  %v670_v50 = vrot.slane %v656_v34, %v5117_v46 }
 0x27a   : > { %v671_v51 = vcombine.low %v663_v58, %v670_v50 }
 0x27c   : > { %v673_v20 = vadd.f32 %v3539_v17, %v671_v51 }
 0x27e   : > { %v675_v53 = vrot.slane %v673_v20, 6  ;;  %v708_v21 = vrot.slane %v673_v20, %v5117_v46 }
 0x280   : > { %v3540_v60 = vmul.f32 -1.442695, %v675_v53  ;;  %v709_v17 = vcombine.low %v708_v21, %v708_v21 }
 0x282   : > { %4360 = vpow2.f32 %v3540_v60 }
 0x28c   : > { %v4361_v42 = vpop.eup %4360 }
 0x28d   : > { %v680_v26 = vadd.f32 1.0, %v4361_v42 }
 0x28f   : > { %4362 = vrcp.f32 %v680_v26 }
 0x299   : > { %v4363_v37 = vpop.eup %4362 }
 0x29a   : > { %v687_v33 = vsub.f32 0.0, %v4363_v37  ;;  %v713_v18 = vcombine.low %v4363_v37, %v4363_v37  ;;  %v727_v37 = vrot.slane %v673_v20, 4 }
 0x29c   : > { %v688_v38 = vmul.f32 1.442695, %v687_v33  ;;  %v720_v25 = vrot.slane %v713_v18, %v5117_v46 }
 0x29e   : > { %4364 = vpow2.f32 %v688_v38  ;;  %v721_v58 = vcombine.low %v720_v25, %v720_v25 }
 0x2a0   : > { %v723_v53 = vsub.f32 %v5126_v41, %v721_v58 }
 0x2a8   : > { %v4365_v52 = vpop.eup %4364 }
 0x2a9   : > { %v691_v29 = vcombine.low %v4365_v52, %v4365_v52 }
 0x2ab   : > { %v698_v30 = vrot.slane %v691_v29, %v5117_v46 }
 0x2ad   : > { %v699_v34 = vcombine.low %v698_v30, %v698_v30 }
 0x2af   : > { %v701_v50 = vmul.f32 %v699_v34, %v5126_v41  ;;  %v684_v41 = vrot.slane %v673_v20, 2 }
 0x2b1   : > { %v5182_v51 = vmax.f32 %v701_v50, %v709_v17 }
 0x2b3   : > { %v724_v60 = vsub.f32 %v723_v53, %v5182_v51  ;;  %v730_v42 = vcombine.high %v5182_v51, %v5182_v51 }
 0x2b5   : > { %v725_v26 = vmul.f32 1.442695, %v724_v60  ;;  %v737_v18 = vrot.slane %v730_v42, %v5117_v46 }
 0x2b7   : > { %4366 = vpow2.f32 %v725_v26  ;;  %v738_v33 = vcombine.high %v737_v18, %v737_v18 }
 0x2b8   : > { %4368 = vtanh.f32 %v673_v20 }
 0x2b9   : > { %v740_v38 = vsub.f32 %v727_v37, %v738_v33 }
 0x2bb   : > { %v741_v52 = vmul.f32 1.442695, %v740_v38 }
 0x2bd   : > { %4370 = vpow2.f32 %v741_v52 }
 0x2c1   : > { %v4367_v29 = vpop.eup %4366 }
 0x2c2   : > { %v744_v25 = vrot.slane %v4367_v29, 6  ;;  %v746_v30 = vrot.slane %v4367_v29, 4  ;;  %v4369_v21 = vpop.eup %4368 }
 0x2c3   : > { %v686_v34 = vmul.f32 %v4369_v21, %v684_v41 }
 0x2c4   : > { %v748_v58 = vsel %vm476_vm0, %v744_v25, %v746_v30 }
 0x2c5   : > { %v750_v60 = vrot.slane %v748_v58, 6 }
 0x2c7   : > { %v4371_v50 = vpop.eup %4370  ;;  %v752_v18 = vmul.f32 %v750_v60, %v5137_v62 }
 0x2c8   : > { %v753_v17 = vmul.f32 %v4371_v50, %v686_v34  ;;  %v755_v53 = vcombine.low %v4371_v50, %v4371_v50 }
 0x2ca   : > { %v762_v42 = vrot.slane %v755_v53, %v5117_v46  ;;  %v3541_v53 = vld [vmem:[%s4582_s18 + $0x10] sm:$0xff] }
 0x2cc   : > { %v764_v26 = vsel %vm476_vm0, %v753_v17, %v762_v42 }
 0x2cd   : > { %v766_v37 = vrot.slane %v764_v26, 6 }
 0x2cf   : > { %v5193_v33 = vadd.f32 %v766_v37, %v752_v18 }
 0x2d1   : > { %v770_v38 = vrot.slane %v5193_v33, 2 }
 0x2d3   : > { %4372 = vrcp.f32 %v770_v38 }
 0x2dd   : > { %v4373_v20 = vpop.eup %4372 }
 0x2de   : > { %v773_v52 = vmul.f32 %v4373_v20, %v5193_v33 }
 0x2e0   : > { %4374 = vtanh.f32 %v773_v52 }
 0x2ea   : > { %v4375_v29 = vpop.eup %4374 }
 0x2eb   : > { %v778_v25 = vrot.slane %v4375_v29, 2 }
 0x2ed   : > { %845 = vmatmul.mubr.f32.vlgmr.msra.gmra.mrb[4].mxu0 %v778_v25  ;;  %916 = vmatmul.mubr.f32.vlgmr.msra.gmra.mrb[4].mxu1 %v778_v25 }
 0x2ee   : > { %3759 = vmatpush1.bf16.msra.mxu0 %v4922_v57  ;;  %3791 = vmatpush1.bf16.msra.mxu1 %v4926_v63 }
 0x2ef   : > { %3761 = vmatprep.subr.bf16.mxu0 %v4930_v0  ;;  %3793 = vmatprep.subr.bf16.mxu1 %v4934_v6 }
 0x2f0   : > { %1115 = vmatprep.mubr.f32.mxu0 %v5968_v49  ;;  %1186 = vmatprep.mubr.f32.mxu1 %v5968_v49 }
 0x2f2   : > { %3763 = vmatpush1.bf16.msra.mxu0 %v4942_v7  ;;  %3795 = vmatpush1.bf16.msra.mxu1 %v4946_v14 }
 0x2f3   : > { %3765 = vmatprep.subr.bf16.mxu0 %v4952_v16  ;;  %3797 = vmatprep.subr.bf16.mxu1 %v4956_v12 }
 0x2f6   : > { %3767 = vmatpush1.bf16.msra.mxu0 %v4964_v15  ;;  %3799 = vmatpush1.bf16.msra.mxu1 %v4968_v22 }
 0x2f7   : > { %3769 = vmatprep.subr.bf16.mxu0 %v4974_v24  ;;  %3801 = vmatprep.subr.bf16.mxu1 %v4978_v10 }
 0x2fa   : > { %3771 = vmatpush1.bf16.msra.mxu0 %v4984_v23  ;;  %3803 = vmatpush1.bf16.msra.mxu1 %v4988_v19 }
 0x2fb   : > { %3773 = vmatprep.subr.bf16.mxu0 %v4994_v32  ;;  %3805 = vmatprep.subr.bf16.mxu1 %v4998_v28 }
 0x2fe   : > { %3775 = vmatpush1.bf16.msra.mxu0 %v5004_v31  ;;  %3807 = vmatpush1.bf16.msra.mxu1 %v5008_v27 }
 0x2ff   : > { %3777 = vmatprep.subr.bf16.mxu0 %v5014_v40  ;;  %3809 = vmatprep.subr.bf16.mxu1 %v5018_v36 }
 0x302   : > { %3779 = vmatpush1.bf16.msra.mxu0 %v5024_v39  ;;  %3811 = vmatpush1.bf16.msra.mxu1 %v5028_v35 }
 0x303   : > { %3781 = vmatprep.subr.bf16.mxu0 %v5034_v48  ;;  %3813 = vmatprep.subr.bf16.mxu1 %v5038_v44 }
 0x306   : > { %3783 = vmatpush1.bf16.msra.mxu0 %v5044_v47  ;;  %3815 = vmatpush1.bf16.msra.mxu1 %v5048_v43 }
 0x307   : > { %3785 = vmatprep.subr.bf16.mxu0 %v5054_v56  ;;  %3817 = vmatprep.subr.bf16.mxu1 %v5058_v54 }
 0x30a   : > { %3787 = vmatpush1.bf16.msra.mxu0 %v5064_v55  ;;  %3819 = vmatpush1.bf16.msra.mxu1 %v5068_v45 }
 0x30b   : > { %3821 = vmatprep.subr.bf16.mxu0 %v4914_v59  ;;  %3853 = vmatprep.subr.bf16.mxu1 %v4918_v61 }
 0x3c0   : > { %v846_v62 = vpop.f32.mrb[4].mxu0  ;;  %v917_v30 = vpop.f32.mrb[4].mxu1 }
 0x3c1   : > { %v848_v21 = vpop.f32.mrb[5].mxu0  ;;  %v919_v41 = vpop.f32.mrb[5].mxu1 }
 0x3c2   : > { %v926_v34 = vcombine.low %v846_v62, %v848_v21  ;;  %v927_v58 = vcombine.low %v917_v30, %v919_v41 }
 0x3c4   : > { %v934_v50 = vrot.slane %v926_v34, %v5117_v46  ;;  %v941_v17 = vrot.slane %v927_v58, %v5117_v46 }
 0x3c6   : > { %v942_v60 = vcombine.low %v934_v50, %v941_v17 }
 0x3c8   : > { %v944_v42 = vadd.f32 %v3541_v53, %v942_v60 }
 0x3ca   : > { %v946_v26 = vrot.slane %v944_v42, 6  ;;  %v979_v34 = vrot.slane %v944_v42, %v5117_v46 }
 0x3cc   : > { %v3542_v18 = vmul.f32 -1.442695, %v946_v26  ;;  %v980_v53 = vcombine.low %v979_v34, %v979_v34 }
 0x3ce   : > { %4376 = vpow2.f32 %v3542_v18 }
 0x3d8   : > { %v4377_v37 = vpop.eup %4376 }
 0x3d9   : > { %v951_v38 = vadd.f32 1.0, %v4377_v37 }
 0x3db   : > { %4378 = vrcp.f32 %v951_v38 }
 0x3e5   : > { %v4379_v20 = vpop.eup %4378 }
 0x3e6   : > { %v958_v52 = vsub.f32 0.0, %v4379_v20  ;;  %v984_v25 = vcombine.low %v4379_v20, %v4379_v20 }
 0x3e8   : > { %v959_v29 = vmul.f32 1.442695, %v958_v52  ;;  %v991_v21 = vrot.slane %v984_v25, %v5117_v46  ;;  %v998_v52 = vrot.slane %v944_v42, 4 }
 0x3ea   : > { %4380 = vpow2.f32 %v959_v29  ;;  %v992_v50 = vcombine.low %v991_v21, %v991_v21 }
 0x3ec   : > { %v994_v26 = vsub.f32 %v5182_v51, %v992_v50 }
 0x3f4   : > { %v4381_v62 = vpop.eup %4380 }
 0x3f5   : > { %v962_v30 = vcombine.low %v4381_v62, %v4381_v62 }
 0x3f7   : > { %v969_v41 = vrot.slane %v962_v30, %v5117_v46 }
 0x3f9   : > { %v970_v58 = vcombine.low %v969_v41, %v969_v41 }
 0x3fb   : > { %v972_v17 = vmul.f32 %v970_v58, %v5182_v51  ;;  %v955_v51 = vrot.slane %v944_v42, 2 }
 0x3fd   : > { %v5238_v60 = vmax.f32 %v972_v17, %v980_v53 }
 0x3ff   : > { %v995_v18 = vsub.f32 %v994_v26, %v5238_v60  ;;  %v1001_v37 = vcombine.high %v5238_v60, %v5238_v60 }
 0x401   : > { %v996_v38 = vmul.f32 1.442695, %v995_v18  ;;  %v1008_v20 = vrot.slane %v1001_v37, %v5117_v46 }
 0x403   : > { %4382 = vpow2.f32 %v996_v38  ;;  %v1009_v29 = vcombine.high %v1008_v20, %v1008_v20 }
 0x404   : > { %4384 = vtanh.f32 %v944_v42 }
 0x405   : > { %v1011_v25 = vsub.f32 %v998_v52, %v1009_v29 }
 0x407   : > { %v1012_v62 = vmul.f32 1.442695, %v1011_v25 }
 0x409   : > { %4386 = vpow2.f32 %v1012_v62 }
 0x40d   : > { %v4383_v30 = vpop.eup %4382 }
 0x40e   : > { %v1015_v21 = vrot.slane %v4383_v30, 6  ;;  %v1017_v41 = vrot.slane %v4383_v30, 4  ;;  %v4385_v34 = vpop.eup %4384 }
 0x40f   : > { %v957_v58 = vmul.f32 %v4385_v34, %v955_v51 }
 0x410   : > { %v1019_v50 = vsel %vm476_vm0, %v1015_v21, %v1017_v41 }
 0x411   : > { %v1021_v18 = vrot.slane %v1019_v50, 6 }
 0x413   : > { %v4387_v17 = vpop.eup %4386  ;;  %v1023_v20 = vmul.f32 %v1021_v18, %v5193_v33 }
 0x414   : > { %v1024_v53 = vmul.f32 %v4387_v17, %v957_v58  ;;  %v1026_v26 = vcombine.low %v4387_v17, %v4387_v17 }
 0x416   : > { %v1033_v37 = vrot.slane %v1026_v26, %v5117_v46  ;;  %v3543_v26 = vld [vmem:[%s4582_s18 + $0x18] sm:$0xff] }
 0x418   : > { %v1035_v38 = vsel %vm476_vm0, %v1024_v53, %v1033_v37 }
 0x419   : > { %v1037_v52 = vrot.slane %v1035_v38, 6 }
 0x41b   : > { %v5249_v29 = vadd.f32 %v1037_v52, %v1023_v20 }
 0x41d   : > { %v1041_v25 = vrot.slane %v5249_v29, 2 }
 0x41f   : > { %4388 = vrcp.f32 %v1041_v25 }
 0x429   : > { %v4389_v42 = vpop.eup %4388 }
 0x42a   : > { %v1044_v62 = vmul.f32 %v4389_v42, %v5249_v29 }
 0x42c   : > { %4390 = vtanh.f32 %v1044_v62 }
 0x436   : > { %v4391_v30 = vpop.eup %4390 }
 0x437   : > { %v1049_v21 = vrot.slane %v4391_v30, 2 }
 0x439   : > { %1116 = vmatmul.mubr.f32.vlgmr.msra.gmra.mrb[6].mxu0 %v1049_v21  ;;  %1187 = vmatmul.mubr.f32.vlgmr.msra.gmra.mrb[6].mxu1 %v1049_v21 }
 0x43a   : > { %3823 = vmatpush1.bf16.msra.mxu0 %v4922_v57  ;;  %3855 = vmatpush1.bf16.msra.mxu1 %v4926_v63 }
 0x43b   : > { %3825 = vmatprep.subr.bf16.mxu0 %v4930_v0  ;;  %3857 = vmatprep.subr.bf16.mxu1 %v4934_v6 }
 0x43c   : > { %1386 = vmatprep.mubr.f32.mxu0 %v5968_v49  ;;  %1457 = vmatprep.mubr.f32.mxu1 %v5968_v49 }
 0x43e   : > { %3827 = vmatpush1.bf16.msra.mxu0 %v4942_v7  ;;  %3859 = vmatpush1.bf16.msra.mxu1 %v4946_v14 }
 0x43f   : > { %3829 = vmatprep.subr.bf16.mxu0 %v4952_v16  ;;  %3861 = vmatprep.subr.bf16.mxu1 %v4956_v12 }
 0x442   : > { %3831 = vmatpush1.bf16.msra.mxu0 %v4964_v15  ;;  %3863 = vmatpush1.bf16.msra.mxu1 %v4968_v22 }
 0x443   : > { %3833 = vmatprep.subr.bf16.mxu0 %v4974_v24  ;;  %3865 = vmatprep.subr.bf16.mxu1 %v4978_v10 }
 0x446   : > { %3835 = vmatpush1.bf16.msra.mxu0 %v4984_v23  ;;  %3867 = vmatpush1.bf16.msra.mxu1 %v4988_v19 }
 0x447   : > { %3837 = vmatprep.subr.bf16.mxu0 %v4994_v32  ;;  %3869 = vmatprep.subr.bf16.mxu1 %v4998_v28 }
 0x44a   : > { %3839 = vmatpush1.bf16.msra.mxu0 %v5004_v31  ;;  %3871 = vmatpush1.bf16.msra.mxu1 %v5008_v27 }
 0x44b   : > { %3841 = vmatprep.subr.bf16.mxu0 %v5014_v40  ;;  %3873 = vmatprep.subr.bf16.mxu1 %v5018_v36 }
 0x44e   : > { %3843 = vmatpush1.bf16.msra.mxu0 %v5024_v39  ;;  %3875 = vmatpush1.bf16.msra.mxu1 %v5028_v35 }
 0x44f   : > { %3845 = vmatprep.subr.bf16.mxu0 %v5034_v48  ;;  %3877 = vmatprep.subr.bf16.mxu1 %v5038_v44 }
 0x452   : > { %3847 = vmatpush1.bf16.msra.mxu0 %v5044_v47  ;;  %3879 = vmatpush1.bf16.msra.mxu1 %v5048_v43 }
 0x453   : > { %3849 = vmatprep.subr.bf16.mxu0 %v5054_v56  ;;  %3881 = vmatprep.subr.bf16.mxu1 %v5058_v54 }
 0x456   : > { %3851 = vmatpush1.bf16.msra.mxu0 %v5064_v55  ;;  %3883 = vmatpush1.bf16.msra.mxu1 %v5068_v45 }
 0x457   : > { %3885 = vmatprep.subr.bf16.mxu0 %v4914_v59  ;;  %3917 = vmatprep.subr.bf16.mxu1 %v4918_v61 }
 0x50c   : > { %v1117_v33 = vpop.f32.mrb[6].mxu0  ;;  %v1188_v41 = vpop.f32.mrb[6].mxu1 }
 0x50d   : > { %v1119_v34 = vpop.f32.mrb[7].mxu0  ;;  %v1190_v51 = vpop.f32.mrb[7].mxu1 }
 0x50e   : > { %v1197_v58 = vcombine.low %v1117_v33, %v1119_v34  ;;  %v1198_v50 = vcombine.low %v1188_v41, %v1190_v51 }
 0x510   : > { %v1205_v17 = vrot.slane %v1197_v58, %v5117_v46  ;;  %v1212_v53 = vrot.slane %v1198_v50, %v5117_v46 }
 0x512   : > { %v1213_v18 = vcombine.low %v1205_v17, %v1212_v53 }
 0x514   : > { %v1215_v37 = vadd.f32 %v3543_v26, %v1213_v18 }
 0x516   : > { %v1217_v38 = vrot.slane %v1215_v37, 6  ;;  %v1250_v58 = vrot.slane %v1215_v37, %v5117_v46 }
 0x518   : > { %v3544_v20 = vmul.f32 -1.442695, %v1217_v38  ;;  %v1251_v26 = vcombine.low %v1250_v58, %v1250_v58 }
 0x51a   : > { %4392 = vpow2.f32 %v3544_v20 }
 0x524   : > { %v4393_v52 = vpop.eup %4392 }
 0x525   : > { %v1222_v25 = vadd.f32 1.0, %v4393_v52 }
 0x527   : > { %4394 = vrcp.f32 %v1222_v25 }
 0x531   : > { %v4395_v42 = vpop.eup %4394 }
 0x532   : > { %v1229_v62 = vsub.f32 0.0, %v4395_v42  ;;  %v1255_v21 = vcombine.low %v4395_v42, %v4395_v42 }
 0x534   : > { %v1230_v30 = vmul.f32 1.442695, %v1229_v62  ;;  %v1262_v34 = vrot.slane %v1255_v21, %v5117_v46  ;;  %v1269_v62 = vrot.slane %v1215_v37, 4 }
 0x536   : > { %4396 = vpow2.f32 %v1230_v30  ;;  %v1263_v17 = vcombine.low %v1262_v34, %v1262_v34 }
 0x538   : > { %v1265_v38 = vsub.f32 %v5238_v60, %v1263_v17 }
 0x540   : > { %v4397_v33 = vpop.eup %4396 }
 0x541   : > { %v1233_v41 = vcombine.low %v4397_v33, %v4397_v33 }
 0x543   : > { %v1240_v51 = vrot.slane %v1233_v41, %v5117_v46 }
 0x545   : > { %v1241_v50 = vcombine.low %v1240_v51, %v1240_v51 }
 0x547   : > { %v1243_v53 = vmul.f32 %v1241_v50, %v5238_v60  ;;  %v1226_v60 = vrot.slane %v1215_v37, 2 }
 0x549   : > { %v5294_v18 = vmax.f32 %v1243_v53, %v1251_v26 }
 0x54b   : > { %v1266_v20 = vsub.f32 %v1265_v38, %v5294_v18  ;;  %v1272_v52 = vcombine.high %v5294_v18, %v5294_v18 }
 0x54d   : > { %v1267_v25 = vmul.f32 1.442695, %v1266_v20  ;;  %v1279_v42 = vrot.slane %v1272_v52, %v5117_v46 }
 0x54f   : > { %4398 = vpow2.f32 %v1267_v25  ;;  %v1280_v30 = vcombine.high %v1279_v42, %v1279_v42 }
 0x550   : > { %4400 = vtanh.f32 %v1215_v37 }
 0x551   : > { %v1282_v21 = vsub.f32 %v1269_v62, %v1280_v30 }
 0x553   : > { %v1283_v33 = vmul.f32 1.442695, %v1282_v21 }
 0x555   : > { %4402 = vpow2.f32 %v1283_v33 }
 0x559   : > { %v4399_v41 = vpop.eup %4398 }
 0x55a   : > { %v1286_v34 = vrot.slane %v4399_v41, 6  ;;  %v1288_v51 = vrot.slane %v4399_v41, 4  ;;  %v4401_v58 = vpop.eup %4400 }
 0x55b   : > { %v1228_v50 = vmul.f32 %v4401_v58, %v1226_v60 }
 0x55c   : > { %v1290_v17 = vsel %vm476_vm0, %v1286_v34, %v1288_v51 }
 0x55d   : > { %v1292_v20 = vrot.slane %v1290_v17, 6 }
 0x55f   : > { %v4403_v53 = vpop.eup %4402  ;;  %v1294_v42 = vmul.f32 %v1292_v20, %v5249_v29 }
 0x560   : > { %v1295_v26 = vmul.f32 %v4403_v53, %v1228_v50  ;;  %v1297_v38 = vcombine.low %v4403_v53, %v4403_v53 }
 0x562   : > { %v1304_v52 = vrot.slane %v1297_v38, %v5117_v46  ;;  %v3545_v38 = vld [vmem:[%s4582_s18 + $0x20] sm:$0xff] }
 0x564   : > { %v1306_v25 = vsel %vm476_vm0, %v1295_v26, %v1304_v52 }
 0x565   : > { %v1308_v62 = vrot.slane %v1306_v25, 6 }
 0x567   : > { %v5305_v30 = vadd.f32 %v1308_v62, %v1294_v42 }
 0x569   : > { %v1312_v21 = vrot.slane %v5305_v30, 2 }
 0x56b   : > { %4404 = vrcp.f32 %v1312_v21 }
 0x575   : > { %v4405_v37 = vpop.eup %4404 }
 0x576   : > { %v1315_v33 = vmul.f32 %v4405_v37, %v5305_v30 }
 0x578   : > { %4406 = vtanh.f32 %v1315_v33 }
 0x582   : > { %v4407_v41 = vpop.eup %4406 }
 0x583   : > { %v1320_v34 = vrot.slane %v4407_v41, 2 }
 0x585   : > { %1387 = vmatmul.mubr.f32.vlgmr.msra.gmra.mrb[8].mxu0 %v1320_v34  ;;  %1458 = vmatmul.mubr.f32.vlgmr.msra.gmra.mrb[8].mxu1 %v1320_v34 }
 0x586   : > { %3887 = vmatpush1.bf16.msra.mxu0 %v4922_v57  ;;  %3919 = vmatpush1.bf16.msra.mxu1 %v4926_v63 }
 0x587   : > { %3889 = vmatprep.subr.bf16.mxu0 %v4930_v0  ;;  %3921 = vmatprep.subr.bf16.mxu1 %v4934_v6 }
 0x588   : > { %1657 = vmatprep.mubr.f32.mxu0 %v5968_v49  ;;  %1728 = vmatprep.mubr.f32.mxu1 %v5968_v49 }
 0x58a   : > { %3891 = vmatpush1.bf16.msra.mxu0 %v4942_v7  ;;  %3923 = vmatpush1.bf16.msra.mxu1 %v4946_v14 }
 0x58b   : > { %3893 = vmatprep.subr.bf16.mxu0 %v4952_v16  ;;  %3925 = vmatprep.subr.bf16.mxu1 %v4956_v12 }
 0x58e   : > { %3895 = vmatpush1.bf16.msra.mxu0 %v4964_v15  ;;  %3927 = vmatpush1.bf16.msra.mxu1 %v4968_v22 }
 0x58f   : > { %3897 = vmatprep.subr.bf16.mxu0 %v4974_v24  ;;  %3929 = vmatprep.subr.bf16.mxu1 %v4978_v10 }
 0x592   : > { %3899 = vmatpush1.bf16.msra.mxu0 %v4984_v23  ;;  %3931 = vmatpush1.bf16.msra.mxu1 %v4988_v19 }
 0x593   : > { %3901 = vmatprep.subr.bf16.mxu0 %v4994_v32  ;;  %3933 = vmatprep.subr.bf16.mxu1 %v4998_v28 }
 0x596   : > { %3903 = vmatpush1.bf16.msra.mxu0 %v5004_v31  ;;  %3935 = vmatpush1.bf16.msra.mxu1 %v5008_v27 }
 0x597   : > { %3905 = vmatprep.subr.bf16.mxu0 %v5014_v40  ;;  %3937 = vmatprep.subr.bf16.mxu1 %v5018_v36 }
 0x59a   : > { %3907 = vmatpush1.bf16.msra.mxu0 %v5024_v39  ;;  %3939 = vmatpush1.bf16.msra.mxu1 %v5028_v35 }
 0x59b   : > { %3909 = vmatprep.subr.bf16.mxu0 %v5034_v48  ;;  %3941 = vmatprep.subr.bf16.mxu1 %v5038_v44 }
 0x59e   : > { %3911 = vmatpush1.bf16.msra.mxu0 %v5044_v47  ;;  %3943 = vmatpush1.bf16.msra.mxu1 %v5048_v43 }
 0x59f   : > { %3913 = vmatprep.subr.bf16.mxu0 %v5054_v56  ;;  %3945 = vmatprep.subr.bf16.mxu1 %v5058_v54 }
 0x5a2   : > { %3915 = vmatpush1.bf16.msra.mxu0 %v5064_v55  ;;  %3947 = vmatpush1.bf16.msra.mxu1 %v5068_v45 }
 0x5a3   : > { %3949 = vmatprep.subr.bf16.mxu0 %v4914_v59  ;;  %3981 = vmatprep.subr.bf16.mxu1 %v4918_v61 }
 0x658   : > { %v1388_v29 = vpop.f32.mrb[8].mxu0  ;;  %v1459_v51 = vpop.f32.mrb[8].mxu1 }
 0x659   : > { %v1390_v58 = vpop.f32.mrb[9].mxu0  ;;  %v1461_v60 = vpop.f32.mrb[9].mxu1 }
 0x65a   : > { %v1468_v50 = vcombine.low %v1388_v29, %v1390_v58  ;;  %v1469_v17 = vcombine.low %v1459_v51, %v1461_v60 }
 0x65c   : > { %v1476_v53 = vrot.slane %v1468_v50, %v5117_v46  ;;  %v1483_v26 = vrot.slane %v1469_v17, %v5117_v46 }
 0x65e   : > { %v1484_v20 = vcombine.low %v1476_v53, %v1483_v26 }
 0x660   : > { %v1486_v52 = vadd.f32 %v3545_v38, %v1484_v20 }
 0x662   : > { %v1488_v25 = vrot.slane %v1486_v52, 6  ;;  %v1521_v50 = vrot.slane %v1486_v52, %v5117_v46 }
 0x664   : > { %v3546_v42 = vmul.f32 -1.442695, %v1488_v25  ;;  %v1522_v38 = vcombine.low %v1521_v50, %v1521_v50 }
 0x666   : > { %4408 = vpow2.f32 %v3546_v42 }
 0x670   : > { %v4409_v62 = vpop.eup %4408 }
 0x671   : > { %v1493_v21 = vadd.f32 1.0, %v4409_v62 }
 0x673   : > { %4410 = vrcp.f32 %v1493_v21 }
 0x67d   : > { %v4411_v37 = vpop.eup %4410 }
 0x67e   : > { %v1500_v33 = vsub.f32 0.0, %v4411_v37  ;;  %v1526_v34 = vcombine.low %v4411_v37, %v4411_v37 }
 0x680   : > { %v1501_v41 = vmul.f32 1.442695, %v1500_v33  ;;  %v1533_v58 = vrot.slane %v1526_v34, %v5117_v46  ;;  %v1540_v33 = vrot.slane %v1486_v52, 4 }
 0x682   : > { %4412 = vpow2.f32 %v1501_v41  ;;  %v1534_v53 = vcombine.low %v1533_v58, %v1533_v58 }
 0x684   : > { %v1536_v25 = vsub.f32 %v5294_v18, %v1534_v53 }
 0x68c   : > { %v4413_v29 = vpop.eup %4412 }
 0x68d   : > { %v1504_v51 = vcombine.low %v4413_v29, %v4413_v29 }
 0x68f   : > { %v1511_v60 = vrot.slane %v1504_v51, %v5117_v46 }
 0x691   : > { %v1512_v17 = vcombine.low %v1511_v60, %v1511_v60 }
 0x693   : > { %v1514_v26 = vmul.f32 %v1512_v17, %v5294_v18  ;;  %v1497_v18 = vrot.slane %v1486_v52, 2 }
 0x695   : > { %v5350_v20 = vmax.f32 %v1514_v26, %v1522_v38 }
 0x697   : > { %v1537_v42 = vsub.f32 %v1536_v25, %v5350_v20  ;;  %v1543_v62 = vcombine.high %v5350_v20, %v5350_v20 }
 0x699   : > { %v1538_v21 = vmul.f32 1.442695, %v1537_v42  ;;  %v1550_v37 = vrot.slane %v1543_v62, %v5117_v46 }
 0x69b   : > { %4414 = vpow2.f32 %v1538_v21  ;;  %v1551_v41 = vcombine.high %v1550_v37, %v1550_v37 }
 0x69c   : > { %4416 = vtanh.f32 %v1486_v52 }
 0x69d   : > { %v1553_v34 = vsub.f32 %v1540_v33, %v1551_v41 }
 0x69f   : > { %v1554_v29 = vmul.f32 1.442695, %v1553_v34 }
 0x6a1   : > { %4418 = vpow2.f32 %v1554_v29 }
 0x6a5   : > { %v4415_v51 = vpop.eup %4414 }
 0x6a6   : > { %v1557_v58 = vrot.slane %v4415_v51, 6  ;;  %v1559_v60 = vrot.slane %v4415_v51, 4  ;;  %v4417_v50 = vpop.eup %4416 }
 0x6a7   : > { %v1499_v17 = vmul.f32 %v4417_v50, %v1497_v18 }
 0x6a8   : > { %v1561_v53 = vsel %vm476_vm0, %v1557_v58, %v1559_v60 }
 0x6a9   : > { %v1563_v42 = vrot.slane %v1561_v53, 6 }
 0x6ab   : > { %v4419_v26 = vpop.eup %4418  ;;  %v1565_v37 = vmul.f32 %v1563_v42, %v5305_v30 }
 0x6ac   : > { %v1566_v38 = vmul.f32 %v4419_v26, %v1499_v17  ;;  %v1568_v25 = vcombine.low %v4419_v26, %v4419_v26 }
 0x6ae   : > { %v1575_v62 = vrot.slane %v1568_v25, %v5117_v46  ;;  %v3547_v25 = vld [vmem:[%s4582_s18 + $0x28] sm:$0xff] }
 0x6b0   : > { %v1577_v21 = vsel %vm476_vm0, %v1566_v38, %v1575_v62 }
 0x6b1   : > { %v1579_v33 = vrot.slane %v1577_v21, 6 }
 0x6b3   : > { %v5361_v41 = vadd.f32 %v1579_v33, %v1565_v37 }
 0x6b5   : > { %v1583_v34 = vrot.slane %v5361_v41, 2 }
 0x6b7   : > { %4420 = vrcp.f32 %v1583_v34 }
 0x6c1   : > { %v4421_v52 = vpop.eup %4420 }
 0x6c2   : > { %v1586_v29 = vmul.f32 %v4421_v52, %v5361_v41 }
 0x6c4   : > { %4422 = vtanh.f32 %v1586_v29 }
 0x6ce   : > { %v4423_v51 = vpop.eup %4422 }
 0x6cf   : > { %v1591_v58 = vrot.slane %v4423_v51, 2 }
 0x6d1   : > { %1658 = vmatmul.mubr.f32.vlgmr.msra.gmra.mrb[10].mxu0 %v1591_v58  ;;  %1729 = vmatmul.mubr.f32.vlgmr.msra.gmra.mrb[10].mxu1 %v1591_v58 }
 0x6d2   : > { %3951 = vmatpush1.bf16.msra.mxu0 %v4922_v57  ;;  %3983 = vmatpush1.bf16.msra.mxu1 %v4926_v63 }
 0x6d3   : > { %3953 = vmatprep.subr.bf16.mxu0 %v4930_v0  ;;  %3985 = vmatprep.subr.bf16.mxu1 %v4934_v6 }
 0x6d4   : > { %1928 = vmatprep.mubr.f32.mxu0 %v5968_v49  ;;  %1999 = vmatprep.mubr.f32.mxu1 %v5968_v49 }
 0x6d6   : > { %3955 = vmatpush1.bf16.msra.mxu0 %v4942_v7  ;;  %3987 = vmatpush1.bf16.msra.mxu1 %v4946_v14 }
 0x6d7   : > { %3957 = vmatprep.subr.bf16.mxu0 %v4952_v16  ;;  %3989 = vmatprep.subr.bf16.mxu1 %v4956_v12 }
 0x6da   : > { %3959 = vmatpush1.bf16.msra.mxu0 %v4964_v15  ;;  %3991 = vmatpush1.bf16.msra.mxu1 %v4968_v22 }
 0x6db   : > { %3961 = vmatprep.subr.bf16.mxu0 %v4974_v24  ;;  %3993 = vmatprep.subr.bf16.mxu1 %v4978_v10 }
 0x6de   : > { %3963 = vmatpush1.bf16.msra.mxu0 %v4984_v23  ;;  %3995 = vmatpush1.bf16.msra.mxu1 %v4988_v19 }
 0x6df   : > { %3965 = vmatprep.subr.bf16.mxu0 %v4994_v32  ;;  %3997 = vmatprep.subr.bf16.mxu1 %v4998_v28 }
 0x6e2   : > { %3967 = vmatpush1.bf16.msra.mxu0 %v5004_v31  ;;  %3999 = vmatpush1.bf16.msra.mxu1 %v5008_v27 }
 0x6e3   : > { %3969 = vmatprep.subr.bf16.mxu0 %v5014_v40  ;;  %4001 = vmatprep.subr.bf16.mxu1 %v5018_v36 }
 0x6e6   : > { %3971 = vmatpush1.bf16.msra.mxu0 %v5024_v39  ;;  %4003 = vmatpush1.bf16.msra.mxu1 %v5028_v35 }
 0x6e7   : > { %3973 = vmatprep.subr.bf16.mxu0 %v5034_v48  ;;  %4005 = vmatprep.subr.bf16.mxu1 %v5038_v44 }
 0x6ea   : > { %3975 = vmatpush1.bf16.msra.mxu0 %v5044_v47  ;;  %4007 = vmatpush1.bf16.msra.mxu1 %v5048_v43 }
 0x6eb   : > { %3977 = vmatprep.subr.bf16.mxu0 %v5054_v56  ;;  %4009 = vmatprep.subr.bf16.mxu1 %v5058_v54 }
 0x6ee   : > { %3979 = vmatpush1.bf16.msra.mxu0 %v5064_v55  ;;  %4011 = vmatpush1.bf16.msra.mxu1 %v5068_v45 }
 0x6ef   : > { %4013 = vmatprep.subr.bf16.mxu0 %v4914_v59  ;;  %4045 = vmatprep.subr.bf16.mxu1 %v4918_v61 }
 0x7a4   : > { %v1659_v30 = vpop.f32.mrb[10].mxu0  ;;  %v1730_v60 = vpop.f32.mrb[10].mxu1 }
 0x7a5   : > { %v1661_v50 = vpop.f32.mrb[11].mxu0  ;;  %v1732_v18 = vpop.f32.mrb[11].mxu1 }
 0x7a6   : > { %v1739_v17 = vcombine.low %v1659_v30, %v1661_v50  ;;  %v1740_v53 = vcombine.low %v1730_v60, %v1732_v18 }
 0x7a8   : > { %v1747_v26 = vrot.slane %v1739_v17, %v5117_v46  ;;  %v1754_v38 = vrot.slane %v1740_v53, %v5117_v46 }
 0x7aa   : > { %v1755_v42 = vcombine.low %v1747_v26, %v1754_v38 }
 0x7ac   : > { %v1757_v62 = vadd.f32 %v3547_v25, %v1755_v42 }
 0x7ae   : > { %v1759_v21 = vrot.slane %v1757_v62, 6  ;;  %v1792_v50 = vrot.slane %v1757_v62, %v5117_v46 }
 0x7b0   : > { %v3548_v37 = vmul.f32 -1.442695, %v1759_v21  ;;  %v1793_v26 = vcombine.low %v1792_v50, %v1792_v50 }
 0x7b2   : > { %4424 = vpow2.f32 %v3548_v37 }
 0x7bc   : > { %v4425_v33 = vpop.eup %4424 }
 0x7bd   : > { %v1764_v59 = vadd.f32 1.0, %v4425_v33 }
 0x7bf   : > { %4426 = vrcp.f32 %v1764_v59  ;;  %v1811_v59 = vrot.slane %v1757_v62, 4 }
 0x7c9   : > { %v4427_v61 = vpop.eup %4426 }
 0x7ca   : > { %v1771_v34 = vsub.f32 0.0, %v4427_v61  ;;  %v1797_v29 = vcombine.low %v4427_v61, %v4427_v61 }
 0x7cc   : > { %v1772_v52 = vmul.f32 1.442695, %v1771_v34  ;;  %v1804_v30 = vrot.slane %v1797_v29, %v5117_v46 }
 0x7ce   : > { %4428 = vpow2.f32 %v1772_v52  ;;  %v1805_v17 = vcombine.low %v1804_v30, %v1804_v30 }
 0x7d0   : > { %v1807_v25 = vsub.f32 %v5350_v20, %v1805_v17 }
 0x7d8   : > { %v4429_v51 = vpop.eup %4428 }
 0x7d9   : > { %v1775_v58 = vcombine.low %v4429_v51, %v4429_v51 }
 0x7db   : > { %v1782_v60 = vrot.slane %v1775_v58, %v5117_v46 }
 0x7dd   : > { %v1783_v18 = vcombine.low %v1782_v60, %v1782_v60 }
 0x7df   : > { %v1785_v53 = vmul.f32 %v1783_v18, %v5350_v20  ;;  %v1768_v20 = vrot.slane %v1757_v62, 2 }
 0x7e1   : > { %v5406_v38 = vmax.f32 %v1785_v53, %v1793_v26 }
 0x7e3   : > { %v1808_v42 = vsub.f32 %v1807_v25, %v5406_v38  ;;  %v1814_v21 = vcombine.high %v5406_v38, %v5406_v38 }
 0x7e5   : > { %v1809_v37 = vmul.f32 1.442695, %v1808_v42  ;;  %v1821_v33 = vrot.slane %v1814_v21, %v5117_v46 }
 0x7e7   : > { %4430 = vpow2.f32 %v1809_v37  ;;  %v1822_v61 = vcombine.high %v1821_v33, %v1821_v33 }
 0x7e8   : > { %4432 = vtanh.f32 %v1757_v62 }
 0x7e9   : > { %v1824_v34 = vsub.f32 %v1811_v59, %v1822_v61 }
 0x7eb   : > { %v1825_v52 = vmul.f32 1.442695, %v1824_v34 }
 0x7ed   : > { %4434 = vpow2.f32 %v1825_v52 }
 0x7f1   : > { %v4431_v29 = vpop.eup %4430 }
 0x7f2   : > { %v1828_v51 = vrot.slane %v4431_v29, 6  ;;  %v1830_v58 = vrot.slane %v4431_v29, 4  ;;  %v4433_v30 = vpop.eup %4432 }
 0x7f3   : > { %v1770_v60 = vmul.f32 %v4433_v30, %v1768_v20 }
 0x7f4   : > { %v1832_v50 = vsel %vm476_vm0, %v1828_v51, %v1830_v58 }
 0x7f5   : > { %v1834_v26 = vrot.slane %v1832_v50, 6 }
 0x7f7   : > { %v4435_v18 = vpop.eup %4434  ;;  %v1836_v21 = vmul.f32 %v1834_v26, %v5361_v41 }
 0x7f8   : > { %v1837_v17 = vmul.f32 %v4435_v18, %v1770_v60  ;;  %v1839_v53 = vcombine.low %v4435_v18, %v4435_v18 }
 0x7fa   : > { %v1846_v25 = vrot.slane %v1839_v53, %v5117_v46 }
 0x7fc   : > { %v1848_v42 = vsel %vm476_vm0, %v1837_v17, %v1846_v25 }
 0x7fd   : > { %v1850_v37 = vrot.slane %v1848_v42, 6 }
 0x7ff   : > { %v5417_v33 = vadd.f32 %v1850_v37, %v1836_v21 }
 0x801   : > { %v1854_v59 = vrot.slane %v5417_v33, 2 }
 0x803   : > { %4436 = vrcp.f32 %v1854_v59 }
 0x80d   : > { %v4437_v62 = vpop.eup %4436 }
 0x80e   : > { %v1857_v61 = vmul.f32 %v4437_v62, %v5417_v33 }
 0x810   : > { %4438 = vtanh.f32 %v1857_v61 }
 0x81a   : > { %v4439_v34 = vpop.eup %4438 }
 0x81b   : > { %v1862_v52 = vrot.slane %v4439_v34, 2 }
 0x81d   : > { %1929 = vmatmul.mubr.f32.vlgmr.msra.gmra.mrb[12].mxu0 %v1862_v52  ;;  %2000 = vmatmul.mubr.f32.vlgmr.msra.gmra.mrb[12].mxu1 %v1862_v52 }
 0x81e   : > { %4015 = vmatpush1.bf16.msra.mxu0 %v4922_v57  ;;  %4047 = vmatpush1.bf16.msra.mxu1 %v4926_v63 }
 0x81f   : > { %4017 = vmatprep.subr.bf16.mxu0 %v4930_v0  ;;  %4049 = vmatprep.subr.bf16.mxu1 %v4934_v6 }
 0x820   : > { %2199 = vmatprep.mubr.f32.mxu0 %v5968_v49  ;;  %2270 = vmatprep.mubr.f32.mxu1 %v5968_v49 }
 0x822   : > { %4019 = vmatpush1.bf16.msra.mxu0 %v4942_v7  ;;  %4051 = vmatpush1.bf16.msra.mxu1 %v4946_v14 }
 0x823   : > { %4021 = vmatprep.subr.bf16.mxu0 %v4952_v16  ;;  %4053 = vmatprep.subr.bf16.mxu1 %v4956_v12 }
 0x826   : > { %4023 = vmatpush1.bf16.msra.mxu0 %v4964_v15  ;;  %4055 = vmatpush1.bf16.msra.mxu1 %v4968_v22  ;;  %v3549_v22 = vld [vmem:[%s4582_s18 + $0x30] sm:$0xff] }
 0x827   : > { %4025 = vmatprep.subr.bf16.mxu0 %v4974_v24  ;;  %4057 = vmatprep.subr.bf16.mxu1 %v4978_v10 }
 0x82a   : > { %4027 = vmatpush1.bf16.msra.mxu0 %v4984_v23  ;;  %4059 = vmatpush1.bf16.msra.mxu1 %v4988_v19 }
 0x82b   : > { %4029 = vmatprep.subr.bf16.mxu0 %v4994_v32  ;;  %4061 = vmatprep.subr.bf16.mxu1 %v4998_v28 }
 0x82e   : > { %4031 = vmatpush1.bf16.msra.mxu0 %v5004_v31  ;;  %4063 = vmatpush1.bf16.msra.mxu1 %v5008_v27 }
 0x82f   : > { %4033 = vmatprep.subr.bf16.mxu0 %v5014_v40  ;;  %4065 = vmatprep.subr.bf16.mxu1 %v5018_v36 }
 0x832   : > { %4035 = vmatpush1.bf16.msra.mxu0 %v5024_v39  ;;  %4067 = vmatpush1.bf16.msra.mxu1 %v5028_v35 }
 0x833   : > { %4037 = vmatprep.subr.bf16.mxu0 %v5034_v48  ;;  %4069 = vmatprep.subr.bf16.mxu1 %v5038_v44 }
 0x836   : > { %4039 = vmatpush1.bf16.msra.mxu0 %v5044_v47  ;;  %4071 = vmatpush1.bf16.msra.mxu1 %v5048_v43 }
 0x837   : > { %4041 = vmatprep.subr.bf16.mxu0 %v5054_v56  ;;  %4073 = vmatprep.subr.bf16.mxu1 %v5058_v54 }
 0x83a   : > { %4043 = vmatpush1.bf16.msra.mxu0 %v5064_v55  ;;  %4075 = vmatpush1.bf16.msra.mxu1 %v5068_v45 }
 0x8f0   : > { %v1930_v6 = vpop.f32.mrb[12].mxu0  ;;  %v2001_v7 = vpop.f32.mrb[12].mxu1 }
 0x8f1   : > { %v1932_v10 = vpop.f32.mrb[13].mxu0  ;;  %v2003_v12 = vpop.f32.mrb[13].mxu1 }
 0x8f2   : > { %v2010_v14 = vcombine.low %v1930_v6, %v1932_v10  ;;  %v2011_v15 = vcombine.low %v2001_v7, %v2003_v12 }
 0x8f4   : > { %v2018_v16 = vrot.slane %v2010_v14, %v5117_v46  ;;  %v2025_v19 = vrot.slane %v2011_v15, %v5117_v46 }
 0x8f6   : > { %v2026_v23 = vcombine.low %v2018_v16, %v2025_v19 }
 0x8f8   : > { %v2028_v24 = vadd.f32 %v3549_v22, %v2026_v23 }
 0x8fa   : > { %v2030_v27 = vrot.slane %v2028_v24, 6  ;;  %v2063_v48 = vrot.slane %v2028_v24, %v5117_v46  ;;  %v2082_v58 = vrot.slane %v2028_v24, 4 }
 0x8fc   : > { %v3550_v28 = vmul.f32 -1.442695, %v2030_v27  ;;  %v2064_v57 = vcombine.low %v2063_v48, %v2063_v48 }
 0x8fe   : > { %4440 = vpow2.f32 %v3550_v28 }
 0x908   : > { %v4441_v31 = vpop.eup %4440 }
 0x909   : > { %v2035_v32 = vadd.f32 1.0, %v4441_v31  ;;  %v3551_v31 = vld [vmem:[%s4582_s18 + $0x38] sm:$0xff] }
 0x90b   : > { %4442 = vrcp.f32 %v2035_v32 }
 0x915   : > { %v4443_v35 = vpop.eup %4442 }
 0x916   : > { %v2042_v36 = vsub.f32 0.0, %v4443_v35  ;;  %v2068_v40 = vcombine.low %v4443_v35, %v4443_v35 }
 0x918   : > { %v2043_v39 = vmul.f32 1.442695, %v2042_v36  ;;  %v2075_v45 = vrot.slane %v2068_v40, %v5117_v46 }
 0x91a   : > { %4444 = vpow2.f32 %v2043_v39  ;;  %v2076_v55 = vcombine.low %v2075_v45, %v2075_v45 }
 0x91c   : > { %v2078_v0 = vsub.f32 %v5406_v38, %v2076_v55 }
 0x924   : > { %v4445_v43 = vpop.eup %4444 }
 0x925   : > { %v2046_v44 = vcombine.low %v4445_v43, %v4445_v43 }
 0x927   : > { %v2053_v47 = vrot.slane %v2046_v44, %v5117_v46 }
 0x929   : > { %v2054_v54 = vcombine.low %v2053_v47, %v2053_v47 }
 0x92b   : > { %v2056_v56 = vmul.f32 %v2054_v54, %v5406_v38  ;;  %v2039_v38 = vrot.slane %v2028_v24, 2 }
 0x92d   : > { %v5460_v63 = vmax.f32 %v2056_v56, %v2064_v57 }
 0x92f   : > { %v2079_v49 = vsub.f32 %v2078_v0, %v5460_v63  ;;  %v2085_v41 = vcombine.high %v5460_v63, %v5460_v63 }
 0x931   : > { %v2080_v29 = vmul.f32 1.442695, %v2079_v49  ;;  %v2092_v51 = vrot.slane %v2085_v41, %v5117_v46 }
 0x933   : > { %4446 = vpow2.f32 %v2080_v29  ;;  %v2093_v30 = vcombine.high %v2092_v51, %v2092_v51 }
 0x934   : > { %4448 = vtanh.f32 %v2028_v24 }
 0x935   : > { %v2095_v20 = vsub.f32 %v2082_v58, %v2093_v30 }
 0x937   : > { %v2096_v60 = vmul.f32 1.442695, %v2095_v20 }
 0x939   : > { %4450 = vpow2.f32 %v2096_v60 }
 0x93d   : > { %v4447_v50 = vpop.eup %4446 }
 0x93e   : > { %v2099_v18 = vrot.slane %v4447_v50, 6  ;;  %v2101_v17 = vrot.slane %v4447_v50, 4  ;;  %v4449_v53 = vpop.eup %4448 }
 0x93f   : > { %v2041_v26 = vmul.f32 %v4449_v53, %v2039_v38 }
 0x940   : > { %v2103_v25 = vsel %vm476_vm0, %v2099_v18, %v2101_v17 }
 0x941   : > { %v2105_v59 = vrot.slane %v2103_v25, 6 }
 0x943   : > { %v4451_v42 = vpop.eup %4450  ;;  %v2107_v34 = vmul.f32 %v2105_v59, %v5417_v33 }
 0x944   : > { %v2108_v21 = vmul.f32 %v4451_v42, %v2041_v26  ;;  %v2110_v37 = vcombine.low %v4451_v42, %v4451_v42 }
 0x946   : > { %v2117_v62 = vrot.slane %v2110_v37, %v5117_v46 }
 0x948   : > { %v2119_v61 = vsel %vm476_vm0, %v2108_v21, %v2117_v62 }
 0x949   : > { %v2121_v52 = vrot.slane %v2119_v61, 6 }
 0x94b   : > { %v5471_v6 = vadd.f32 %v2121_v52, %v2107_v34 }
 0x94d   : > { %v2125_v7 = vrot.slane %v5471_v6, 2 }
 0x94f   : > { %4452 = vrcp.f32 %v2125_v7 }
 0x959   : > { %v4453_v10 = vpop.eup %4452 }
 0x95a   : > { %v2128_v12 = vmul.f32 %v4453_v10, %v5471_v6 }
 0x95c   : > { %4454 = vtanh.f32 %v2128_v12 }
 0x966   : > { %v4455_v14 = vpop.eup %4454 }
 0x967   : > { %v2133_v15 = vrot.slane %v4455_v14, 2 }
 0x969   : > { %2200 = vmatmul.mubr.f32.vlgmr.msra.gmra.mrb[14].mxu0 %v2133_v15  ;;  %2271 = vmatmul.mubr.f32.vlgmr.msra.gmra.mrb[14].mxu1 %v2133_v15 }
 0xa3c   : > { %v2201_v16 = vpop.f32.mrb[14].mxu0  ;;  %v2272_v19 = vpop.f32.mrb[14].mxu1 }
 0xa3d   : > { %v2203_v22 = vpop.f32.mrb[15].mxu0  ;;  %v2274_v23 = vpop.f32.mrb[15].mxu1 }
 0xa3e   : > { %v2281_v33 = vcombine.low %v2201_v16, %v2203_v22  ;;  %v2282_v24 = vcombine.low %v2272_v19, %v2274_v23 }
 0xa40   : > { %v2289_v27 = vrot.slane %v2281_v33, %v5117_v46  ;;  %v2296_v28 = vrot.slane %v2282_v24, %v5117_v46 }
 0xa42   : > { %v2297_v32 = vcombine.low %v2289_v27, %v2296_v28 }
 0xa44   : > { %v2299_v35 = vadd.f32 %v3551_v31, %v2297_v32 }
 0xa46   : > { %v2301_v36 = vrot.slane %v2299_v35, 6  ;;  %v2334_v0 = vrot.slane %v2299_v35, %v5117_v46  ;;  %v2353_v17 = vrot.slane %v2299_v35, 4  ;;  %v2310_v59 = vrot.slane %v2299_v35, 2 }
 0xa48   : > { %v3552_v39 = vmul.f32 -1.442695, %v2301_v36  ;;  %v2335_v51 = vcombine.low %v2334_v0, %v2334_v0 }
 0xa4a   : > { %4456 = vpow2.f32 %v3552_v39 }
 0xa54   : > { %v4457_v40 = vpop.eup %4456 }
 0xa55   : > { %v2306_v43 = vadd.f32 1.0, %v4457_v40 }
 0xa57   : > { %4458 = vrcp.f32 %v2306_v43 }
 0xa61   : > { %v4459_v44 = vpop.eup %4458 }
 0xa62   : > { %v2313_v45 = vsub.f32 0.0, %v4459_v44  ;;  %v2339_v48 = vcombine.low %v4459_v44, %v4459_v44 }
 0xa64   : > { %v2314_v47 = vmul.f32 1.442695, %v2313_v45  ;;  %v2346_v56 = vrot.slane %v2339_v48, %v5117_v46 }
 0xa66   : > { %4460 = vpow2.f32 %v2314_v47  ;;  %v2347_v41 = vcombine.low %v2346_v56, %v2346_v56 }
 0xa68   : > { %v2349_v30 = vsub.f32 %v5460_v63, %v2347_v41 }
 0xa70   : > { %v4461_v54 = vpop.eup %4460 }
 0xa71   : > { %v2317_v55 = vcombine.low %v4461_v54, %v4461_v54 }
 0xa73   : > { %v2324_v57 = vrot.slane %v2317_v55, %v5117_v46 }
 0xa75   : > { %v2325_v49 = vcombine.low %v2324_v57, %v2324_v57 }
 0xa77   : > { %v2327_v29 = vmul.f32 %v2325_v49, %v5460_v63 }
 0xa79   : > { %v2337_v58 = vmax.f32 %v2327_v29, %v2335_v51 }
 0xa7b   : > { %v2350_v20 = vsub.f32 %v2349_v30, %v2337_v58  ;;  %v2356_v60 = vcombine.high %v2337_v58, %v2337_v58 }
 0xa7d   : > { %v2351_v50 = vmul.f32 1.442695, %v2350_v20  ;;  %v2363_v18 = vrot.slane %v2356_v60, %v5117_v46 }
 0xa7f   : > { %4462 = vpow2.f32 %v2351_v50  ;;  %v2364_v53 = vcombine.high %v2363_v18, %v2363_v18 }
 0xa80   : > { %4464 = vtanh.f32 %v2299_v35 }
 0xa81   : > { %v2366_v38 = vsub.f32 %v2353_v17, %v2364_v53 }
 0xa83   : > { %v2367_v26 = vmul.f32 1.442695, %v2366_v38 }
 0xa85   : > { %4466 = vpow2.f32 %v2367_v26 }
 0xa89   : > { %v4463_v25 = vpop.eup %4462 }
 0xa8a   : > { %v2370_v42 = vrot.slane %v4463_v25, 6  ;;  %v2372_v21 = vrot.slane %v4463_v25, 4  ;;  %v4465_v37 = vpop.eup %4464 }
 0xa8b   : > { %v2312_v62 = vmul.f32 %v4465_v37, %v2310_v59 }
 0xa8c   : > { %v2374_v63 = vsel %vm476_vm0, %v2370_v42, %v2372_v21 }
 0xa8d   : > { %v2376_v7 = vrot.slane %v2374_v63, 6 }
 0xa8f   : > { %v4467_v61 = vpop.eup %4466  ;;  %v2378_v14 = vmul.f32 %v2376_v7, %v5471_v6 }
 0xa90   : > { %v2379_v34 = vmul.f32 %v4467_v61, %v2312_v62  ;;  %v2381_v52 = vcombine.low %v4467_v61, %v4467_v61 }
 0xa92   : > { %v2388_v10 = vrot.slane %v2381_v52, %v5117_v46 }
 0xa94   : > { %v2390_v12 = vsel %vm476_vm0, %v2379_v34, %v2388_v10 }
 0xa95   : > { %v2392_v15 = vrot.slane %v2390_v12, 6 }
 0xa97   : > { %v2394_v16 = vadd.f32 %v2392_v15, %v2378_v14 }
 0xa99   : > { %v2396_v19 = vrot.slane %v2394_v16, 2 }
 0xa9b   : > { %4468 = vrcp.f32 %v2396_v19 }
 0xaa5   : > { %v4469_v22 = vpop.eup %4468 }
 0xaa6   : > { %v2399_v23 = vmul.f32 %v4469_v22, %v2394_v16 }
 0xaa8   : > { %4470 = vtanh.f32 %v2399_v23 }
 0xab2   : > { %v4471_v33 = vpop.eup %4470 }
 0xab3   : > { %v2402_v24 = vrot.slane %v4471_v33, 2 }
 0xab5   : > { %v2404_v27 = vsel %vm476_vm0, %v2402_v24, %v2394_v16 }
 0xab6   : > { %v2406_v28 = vsel %vm2405_vm1, %v2404_v27, %v2337_v58 }
 0xab7   : > { %2407 = vst [vmem:[%s5855_s3] sm:$0xff] %v2406_v28 }
 0xab8 PF: > { %p3553_p6 = scmp.ne.s32.totalorder %s4574_s13, 1 }
 0xab9   : > { %v5969_v46 = vld [vmem:[#allocation2_spill] sm:$0xff] (!%p3553_p6)  ;;  %v5499_v31 = vpack.c.bf16 (!%p3553_p6), %v4629_v8, %v4609_v4  ;;  %v5503_v32 = vpack.c.bf16 (!%p3553_p6), %v4614_v5, %v4594_v1  ;;  %v5970_v35 = vld [vmem:[#allocation3_spill] sm:$0xff] (!%p3553_p6)  ;;  %v5971_v39 = vld [vmem:[#allocation4_spill] sm:$0xff] (!%p3553_p6)  ;;  %v5523_v1 = vpack.c.bf16 (!%p3553_p6), %v4654_v13, %v4634_v9  ;;  %v4546_v56 = vmov (!%p3553_p6), 0.0  }
 0xaba   : > { %2411 = sbr.rel (%p3553_p6) target bundleno = 4111 (0x100f), region = 44  ;;  %v5495_v6 = vpack.c.bf16 (!%p3553_p6), %v5969_v46, %v4599_v2  ;;  %v5507_v36 = vpack.c.bf16 (!%p3553_p6), %v5970_v35, %v4604_v3  ;;  %v5972_v40 = vld [vmem:[#allocation6_spill] sm:$0xff] (!%p3553_p6)  ;;  %v5973_v44 = vld [vmem:[#allocation5_spill] sm:$0xff] (!%p3553_p6)  ;;  %v5974_v45 = vld [vmem:[#allocation8_spill] sm:$0xff] (!%p3553_p6)  ;;  %2478 = vmatprep.mubr.f32.mxu0 (!%p3553_p6), %v4546_v56  ;;  %2549 = vmatprep.mubr.f32.mxu1 (!%p3553_p6), %v4546_v56  ;;  %vm2653_vm2 = vcmask (!%p3553_p6), 1041408   ;;  %vm3498_vm3 = vcmask (!%p3553_p6), 1045504  }
 0xabb   : > { %v5511_v43 = vpack.c.bf16 (!%p3553_p6), %v5972_v40, %v5971_v39  ;;  %v5515_v2 = vpack.c.bf16 (!%p3553_p6), %v5974_v45, %v5973_v44  ;;  %4109 = vmatprep.subr.bf16.mxu1 (!%p3553_p6), %v5499_v31  ;;  %v5975_v3 = vld [vmem:[#allocation7_spill] sm:$0xff] (!%p3553_p6)  ;;  %v5976_v5 = vld [vmem:[#allocation10_spill] sm:$0xff] (!%p3553_p6)  ;;  %v5978_v48 = vld [vmem:[#allocation12_spill] sm:$0xff] (!%p3553_p6) }
 0xabc   : > { %4077 = vmatprep.subr.bf16.mxu0 (!%p3553_p6), %v5495_v6  ;;  %4111 = vmatpush1.bf16.msra.mxu1 (!%p3553_p6), %v5507_v36  ;;  %v5527_v4 = vpack.c.bf16 (!%p3553_p6), %v5975_v3, %v4644_v11  ;;  %v5977_v8 = vld [vmem:[#allocation14_spill] sm:$0xff] (!%p3553_p6)  ;;  %v5979_v54 = vld [vmem:[#allocation16_spill] sm:$0xff] (!%p3553_p6)  ;;  %v5980_v9 = vld [vmem:[#allocation9_spill] sm:$0xff] (!%p3553_p6) }
 0xabd   : > { %4079 = vmatpush1.bf16.msra.mxu0 (!%p3553_p6), %v5503_v32  ;;  %4113 = vmatprep.subr.bf16.mxu1 (!%p3553_p6), %v5515_v2  ;;  %v5533_v47 = vpack.c.bf16 (!%p3553_p6), %v5977_v8, %v5976_v5  ;;  %v5537_v55 = vpack.c.bf16 (!%p3553_p6), %v5979_v54, %v5978_v48  ;;  %v5981_v11 = vld [vmem:[#allocation13_spill] sm:$0xff] (!%p3553_p6)  ;;  %v5982_v57 = vld [vmem:[#allocation11_spill] sm:$0xff] (!%p3553_p6)  ;;  %v5984_v41 = vld [vmem:[#allocation18_spill] sm:$0xff] (!%p3553_p6) }
 0xabe   : > { %4081 = vmatprep.subr.bf16.mxu0 (!%p3553_p6), %v5511_v43  ;;  %v5545_v13 = vpack.c.bf16 (!%p3553_p6), %v5981_v11, %v5980_v9  ;;  %v5983_v0 = vld [vmem:[#allocation15_spill] sm:$0xff] (!%p3553_p6)  ;;  %v5985_v29 = vld [vmem:[#allocation22_spill] sm:$0xff] (!%p3553_p6)  ;;  %v5986_v58 = vld [vmem:[#allocation20_spill] sm:$0xff] (!%p3553_p6) }
 0xabf   : > { %v5549_v49 = vpack.c.bf16 (!%p3553_p6), %v5983_v0, %v5982_v57  ;;  %v5555_v51 = vpack.c.bf16 (!%p3553_p6), %v5985_v29, %v5984_v41  ;;  %v5987_v30 = vld [vmem:[#allocation24_spill] sm:$0xff] (!%p3553_p6)  ;;  %v5988_v60 = vld [vmem:[#allocation17_spill] sm:$0xff] (!%p3553_p6)  ;;  %v5990_v17 = vld [vmem:[#allocation19_spill] sm:$0xff] (!%p3553_p6) }
 0xac0   : > { %4115 = vmatpush1.bf16.msra.mxu1 (!%p3553_p6), %v5527_v4  ;;  %v5559_v20 = vpack.c.bf16 (!%p3553_p6), %v5987_v30, %v5986_v58  ;;  %v5989_v50 = vld [vmem:[#allocation21_spill] sm:$0xff] (!%p3553_p6)  ;;  %v5991_v53 = vld [vmem:[#allocation23_spill] sm:$0xff] (!%p3553_p6)  ;;  %v5992_v26 = vld [vmem:[#allocation26_spill] sm:$0xff] (!%p3553_p6) }
 0xac1   : > { %4083 = vmatpush1.bf16.msra.mxu0 %v5523_v1  ;;  %4117 = vmatprep.subr.bf16.mxu1 %v5537_v55  ;;  %v5565_v18 = vpack.c.bf16 %v5989_v50, %v5988_v60  ;;  %v5569_v38 = vpack.c.bf16 %v5991_v53, %v5990_v17  ;;  %v5993_v25 = vld [vmem:[#allocation30_spill] sm:$0xff]  ;;  %v5994_v21 = vld [vmem:[#allocation28_spill] sm:$0xff]  ;;  %v5996_v62 = vld [vmem:[#allocation25_spill] sm:$0xff] }
 0xac2   : > { %4085 = vmatprep.subr.bf16.mxu0 %v5533_v47  ;;  %v5575_v42 = vpack.c.bf16 %v5993_v25, %v5992_v26  ;;  %v5995_v37 = vld [vmem:[#allocation32_spill] sm:$0xff]  ;;  %v5997_v63 = vld [vmem:[#allocation29_spill] sm:$0xff]  ;;  %v5998_v34 = vld [vmem:[#allocation27_spill] sm:$0xff] }
 0xac3   : > { %v5579_v59 = vpack.c.bf16 %v5995_v37, %v5994_v21  ;;  %v5585_v61 = vpack.c.bf16 %v5997_v63, %v5996_v62  ;;  %v5999_v52 = vld [vmem:[#allocation31_spill] sm:$0xff]  ;;  %v6000_v10 = vld [vmem:[#allocation34_spill] sm:$0xff]  ;;  %v6002_v15 = vld [vmem:[#allocation36_spill] sm:$0xff]  ;;  %v4547_v21 = vmov 1983009808   ;;  %v2565_v62 = vlaneseq }
 0xac4   : > { %4119 = vmatpush1.bf16.msra.mxu1 %v5549_v49  ;;  %v5589_v7 = vpack.c.bf16 %v5999_v52, %v5998_v34  ;;  %v6001_v12 = vld [vmem:[#allocation38_spill] sm:$0xff]  ;;  %v6003_v16 = vld [vmem:[#allocation40_spill] sm:$0xff]  ;;  %v6004_v22 = vld [vmem:[#allocation33_spill] sm:$0xff]  ;;  %v2563_v37 = vunpack.c.l.s4 %v4547_v21 }
 0xac5   : > { %4087 = vmatpush1.bf16.msra.mxu0 %v5545_v13  ;;  %4121 = vmatprep.subr.bf16.mxu1 %v5559_v20  ;;  %v5595_v14 = vpack.c.bf16 %v6001_v12, %v6000_v10  ;;  %v5599_v19 = vpack.c.bf16 %v6003_v16, %v6002_v15  ;;  %v6005_v23 = vld [vmem:[#allocation37_spill] sm:$0xff]  ;;  %v6006_v24 = vld [vmem:[#allocation35_spill] sm:$0xff]  ;;  %v6008_v46 = vld [vmem:[#allocation42_spill] sm:$0xff]  ;;  %v2566_v34 = vshrl.u32 %v2565_v62, 7 }
 0xac6   : > { %4089 = vmatprep.subr.bf16.mxu0 %v5555_v51  ;;  %v5605_v33 = vpack.c.bf16 %v6005_v23, %v6004_v22  ;;  %v6007_v27 = vld [vmem:[#allocation39_spill] sm:$0xff]  ;;  %v6009_v35 = vld [vmem:[#allocation46_spill] sm:$0xff]  ;;  %v6010_v40 = vld [vmem:[#allocation44_spill] sm:$0xff]  ;;  %v2564_v63 = vunpack.c.0.s8 %v2563_v37 }
 0xac7   : > { %v5609_v28 = vpack.c.bf16 %v6007_v27, %v6006_v24  ;;  %v5615_v39 = vpack.c.bf16 %v6009_v35, %v6008_v46  ;;  %v6011_v44 = vld [vmem:[#allocation48_spill] sm:$0xff]  ;;  %v6012_v3 = vld [vmem:[#allocation41_spill] sm:$0xff]  ;;  %v6014_v48 = vld [vmem:[#allocation43_spill] sm:$0xff] }
 0xac8   : > { %4123 = vmatpush1.bf16.msra.mxu1 %v5569_v38  ;;  %v5619_v45 = vpack.c.bf16 %v6011_v44, %v6010_v40  ;;  %v6013_v5 = vld [vmem:[#allocation45_spill] sm:$0xff]  ;;  %v6015_v54 = vld [vmem:[#allocation47_spill] sm:$0xff]  ;;  %v6016_v11 = vld [vmem:[#allocation50_spill] sm:$0xff]  ;;  %v5698_v12 = vsub.s32 %v2564_v63, %v2566_v34 }
 0xac9   : > { %4091 = vmatpush1.bf16.msra.mxu0 %v5565_v18  ;;  %4125 = vmatprep.subr.bf16.mxu1 %v5579_v59  ;;  %v5625_v8 = vpack.c.bf16 %v6013_v5, %v6012_v3  ;;  %v5629_v9 = vpack.c.bf16 %v6015_v54, %v6014_v48  ;;  %v6017_v57 = vld [vmem:[#allocation54_spill] sm:$0xff]  ;;  %v6018_v41 = vld [vmem:[#allocation52_spill] sm:$0xff]  ;;  %v6020_v30 = vld [vmem:[#allocation49_spill] sm:$0xff] }
 0xaca   : > { %4093 = vmatprep.subr.bf16.mxu0 %v5575_v42  ;;  %v5635_v0 = vpack.c.bf16 %v6017_v57, %v6016_v11  ;;  %v6019_v29 = vld [vmem:[#allocation56_spill] sm:$0xff]  ;;  %v6021_v60 = vld [vmem:[#allocation53_spill] sm:$0xff]  ;;  %v6022_v17 = vld [vmem:[#allocation51_spill] sm:$0xff] }
 0xacb   : > { %v5639_v58 = vpack.c.bf16 %v6019_v29, %v6018_v41  ;;  %v5645_v50 = vpack.c.bf16 %v6021_v60, %v6020_v30  ;;  %v6023_v53 = vld [vmem:[#allocation55_spill] sm:$0xff]  ;;  %v5658_v25 = vld [vmem:[%s5855_s3] sm:$0xff] }
 0xacc   : > { %4127 = vmatpush1.bf16.msra.mxu1 %v5589_v7  ;;  %v5649_v26 = vpack.c.bf16 %v6023_v53, %v6022_v17  ;;  %v2413_v46 = vld [vmem:[%s4582_s18] sm:$0xff] }
 0xacd   : > { %4095 = vmatpush1.bf16.msra.mxu0 %v5585_v61  ;;  %4129 = vmatprep.subr.bf16.mxu1 %v5599_v19 }
 0xace   : > { %4097 = vmatprep.subr.bf16.mxu0 %v5595_v14 }
 0xad0   : > { %4131 = vmatpush1.bf16.msra.mxu1 %v5609_v28 }
 0xad1   : > { %4099 = vmatpush1.bf16.msra.mxu0 %v5605_v33  ;;  %4133 = vmatprep.subr.bf16.mxu1 %v5619_v45 }
 0xad2   : > { %4101 = vmatprep.subr.bf16.mxu0 %v5615_v39 }
 0xad4   : > { %4135 = vmatpush1.bf16.msra.mxu1 %v5629_v9 }
 0xad5   : > { %4103 = vmatpush1.bf16.msra.mxu0 %v5625_v8  ;;  %4137 = vmatprep.subr.bf16.mxu1 %v5639_v58 }
 0xad6   : > { %4105 = vmatprep.subr.bf16.mxu0 %v5635_v0 }
 0xad8   : > { %4139 = vmatpush1.bf16.msra.mxu1 %v5649_v26 }
 0xad9   : > { %4107 = vmatpush1.bf16.msra.mxu0 %v5645_v50  ;;  %4173 = vmatprep.subr.bf16.mxu1 %v5499_v31 }
 0xada   : > { %4141 = vmatprep.subr.bf16.mxu0 %v5495_v6 }
 0xadb   : > { %2550 = vmatmul.mubr.f32.vlgmr.msra.gmra.mrb[0].mxu1 %v5658_v25 }
 0xadc   : > { %2479 = vmatmul.mubr.f32.vlgmr.msra.gmra.mrb[0].mxu0 %v5658_v25  ;;  %4175 = vmatpush1.bf16.msra.mxu1 %v5507_v36 }
 0xadd   : > { %4143 = vmatpush1.bf16.msra.mxu0 %v5503_v32  ;;  %4177 = vmatprep.subr.bf16.mxu1 %v5515_v2 }
 0xade   : > { %4145 = vmatprep.subr.bf16.mxu0 %v5511_v43  ;;  %2750 = vmatprep.mubr.f32.mxu0 %v4546_v56 }
 0xadf   : > { %2821 = vmatprep.mubr.f32.mxu1 %v4546_v56 }
 0xae0   : > { %4179 = vmatpush1.bf16.msra.mxu1 %v5527_v4 }
 0xae1   : > { %4147 = vmatpush1.bf16.msra.mxu0 %v5523_v1  ;;  %4181 = vmatprep.subr.bf16.mxu1 %v5537_v55 }
 0xae2   : > { %4149 = vmatprep.subr.bf16.mxu0 %v5533_v47 }
 0xae4   : > { %4183 = vmatpush1.bf16.msra.mxu1 %v5549_v49 }
 0xae5   : > { %4151 = vmatpush1.bf16.msra.mxu0 %v5545_v13  ;;  %4185 = vmatprep.subr.bf16.mxu1 %v5559_v20 }
 0xae6   : > { %4153 = vmatprep.subr.bf16.mxu0 %v5555_v51 }
 0xae8   : > { %4187 = vmatpush1.bf16.msra.mxu1 %v5569_v38 }
 0xae9   : > { %4155 = vmatpush1.bf16.msra.mxu0 %v5565_v18  ;;  %4189 = vmatprep.subr.bf16.mxu1 %v5579_v59 }
 0xaea   : > { %4157 = vmatprep.subr.bf16.mxu0 %v5575_v42 }
 0xaec   : > { %4191 = vmatpush1.bf16.msra.mxu1 %v5589_v7 }
 0xaed   : > { %4159 = vmatpush1.bf16.msra.mxu0 %v5585_v61  ;;  %4193 = vmatprep.subr.bf16.mxu1 %v5599_v19 }
 0xaee   : > { %4161 = vmatprep.subr.bf16.mxu0 %v5595_v14 }
 0xaf0   : > { %4195 = vmatpush1.bf16.msra.mxu1 %v5609_v28 }
 0xaf1   : > { %4163 = vmatpush1.bf16.msra.mxu0 %v5605_v33  ;;  %4197 = vmatprep.subr.bf16.mxu1 %v5619_v45 }
 0xaf2   : > { %4165 = vmatprep.subr.bf16.mxu0 %v5615_v39 }
 0xaf4   : > { %4199 = vmatpush1.bf16.msra.mxu1 %v5629_v9 }
 0xaf5   : > { %4167 = vmatpush1.bf16.msra.mxu0 %v5625_v8  ;;  %4201 = vmatprep.subr.bf16.mxu1 %v5639_v58 }
 0xaf6   : > { %4169 = vmatprep.subr.bf16.mxu0 %v5635_v0 }
 0xaf8   : > { %4203 = vmatpush1.bf16.msra.mxu1 %v5649_v26 }
 0xaf9   : > { %4171 = vmatpush1.bf16.msra.mxu0 %v5645_v50  ;;  %4237 = vmatprep.subr.bf16.mxu1 %v5499_v31 }
 0xafa   : > { %4205 = vmatprep.subr.bf16.mxu0 %v5495_v6 }
 0xbae   : > { %v2551_v10 = vpop.f32.mrb[0].mxu1 }
 0xbaf   : > { %v2480_v52 = vpop.f32.mrb[0].mxu0  ;;  %v2553_v16 = vpop.f32.mrb[1].mxu1 }
 0xbb0   : > { %v2482_v15 = vpop.f32.mrb[1].mxu0  ;;  %v2561_v23 = vcombine.low %v2551_v10, %v2553_v16 }
 0xbb1   : > { %v2560_v22 = vcombine.low %v2480_v52, %v2482_v15 }
 0xbb2   : > { %v2575_v27 = vrot.slane %v2561_v23, %v5698_v12 }
 0xbb3   : > { %v2568_v24 = vrot.slane %v2560_v22, %v5698_v12 }
 0xbb5   : > { %v2576_v35 = vcombine.low %v2568_v24, %v2575_v27 }
 0xbb7   : > { %v2578_v40 = vadd.f32 %v2576_v35, %v2413_v46 }
 0xbb9   : > { %v2580_v44 = vrot.slane %v2578_v40, 6  ;;  %v2613_v53 = vrot.slane %v2578_v40, %v5698_v12  ;;  %v2632_v23 = vrot.slane %v2578_v40, 4 }
 0xbbb   : > { %v3554_v3 = vmul.f32 -1.442695, %v2580_v44  ;;  %v2614_v63 = vcombine.low %v2613_v53, %v2613_v53 }
 0xbbd   : > { %4472 = vpow2.f32 %v3554_v3 }
 0xbc7   : > { %v4473_v5 = vpop.eup %4472 }
 0xbc8   : > { %v2585_v48 = vadd.f32 1.0, %v4473_v5 }
 0xbca   : > { %4474 = vrcp.f32 %v2585_v48  ;;  %v2589_v48 = vrot.slane %v2578_v40, 2 }
 0xbd4   : > { %v4475_v54 = vpop.eup %4474 }
 0xbd5   : > { %v2592_v11 = vsub.f32 0.0, %v4475_v54  ;;  %v2618_v41 = vcombine.low %v4475_v54, %v4475_v54 }
 0xbd7   : > { %v2593_v57 = vmul.f32 1.442695, %v2592_v11  ;;  %v2625_v60 = vrot.slane %v2618_v41, %v5698_v12 }
 0xbd9   : > { %4476 = vpow2.f32 %v2593_v57  ;;  %v2626_v37 = vcombine.low %v2625_v60, %v2625_v60 }
 0xbdb   : > { %v2628_v52 = vsub.f32 %v5658_v25, %v2626_v37 }
 0xbe3   : > { %v4477_v29 = vpop.eup %4476 }
 0xbe4   : > { %v2596_v30 = vcombine.low %v4477_v29, %v4477_v29 }
 0xbe6   : > { %v2603_v17 = vrot.slane %v2596_v30, %v5698_v12 }
 0xbe8   : > { %v2604_v21 = vcombine.low %v2603_v17, %v2603_v17 }
 0xbea   : > { %v2606_v62 = vmul.f32 %v2604_v21, %v5658_v25 }
 0xbec   : > { %v5707_v34 = vmax.f32 %v2606_v62, %v2614_v63 }
 0xbee   : > { %v2629_v10 = vsub.f32 %v2628_v52, %v5707_v34  ;;  %v2635_v15 = vcombine.high %v5707_v34, %v5707_v34 }
 0xbf0   : > { %v2630_v16 = vmul.f32 1.442695, %v2629_v10  ;;  %v2642_v22 = vrot.slane %v2635_v15, %v5698_v12 }
 0xbf2   : > { %4478 = vpow2.f32 %v2630_v16  ;;  %v2643_v24 = vcombine.high %v2642_v22, %v2642_v22 }
 0xbf3   : > { %4480 = vtanh.f32 %v2578_v40 }
 0xbf4   : > { %v2645_v27 = vsub.f32 %v2632_v23, %v2643_v24 }
 0xbf6   : > { %v2646_v46 = vmul.f32 1.442695, %v2645_v27 }
 0xbf8   : > { %4482 = vpow2.f32 %v2646_v46 }
 0xbfc   : > { %v4479_v35 = vpop.eup %4478 }
 0xbfd   : > { %v2649_v44 = vrot.slane %v4479_v35, 6  ;;  %v2651_v3 = vrot.slane %v4479_v35, 4  ;;  %v4481_v5 = vpop.eup %4480  ;;  %v3555_v35 = vld [vmem:[%s4582_s18 + $0x8] sm:$0xff] }
 0xbfe   : > { %v2591_v54 = vmul.f32 %v4481_v5, %v2589_v48 }
 0xbff   : > { %v2654_v11 = vsel %vm2653_vm2, %v2649_v44, %v2651_v3 }
 0xc00   : > { %v2656_v30 = vrot.slane %v2654_v11, 6 }
 0xc02   : > { %v4483_v57 = vpop.eup %4482  ;;  %v2658_v53 = vmul.f32 %v2656_v30, %v5658_v25 }
 0xc03   : > { %v2659_v41 = vmul.f32 %v4483_v57, %v2591_v54  ;;  %v2661_v29 = vcombine.low %v4483_v57, %v4483_v57 }
 0xc05   : > { %v2668_v60 = vrot.slane %v2661_v29, %v5698_v12 }
 0xc07   : > { %v2670_v17 = vsel %vm2653_vm2, %v2659_v41, %v2668_v60 }
 0xc08   : > { %v2672_v21 = vrot.slane %v2670_v17, 6 }
 0xc0a   : > { %v5718_v37 = vadd.f32 %v2672_v21, %v2658_v53 }
 0xc0c   : > { %v2676_v62 = vrot.slane %v5718_v37, 2 }
 0xc0e   : > { %4484 = vrcp.f32 %v2676_v62 }
 0xc18   : > { %v4485_v40 = vpop.eup %4484 }
 0xc19   : > { %v2679_v63 = vmul.f32 %v4485_v40, %v5718_v37 }
 0xc1b   : > { %4486 = vtanh.f32 %v2679_v63 }
 0xc25   : > { %v4487_v52 = vpop.eup %4486 }
 0xc26   : > { %v2684_v10 = vrot.slane %v4487_v52, 2 }
 0xc28   : > { %2751 = vmatmul.mubr.f32.vlgmr.msra.gmra.mrb[2].mxu0 %v2684_v10  ;;  %2822 = vmatmul.mubr.f32.vlgmr.msra.gmra.mrb[2].mxu1 %v2684_v10 }
 0xc29   : > { %4207 = vmatpush1.bf16.msra.mxu0 %v5503_v32  ;;  %4239 = vmatpush1.bf16.msra.mxu1 %v5507_v36 }
 0xc2a   : > { %4209 = vmatprep.subr.bf16.mxu0 %v5511_v43  ;;  %4241 = vmatprep.subr.bf16.mxu1 %v5515_v2 }
 0xc2b   : > { %3021 = vmatprep.mubr.f32.mxu0 %v4546_v56  ;;  %3092 = vmatprep.mubr.f32.mxu1 %v4546_v56 }
 0xc2d   : > { %4211 = vmatpush1.bf16.msra.mxu0 %v5523_v1  ;;  %4243 = vmatpush1.bf16.msra.mxu1 %v5527_v4 }
 0xc2e   : > { %4213 = vmatprep.subr.bf16.mxu0 %v5533_v47  ;;  %4245 = vmatprep.subr.bf16.mxu1 %v5537_v55 }
 0xc31   : > { %4215 = vmatpush1.bf16.msra.mxu0 %v5545_v13  ;;  %4247 = vmatpush1.bf16.msra.mxu1 %v5549_v49 }
 0xc32   : > { %4217 = vmatprep.subr.bf16.mxu0 %v5555_v51  ;;  %4249 = vmatprep.subr.bf16.mxu1 %v5559_v20 }
 0xc35   : > { %4219 = vmatpush1.bf16.msra.mxu0 %v5565_v18  ;;  %4251 = vmatpush1.bf16.msra.mxu1 %v5569_v38 }
 0xc36   : > { %4221 = vmatprep.subr.bf16.mxu0 %v5575_v42  ;;  %4253 = vmatprep.subr.bf16.mxu1 %v5579_v59 }
 0xc39   : > { %4223 = vmatpush1.bf16.msra.mxu0 %v5585_v61  ;;  %4255 = vmatpush1.bf16.msra.mxu1 %v5589_v7 }
 0xc3a   : > { %4225 = vmatprep.subr.bf16.mxu0 %v5595_v14  ;;  %4257 = vmatprep.subr.bf16.mxu1 %v5599_v19 }
 0xc3d   : > { %4227 = vmatpush1.bf16.msra.mxu0 %v5605_v33  ;;  %4259 = vmatpush1.bf16.msra.mxu1 %v5609_v28 }
 0xc3e   : > { %4229 = vmatprep.subr.bf16.mxu0 %v5615_v39  ;;  %4261 = vmatprep.subr.bf16.mxu1 %v5619_v45 }
 0xc41   : > { %4231 = vmatpush1.bf16.msra.mxu0 %v5625_v8  ;;  %4263 = vmatpush1.bf16.msra.mxu1 %v5629_v9 }
 0xc42   : > { %4233 = vmatprep.subr.bf16.mxu0 %v5635_v0  ;;  %4265 = vmatprep.subr.bf16.mxu1 %v5639_v58 }
 0xc45   : > { %4235 = vmatpush1.bf16.msra.mxu0 %v5645_v50  ;;  %4267 = vmatpush1.bf16.msra.mxu1 %v5649_v26 }
 0xc46   : > { %4269 = vmatprep.subr.bf16.mxu0 %v5495_v6  ;;  %4301 = vmatprep.subr.bf16.mxu1 %v5499_v31 }
 0xcfb   : > { %v2752_v25 = vpop.f32.mrb[2].mxu0  ;;  %v2823_v15 = vpop.f32.mrb[2].mxu1 }
 0xcfc   : > { %v2754_v16 = vpop.f32.mrb[3].mxu0  ;;  %v2825_v22 = vpop.f32.mrb[3].mxu1 }
 0xcfd   : > { %v2832_v23 = vcombine.low %v2752_v25, %v2754_v16  ;;  %v2833_v24 = vcombine.low %v2823_v15, %v2825_v22 }
 0xcff   : > { %v2840_v27 = vrot.slane %v2832_v23, %v5698_v12  ;;  %v2847_v46 = vrot.slane %v2833_v24, %v5698_v12 }
 0xd01   : > { %v2848_v44 = vcombine.low %v2840_v27, %v2847_v46 }
 0xd03   : > { %v2850_v3 = vadd.f32 %v3555_v35, %v2848_v44 }
 0xd05   : > { %v2852_v5 = vrot.slane %v2850_v3, 6  ;;  %v2885_v53 = vrot.slane %v2850_v3, %v5698_v12  ;;  %v2904_v23 = vrot.slane %v2850_v3, 4 }
 0xd07   : > { %v3556_v48 = vmul.f32 -1.442695, %v2852_v5  ;;  %v2886_v63 = vcombine.low %v2885_v53, %v2885_v53 }
 0xd09   : > { %4488 = vpow2.f32 %v3556_v48 }
 0xd13   : > { %v4489_v54 = vpop.eup %4488 }
 0xd14   : > { %v2857_v6 = vadd.f32 1.0, %v4489_v54 }
 0xd16   : > { %4490 = vrcp.f32 %v2857_v6 }
 0xd20   : > { %v4491_v31 = vpop.eup %4490 }
 0xd21   : > { %v2864_v11 = vsub.f32 0.0, %v4491_v31  ;;  %v2890_v41 = vcombine.low %v4491_v31, %v4491_v31 }
 0xd23   : > { %v2865_v57 = vmul.f32 1.442695, %v2864_v11  ;;  %v2897_v60 = vrot.slane %v2890_v41, %v5698_v12 }
 0xd25   : > { %4492 = vpow2.f32 %v2865_v57  ;;  %v2898_v62 = vcombine.low %v2897_v60, %v2897_v60 }
 0xd27   : > { %v2900_v10 = vsub.f32 %v5707_v34, %v2898_v62 }
 0xd2f   : > { %v4493_v29 = vpop.eup %4492 }
 0xd30   : > { %v2868_v30 = vcombine.low %v4493_v29, %v4493_v29 }
 0xd32   : > { %v2875_v17 = vrot.slane %v2868_v30, %v5698_v12 }
 0xd34   : > { %v2876_v21 = vcombine.low %v2875_v17, %v2875_v17 }
 0xd36   : > { %v2878_v40 = vmul.f32 %v2876_v21, %v5707_v34  ;;  %v2861_v34 = vrot.slane %v2850_v3, 2 }
 0xd38   : > { %v5763_v52 = vmax.f32 %v2878_v40, %v2886_v63 }
 0xd3a   : > { %v2901_v25 = vsub.f32 %v2900_v10, %v5763_v52  ;;  %v2907_v15 = vcombine.high %v5763_v52, %v5763_v52 }
 0xd3c   : > { %v2902_v16 = vmul.f32 1.442695, %v2901_v25  ;;  %v2914_v22 = vrot.slane %v2907_v15, %v5698_v12 }
 0xd3e   : > { %4494 = vpow2.f32 %v2902_v16  ;;  %v2915_v24 = vcombine.high %v2914_v22, %v2914_v22 }
 0xd3f   : > { %4496 = vtanh.f32 %v2850_v3 }
 0xd40   : > { %v2917_v27 = vsub.f32 %v2904_v23, %v2915_v24 }
 0xd42   : > { %v2918_v46 = vmul.f32 1.442695, %v2917_v27 }
 0xd44   : > { %4498 = vpow2.f32 %v2918_v46 }
 0xd48   : > { %v4495_v35 = vpop.eup %4494 }
 0xd49   : > { %v2921_v44 = vrot.slane %v4495_v35, 6  ;;  %v2923_v5 = vrot.slane %v4495_v35, 4  ;;  %v4497_v48 = vpop.eup %4496 }
 0xd4a   : > { %v2863_v54 = vmul.f32 %v4497_v48, %v2861_v34 }
 0xd4b   : > { %v2925_v6 = vsel %vm2653_vm2, %v2921_v44, %v2923_v5 }
 0xd4c   : > { %v2927_v41 = vrot.slane %v2925_v6, 6 }
 0xd4e   : > { %v4499_v31 = vpop.eup %4498  ;;  %v2929_v60 = vmul.f32 %v2927_v41, %v5718_v37 }
 0xd4f   : > { %v2930_v11 = vmul.f32 %v4499_v31, %v2863_v54  ;;  %v2932_v57 = vcombine.low %v4499_v31, %v4499_v31 }
 0xd51   : > { %v2939_v29 = vrot.slane %v2932_v57, %v5698_v12 }
 0xd53   : > { %v2941_v30 = vsel %vm2653_vm2, %v2930_v11, %v2939_v29 }
 0xd54   : > { %v2943_v17 = vrot.slane %v2941_v30, 6 }
 0xd56   : > { %v5774_v53 = vadd.f32 %v2943_v17, %v2929_v60 }
 0xd58   : > { %v2947_v21 = vrot.slane %v5774_v53, 2 }
 0xd5a   : > { %4500 = vrcp.f32 %v2947_v21 }
 0xd64   : > { %v4501_v3 = vpop.eup %4500 }
 0xd65   : > { %v2950_v62 = vmul.f32 %v4501_v3, %v5774_v53 }
 0xd67   : > { %4502 = vtanh.f32 %v2950_v62 }
 0xd71   : > { %v4503_v40 = vpop.eup %4502 }
 0xd72   : > { %v2955_v63 = vrot.slane %v4503_v40, 2 }
 0xd74   : > { %3022 = vmatmul.mubr.f32.vlgmr.msra.gmra.mrb[4].mxu0 %v2955_v63  ;;  %3093 = vmatmul.mubr.f32.vlgmr.msra.gmra.mrb[4].mxu1 %v2955_v63 }
 0xd75   : > { %4271 = vmatpush1.bf16.msra.mxu0 %v5503_v32  ;;  %4303 = vmatpush1.bf16.msra.mxu1 %v5507_v36 }
 0xd76   : > { %4273 = vmatprep.subr.bf16.mxu0 %v5511_v43  ;;  %4305 = vmatprep.subr.bf16.mxu1 %v5515_v2 }
 0xd77   : > { %3292 = vmatprep.mubr.f32.mxu0 %v4546_v56  ;;  %3363 = vmatprep.mubr.f32.mxu1 %v4546_v56  ;;  %v3557_v56 = vld [vmem:[%s4582_s18 + $0x10] sm:$0xff] }
 0xd79   : > { %4275 = vmatpush1.bf16.msra.mxu0 %v5523_v1  ;;  %4307 = vmatpush1.bf16.msra.mxu1 %v5527_v4 }
 0xd7a   : > { %4277 = vmatprep.subr.bf16.mxu0 %v5533_v47  ;;  %4309 = vmatprep.subr.bf16.mxu1 %v5537_v55 }
 0xd7d   : > { %4279 = vmatpush1.bf16.msra.mxu0 %v5545_v13  ;;  %4311 = vmatpush1.bf16.msra.mxu1 %v5549_v49 }
 0xd7e   : > { %4281 = vmatprep.subr.bf16.mxu0 %v5555_v51  ;;  %4313 = vmatprep.subr.bf16.mxu1 %v5559_v20 }
 0xd81   : > { %4283 = vmatpush1.bf16.msra.mxu0 %v5565_v18  ;;  %4315 = vmatpush1.bf16.msra.mxu1 %v5569_v38 }
 0xd82   : > { %4285 = vmatprep.subr.bf16.mxu0 %v5575_v42  ;;  %4317 = vmatprep.subr.bf16.mxu1 %v5579_v59 }
 0xd85   : > { %4287 = vmatpush1.bf16.msra.mxu0 %v5585_v61  ;;  %4319 = vmatpush1.bf16.msra.mxu1 %v5589_v7 }
 0xd86   : > { %4289 = vmatprep.subr.bf16.mxu0 %v5595_v14  ;;  %4321 = vmatprep.subr.bf16.mxu1 %v5599_v19 }
 0xd89   : > { %4291 = vmatpush1.bf16.msra.mxu0 %v5605_v33  ;;  %4323 = vmatpush1.bf16.msra.mxu1 %v5609_v28 }
 0xd8a   : > { %4293 = vmatprep.subr.bf16.mxu0 %v5615_v39  ;;  %4325 = vmatprep.subr.bf16.mxu1 %v5619_v45 }
 0xd8d   : > { %4295 = vmatpush1.bf16.msra.mxu0 %v5625_v8  ;;  %4327 = vmatpush1.bf16.msra.mxu1 %v5629_v9 }
 0xd8e   : > { %4297 = vmatprep.subr.bf16.mxu0 %v5635_v0  ;;  %4329 = vmatprep.subr.bf16.mxu1 %v5639_v58 }
 0xd91   : > { %4299 = vmatpush1.bf16.msra.mxu0 %v5645_v50  ;;  %4331 = vmatpush1.bf16.msra.mxu1 %v5649_v26 }
 0xe47   : > { %v3023_v32 = vpop.f32.mrb[4].mxu0  ;;  %v3094_v36 = vpop.f32.mrb[4].mxu1 }
 0xe48   : > { %v3025_v43 = vpop.f32.mrb[5].mxu0  ;;  %v3096_v2 = vpop.f32.mrb[5].mxu1 }
 0xe49   : > { %v3103_v1 = vcombine.low %v3023_v32, %v3025_v43  ;;  %v3104_v4 = vcombine.low %v3094_v36, %v3096_v2 }
 0xe4b   : > { %v3111_v47 = vrot.slane %v3103_v1, %v5698_v12  ;;  %v3118_v55 = vrot.slane %v3104_v4, %v5698_v12  ;;  %v3559_v1 = vld [vmem:[%s4582_s18 + $0x18] sm:$0xff] }
 0xe4d   : > { %v3119_v13 = vcombine.low %v3111_v47, %v3118_v55 }
 0xe4f   : > { %v3121_v49 = vadd.f32 %v3557_v56, %v3119_v13 }
 0xe51   : > { %v3123_v51 = vrot.slane %v3121_v49, 6  ;;  %v3156_v39 = vrot.slane %v3121_v49, %v5698_v12  ;;  %v3175_v15 = vrot.slane %v3121_v49, 4 }
 0xe53   : > { %v3558_v20 = vmul.f32 -1.442695, %v3123_v51  ;;  %v3157_v0 = vcombine.low %v3156_v39, %v3156_v39 }
 0xe55   : > { %4504 = vpow2.f32 %v3558_v20 }
 0xe5f   : > { %v4505_v18 = vpop.eup %4504 }
 0xe60   : > { %v3128_v38 = vadd.f32 1.0, %v4505_v18 }
 0xe62   : > { %4506 = vrcp.f32 %v3128_v38 }
 0xe6c   : > { %v4507_v42 = vpop.eup %4506 }
 0xe6d   : > { %v3135_v59 = vsub.f32 0.0, %v4507_v42  ;;  %v3161_v7 = vcombine.low %v4507_v42, %v4507_v42 }
 0xe6f   : > { %v3136_v61 = vmul.f32 1.442695, %v3135_v59  ;;  %v3168_v33 = vrot.slane %v3161_v7, %v5698_v12 }
 0xe71   : > { %4508 = vpow2.f32 %v3136_v61  ;;  %v3169_v8 = vcombine.low %v3168_v33, %v3168_v33 }
 0xe73   : > { %v3171_v50 = vsub.f32 %v5763_v52, %v3169_v8 }
 0xe7b   : > { %v4509_v14 = vpop.eup %4508 }
 0xe7c   : > { %v3139_v19 = vcombine.low %v4509_v14, %v4509_v14 }
 0xe7e   : > { %v3146_v28 = vrot.slane %v3139_v19, %v5698_v12 }
 0xe80   : > { %v3147_v45 = vcombine.low %v3146_v28, %v3146_v28 }
 0xe82   : > { %v3149_v9 = vmul.f32 %v3147_v45, %v5763_v52  ;;  %v3132_v52 = vrot.slane %v3121_v49, 2 }
 0xe84   : > { %v5817_v58 = vmax.f32 %v3149_v9, %v3157_v0 }
 0xe86   : > { %v3172_v26 = vsub.f32 %v3171_v50, %v5817_v58  ;;  %v3178_v37 = vcombine.high %v5817_v58, %v5817_v58 }
 0xe88   : > { %v3173_v10 = vmul.f32 1.442695, %v3172_v26  ;;  %v3185_v25 = vrot.slane %v3178_v37, %v5698_v12 }
 0xe8a   : > { %4510 = vpow2.f32 %v3173_v10  ;;  %v3186_v16 = vcombine.high %v3185_v25, %v3185_v25 }
 0xe8b   : > { %4512 = vtanh.f32 %v3121_v49 }
 0xe8c   : > { %v3188_v22 = vsub.f32 %v3175_v15, %v3186_v16 }
 0xe8e   : > { %v3189_v23 = vmul.f32 1.442695, %v3188_v22 }
 0xe90   : > { %4514 = vpow2.f32 %v3189_v23 }
 0xe94   : > { %v4511_v24 = vpop.eup %4510 }
 0xe95   : > { %v3192_v27 = vrot.slane %v4511_v24, 6  ;;  %v3194_v46 = vrot.slane %v4511_v24, 4  ;;  %v4513_v35 = vpop.eup %4512 }
 0xe96   : > { %v3134_v44 = vmul.f32 %v4513_v35, %v3132_v52 }
 0xe97   : > { %v3196_v5 = vsel %vm2653_vm2, %v3192_v27, %v3194_v46 }
 0xe98   : > { %v3198_v6 = vrot.slane %v3196_v5, 6 }
 0xe9a   : > { %v4515_v48 = vpop.eup %4514  ;;  %v3200_v57 = vmul.f32 %v3198_v6, %v5774_v53 }
 0xe9b   : > { %v3201_v34 = vmul.f32 %v4515_v48, %v3134_v44  ;;  %v3203_v54 = vcombine.low %v4515_v48, %v4515_v48 }
 0xe9d   : > { %v3210_v31 = vrot.slane %v3203_v54, %v5698_v12 }
 0xe9f   : > { %v3212_v11 = vsel %vm2653_vm2, %v3201_v34, %v3210_v31 }
 0xea0   : > { %v3214_v41 = vrot.slane %v3212_v11, 6 }
 0xea2   : > { %v5828_v29 = vadd.f32 %v3214_v41, %v3200_v57 }
 0xea4   : > { %v3218_v30 = vrot.slane %v5828_v29, 2 }
 0xea6   : > { %4516 = vrcp.f32 %v3218_v30 }
 0xeb0   : > { %v4517_v60 = vpop.eup %4516 }
 0xeb1   : > { %v3221_v17 = vmul.f32 %v4517_v60, %v5828_v29 }
 0xeb3   : > { %4518 = vtanh.f32 %v3221_v17 }
 0xebd   : > { %v4519_v21 = vpop.eup %4518 }
 0xebe   : > { %v3226_v3 = vrot.slane %v4519_v21, 2 }
 0xec0   : > { %3293 = vmatmul.mubr.f32.vlgmr.msra.gmra.mrb[6].mxu0 %v3226_v3  ;;  %3364 = vmatmul.mubr.f32.vlgmr.msra.gmra.mrb[6].mxu1 %v3226_v3 }
 0xf93   : > { %v3294_v62 = vpop.f32.mrb[6].mxu0  ;;  %v3365_v40 = vpop.f32.mrb[6].mxu1 }
 0xf94   : > { %v3296_v63 = vpop.f32.mrb[7].mxu0  ;;  %v3367_v32 = vpop.f32.mrb[7].mxu1 }
 0xf95   : > { %v3374_v53 = vcombine.low %v3294_v62, %v3296_v63  ;;  %v3375_v36 = vcombine.low %v3365_v40, %v3367_v32 }
 0xf97   : > { %v3382_v43 = vrot.slane %v3374_v53, %v5698_v12  ;;  %v3389_v2 = vrot.slane %v3375_v36, %v5698_v12 }
 0xf99   : > { %v3390_v4 = vcombine.low %v3382_v43, %v3389_v2 }
 0xf9b   : > { %v3392_v47 = vadd.f32 %v3559_v1, %v3390_v4 }
 0xf9d   : > { %v3394_v55 = vrot.slane %v3392_v47, 6  ;;  %v3427_v14 = vrot.slane %v3392_v47, %v5698_v12  ;;  %v3446_v37 = vrot.slane %v3392_v47, 4  ;;  %v3403_v27 = vrot.slane %v3392_v47, 2 }
 0xf9f   : > { %v3560_v56 = vmul.f32 -1.442695, %v3394_v55  ;;  %v3428_v39 = vcombine.low %v3427_v14, %v3427_v14 }
 0xfa1   : > { %4520 = vpow2.f32 %v3560_v56 }
 0xfab   : > { %v4521_v13 = vpop.eup %4520 }
 0xfac   : > { %v3399_v49 = vadd.f32 1.0, %v4521_v13 }
 0xfae   : > { %4522 = vrcp.f32 %v3399_v49 }
 0xfb8   : > { %v4523_v51 = vpop.eup %4522 }
 0xfb9   : > { %v3406_v20 = vsub.f32 0.0, %v4523_v51  ;;  %v3432_v38 = vcombine.low %v4523_v51, %v4523_v51 }
 0xfbb   : > { %v3407_v18 = vmul.f32 1.442695, %v3406_v20  ;;  %v3439_v61 = vrot.slane %v3432_v38, %v5698_v12 }
 0xfbd   : > { %4524 = vpow2.f32 %v3407_v18  ;;  %v3440_v33 = vcombine.low %v3439_v61, %v3439_v61 }
 0xfbf   : > { %v3442_v8 = vsub.f32 %v5817_v58, %v3440_v33 }
 0xfc7   : > { %v4525_v42 = vpop.eup %4524 }
 0xfc8   : > { %v3410_v59 = vcombine.low %v4525_v42, %v4525_v42 }
 0xfca   : > { %v3417_v7 = vrot.slane %v3410_v59, %v5698_v12 }
 0xfcc   : > { %v3418_v19 = vcombine.low %v3417_v7, %v3417_v7 }
 0xfce   : > { %v3420_v28 = vmul.f32 %v3418_v19, %v5817_v58 }
 0xfd0   : > { %v3430_v45 = vmax.f32 %v3420_v28, %v3428_v39 }
 0xfd2   : > { %v3443_v9 = vsub.f32 %v3442_v8, %v3430_v45  ;;  %v3449_v0 = vcombine.high %v3430_v45, %v3430_v45 }
 0xfd4   : > { %v3444_v50 = vmul.f32 1.442695, %v3443_v9  ;;  %v3456_v26 = vrot.slane %v3449_v0, %v5698_v12 }
 0xfd6   : > { %4526 = vpow2.f32 %v3444_v50  ;;  %v3457_v10 = vcombine.high %v3456_v26, %v3456_v26 }
 0xfd7   : > { %4528 = vtanh.f32 %v3392_v47 }
 0xfd8   : > { %v3459_v25 = vsub.f32 %v3446_v37, %v3457_v10 }
 0xfda   : > { %v3460_v15 = vmul.f32 1.442695, %v3459_v25 }
 0xfdc   : > { %4530 = vpow2.f32 %v3460_v15 }
 0xfe0   : > { %v4527_v16 = vpop.eup %4526 }
 0xfe1   : > { %v3463_v22 = vrot.slane %v4527_v16, 6  ;;  %v3465_v23 = vrot.slane %v4527_v16, 4  ;;  %v4529_v24 = vpop.eup %4528 }
 0xfe2   : > { %v3405_v46 = vmul.f32 %v4529_v24, %v3403_v27 }
 0xfe3   : > { %v3467_v58 = vsel %vm2653_vm2, %v3463_v22, %v3465_v23 }
 0xfe4   : > { %v3469_v5 = vrot.slane %v3467_v58, 6 }
 0xfe6   : > { %v4531_v35 = vpop.eup %4530  ;;  %v3471_v54 = vmul.f32 %v3469_v5, %v5828_v29 }
 0xfe7   : > { %v3472_v52 = vmul.f32 %v4531_v35, %v3405_v46  ;;  %v3474_v44 = vcombine.low %v4531_v35, %v4531_v35 }
 0xfe9   : > { %v3481_v48 = vrot.slane %v3474_v44, %v5698_v12 }
 0xfeb   : > { %v3483_v34 = vsel %vm2653_vm2, %v3472_v52, %v3481_v48 }
 0xfec   : > { %v3485_v6 = vrot.slane %v3483_v34, 6 }
 0xfee   : > { %v3487_v31 = vadd.f32 %v3485_v6, %v3471_v54 }
 0xff0   : > { %v3489_v11 = vrot.slane %v3487_v31, 2 }
 0xff2   : > { %4532 = vrcp.f32 %v3489_v11 }
 0xffc   : > { %v4533_v57 = vpop.eup %4532 }
 0xffd   : > { %v3492_v41 = vmul.f32 %v4533_v57, %v3487_v31 }
 0xfff   : > { %4534 = vtanh.f32 %v3492_v41 }
0x1009   : > { %v4535_v30 = vpop.eup %4534 }
0x100a   : > { %v3495_v60 = vrot.slane %v4535_v30, 2 }
0x100c   : > { %v3497_v17 = vsel %vm2653_vm2, %v3495_v60, %v3487_v31 }
0x100d   : > { %v3499_v21 = vsel %vm3498_vm3, %v3497_v17, %v3430_v45 }
0x100e   : > { %3500 = vst [vmem:[%s5855_s3] sm:$0xff] %v3499_v21 }
0x100f PF: > { %s13_s12 = sadd.s32 1, %s4542_s12  }
0x1010   : > { %p10_p7 = scmp.ge.s32.totalorder %s13_s12, 4  }
0x1012   :  { %12 = sbr.rel (!%p10_p7) target bundleno = 1 (0x1), region = 80 }

</bundles_post_ra>
